<compile_context>
chip_gen: v7x
topology: tpu7x:2x2x1
jax: 0.10.0
libtpu: 0.0.40
codegen_flags: <defaults>
</compile_context>

<pallas_src>
import functools
import math

import jax
import jax.numpy as jnp
from jax.experimental import pallas as pl
from jax.experimental.pallas import tpu as pltpu


# ---------------------------------------------------------------------------
# In-kernel building blocks
# ---------------------------------------------------------------------------

def _conv_taps(xflat, w_ref, *, H, W, k):
    """'same' kxk conv as k*k shifted (M,C)@(C,N) MXU matmuls, f32 accumulate.

    xflat: (L, C) bf16 value. The input was zero-padded with p=k//2 rows in H,
           flattened row-major over (H+2p, W), then padded with p extra flat rows
           at each end, so every tap is a contiguous static slice of length M=H*W.
    w_ref: (k*k, C, N) ref with tap-major HWIO conv weights.
    """
    p = k // 2
    M = H * W
    ri = jax.lax.broadcasted_iota(jnp.int32, (M, 1), 0)
    col = (ri & (W - 1)) if (W & (W - 1)) == 0 else (ri % W)   # output column index

    acc = None
    for dy in range(k):
        for dx in range(-p, p + 1):
            start = p + dy * W + dx
            xs = xflat[start:start + M, :]
            # Zero the rows whose tap would wrap across an image row boundary
            # (these positions must read the W-halo, i.e. zero).
            if dx > 0:
                xs = jnp.where(col < (W - dx), xs, 0)
            elif dx < 0:
                xs = jnp.where(col >= (-dx), xs, 0)
            t = jnp.dot(xs, w_ref[dy * k + (dx + p)],
                        preferred_element_type=jnp.float32)
            acc = t if acc is None else acc + t
    return acc                                                  # (M, N) f32


def _groupnorm_silu(y, gamma, beta, *, groups, eps):
    """Single-pass GroupNorm(groups) + SiLU on a (M, N) f32 conv result."""
    M, N = y.shape
    cg = N // groups
    inv = 1.0 / float(M * cg)
    s1 = jnp.sum(y, axis=0, keepdims=True)                      # (1, N) sublane reduce
    s2 = jnp.sum(y * y, axis=0, keepdims=True)                  # (1, N)
    lane = jax.lax.broadcasted_iota(jnp.int32, (1, N), 1)
    mean_l = jnp.zeros((1, N), jnp.float32)
    rstd_l = jnp.zeros((1, N), jnp.float32)
    for g in range(groups):                                     # static unroll (groups == 2)
        m = (lane >= g * cg) & (lane < (g + 1) * cg)
        mu = jnp.sum(jnp.where(m, s1, 0.0), axis=1, keepdims=True) * inv    # (1, 1)
        ex2 = jnp.sum(jnp.where(m, s2, 0.0), axis=1, keepdims=True) * inv   # (1, 1)
        rstd = jax.lax.rsqrt(ex2 - mu * mu + eps)
        mean_l = jnp.where(m, mu, mean_l)
        rstd_l = jnp.where(m, rstd, rstd_l)
    scale = rstd_l * gamma                                      # (1, N)
    shift = beta - mean_l * scale                               # (1, N)
    yn = y * scale + shift
    return yn * jax.nn.sigmoid(yn)                              # SiLU, f32


# ---------------------------------------------------------------------------
# Pallas kernels
# ---------------------------------------------------------------------------

def _convsc_kernel(x_ref, w_ref, b_ref, gamma_ref, beta_ref, o_ref,
                   *, H, W, k, groups, eps):
    """One ConvSC layer (conv + bias + GroupNorm + SiLU) for one sample."""
    y = _conv_taps(x_ref[0], w_ref, H=H, W=W, k=k) + b_ref[...]
    act = _groupnorm_silu(y, gamma_ref[...], beta_ref[...], groups=groups, eps=eps)
    o_ref[0] = act.astype(o_ref.dtype)


def _convsc_skip_readout_kernel(x_ref, skip_ref, w_ref, b_ref, gamma_ref,
                                beta_ref, row_ref, rob_ref, o_ref,
                                *, H, W, k, groups, eps):
    """Last ConvSC layer with fused skip add and fused 1x1 readout."""
    xsum = x_ref[0] + skip_ref[0]                               # fused (hid + enc1) in VMEM
    y = _conv_taps(xsum, w_ref, H=H, W=W, k=k) + b_ref[...]
    act = _groupnorm_silu(y, gamma_ref[...], beta_ref[...], groups=groups, eps=eps)
    # Fused 1x1 readout, emitted transposed as (C_out, M): lane-dense store and the
    # host-side result reshapes straight to NCHW (no output transpose needed).
    out = jax.lax.dot_general(row_ref[...], act,
                              dimension_numbers=(((1,), (1,)), ((), ())),
                              preferred_element_type=jnp.float32)
    o_ref[0] = out + rob_ref[...]                               # (C_out, M) + (C_out, 1)


# ---------------------------------------------------------------------------
# pallas_call wrappers
# ---------------------------------------------------------------------------

def _vmem_limit_bytes(block_bytes):
    # Derived from actual block bytes; never the full physical VMEM of a v7x TC
    # (64 MiB) - clamp to [default 32 MiB, 48 MiB].
    return int(min(48 * 1024 * 1024, max(32 * 1024 * 1024, 4 * block_bytes)))


def convsc_pallas(xflat, w, b, gamma, beta, *, H, W, k, groups=2, eps=1e-5,
                  out_dtype=jnp.bfloat16):
    """xflat: (B, L, C) bf16 (H-halo padded + flattened); w: (k*k, C, N) bf16."""
    B, L, C = xflat.shape
    KK, _, N = w.shape
    M = H * W
    kernel = functools.partial(_convsc_kernel, H=H, W=W, k=k, groups=groups, eps=eps)
    blk = L * C * 2 + KK * C * N * 2 + 3 * N * 4 + M * N * 4 + 14 * M * max(N, C) * 4
    return pl.pallas_call(
        kernel,
        out_shape=jax.ShapeDtypeStruct((B, M, N), out_dtype),
        grid=(B,),
        in_specs=[
            pl.BlockSpec((1, L, C), lambda i: (i, 0, 0)),
            pl.BlockSpec((KK, C, N), lambda i: (0, 0, 0)),
            pl.BlockSpec((1, N), lambda i: (0, 0)),
            pl.BlockSpec((1, N), lambda i: (0, 0)),
            pl.BlockSpec((1, N), lambda i: (0, 0)),
        ],
        out_specs=pl.BlockSpec((1, M, N), lambda i: (i, 0, 0)),
        compiler_params=pltpu.CompilerParams(
            dimension_semantics=("parallel",),
            vmem_limit_bytes=_vmem_limit_bytes(blk)),
    )(xflat, w, b.reshape(1, N), gamma.reshape(1, N), beta.reshape(1, N))


def convsc_skip_readout_pallas(xflat, skipflat, w, b, gamma, beta, ro_w, ro_b,
                               *, H, W, k, groups=2, eps=1e-5):
    """Last ConvSC: fused (x + skip) -> conv -> GN -> SiLU -> 1x1 readout.

    Returns (B, C_out, H*W) f32 (directly reshapeable to NCHW)."""
    B, L, C = xflat.shape
    KK, _, N = w.shape
    C_out = ro_w.shape[0]
    M = H * W
    kernel = functools.partial(_convsc_skip_readout_kernel, H=H, W=W, k=k,
                               groups=groups, eps=eps)
    blk = (2 * L * C * 2 + KK * C * N * 2 + 3 * N * 4 + C_out * (C + 1) * 4
           + C_out * M * 4 + 16 * M * max(N, C) * 4)
    return pl.pallas_call(
        kernel,
        out_shape=jax.ShapeDtypeStruct((B, C_out, M), jnp.float32),
        grid=(B,),
        in_specs=[
            pl.BlockSpec((1, L, C), lambda i: (i, 0, 0)),
            pl.BlockSpec((1, L, C), lambda i: (i, 0, 0)),
            pl.BlockSpec((KK, C, N), lambda i: (0, 0, 0)),
            pl.BlockSpec((1, N), lambda i: (0, 0)),
            pl.BlockSpec((1, N), lambda i: (0, 0)),
            pl.BlockSpec((1, N), lambda i: (0, 0)),
            pl.BlockSpec((C_out, C), lambda i: (0, 0)),
            pl.BlockSpec((C_out, 1), lambda i: (0, 0)),
        ],
        out_specs=pl.BlockSpec((1, C_out, M), lambda i: (i, 0, 0)),
        compiler_params=pltpu.CompilerParams(
            dimension_semantics=("parallel",),
            vmem_limit_bytes=_vmem_limit_bytes(blk)),
    )(xflat, skipflat, w, b.reshape(1, N), gamma.reshape(1, N),
      beta.reshape(1, N), ro_w, ro_b.reshape(C_out, 1))


# ---------------------------------------------------------------------------
# Wrapper-side layout plumbing (pure data movement, no FLOPs)
# ---------------------------------------------------------------------------

def _pad_flatten(x_nhwc, p):
    """(B,H,W,C) -> (B, (H+2p)*W + 2p, C): zero-pad the H halo, flatten rows, and
    pad p extra flat rows per end so every conv tap is a contiguous slice."""
    B, H, W, C = x_nhwc.shape
    xp = jnp.pad(x_nhwc, ((0, 0), (p, p), (0, 0), (0, 0)))
    xf = xp.reshape(B, (H + 2 * p) * W, C)
    return jnp.pad(xf, ((0, 0), (p, p), (0, 0)))


def _pixel_shuffle_nhwc(y, r=2):
    """PixelShuffle(r) in NHWC: (B, H, W, C*r*r) -> (B, H*r, W*r, C)."""
    B, H, W, Cr2 = y.shape
    C = Cr2 // (r * r)
    y = y.reshape(B, H, W, C, r, r).transpose(0, 1, 4, 2, 5, 3)
    return y.reshape(B, H * r, W * r, C)


def sampling_generator(N, reverse=False):
    samplings = [False, True] * (N // 2)
    if reverse:
        return list(reversed(samplings[:N]))
    return samplings[:N]


# ---------------------------------------------------------------------------
# Decoder module
# ---------------------------------------------------------------------------

class DecoderPallas:
    """Pallas implementation of the SimVP Decoder forward pass (NCHW in/out)."""

    def __init__(self, C_hid, C_out, N_S, spatio_kernel, key, eps=1e-5):
        self.C_hid, self.C_out, self.k, self.eps = C_hid, C_out, spatio_kernel, eps
        self.p = spatio_kernel // 2
        self.samplings = sampling_generator(N_S, reverse=True)
        assert not self.samplings[-1], "last ConvSC is never upsampling"

        keys = jax.random.split(key, len(self.samplings) + 2)
        self.dec = []
        for li, s in enumerate(self.samplings):
            n_out = C_hid * 4 if s else C_hid
            # trunc_normal_(std=0.02, a=-2, b=2): bounds are +-100 sigma, so a
            # plain normal is numerically identical.
            w_hwio = 0.02 * jax.random.normal(
                keys[li], (self.k, self.k, C_hid, n_out), jnp.float32)
            self.dec.append(dict(
                upsampling=s,
                w_hwio=w_hwio,
                w_taps=w_hwio.reshape(self.k * self.k, C_hid, n_out),
                b=jnp.zeros((n_out,), jnp.float32),
                gamma=jnp.ones((C_hid,), jnp.float32),   # GroupNorm(2, C_hid)
                beta=jnp.zeros((C_hid,), jnp.float32),
            ))
        bound = 1.0 / math.sqrt(C_hid)                    # nn.Conv2d default init
        self.ro_w = jax.random.uniform(
            keys[-2], (C_out, C_hid), jnp.float32, -bound, bound)
        self.ro_b = jax.random.uniform(
            keys[-1], (C_out,), jnp.float32, -bound, bound)

    def _affine(self, layer):
        if layer["upsampling"]:
            # GroupNorm(2)+SiLU commute with PixelShuffle(2) when applied on the
            # pre-shuffle channels with gamma/beta expanded per (ch // 4); the two
            # groups stay contiguous halves of the 4*C channels.
            return jnp.repeat(layer["gamma"], 4), jnp.repeat(layer["beta"], 4)
        return layer["gamma"], layer["beta"]

    def _convsc(self, x, layer):
        B, H, W, _ = x.shape
        gamma, beta = self._affine(layer)
        xf = _pad_flatten(x, self.p)
        n_out = layer["w_taps"].shape[-1]
        y = convsc_pallas(xf, layer["w_taps"].astype(jnp.bfloat16), layer["b"],
                          gamma, beta, H=H, W=W, k=self.k, eps=self.eps,
                          out_dtype=jnp.bfloat16)
        y = y.reshape(B, H, W, n_out)
        if layer["upsampling"]:
            y = _pixel_shuffle_nhwc(y, 2)
        return y

    def __call__(self, hid_nchw, enc1_nchw):
        x = jnp.transpose(hid_nchw, (0, 2, 3, 1)).astype(jnp.bfloat16)
        skip = jnp.transpose(enc1_nchw, (0, 2, 3, 1)).astype(jnp.bfloat16)
        for layer in self.dec[:-1]:
            x = self._convsc(x, layer)
        last = self.dec[-1]
        B, H, W, _ = x.shape
        gamma, beta = self._affine(last)
        out = convsc_skip_readout_pallas(
            _pad_flatten(x, self.p), _pad_flatten(skip, self.p),
            last["w_taps"].astype(jnp.bfloat16), last["b"], gamma, beta,
            self.ro_w, self.ro_b, H=H, W=W, k=self.k, eps=self.eps)
        return out.reshape(B, self.C_out, H, W)           # already NCHW

    # -- pure-JAX reference (XLA conv) for a correctness cross-check ----------
    def reference(self, hid_nchw, enc1_nchw):
        def convsc_ref(x, layer):
            p = self.p
            y = jax.lax.conv_general_dilated(
                x, layer["w_hwio"], window_strides=(1, 1),
                padding=((p, p), (p, p)),
                dimension_numbers=("NHWC", "HWIO", "NHWC")) + layer["b"]
            if layer["upsampling"]:
                y = _pixel_shuffle_nhwc(y, 2)
            B, H, W, C = y.shape
            yg = y.reshape(B, H, W, 2, C // 2)
            mu = yg.mean(axis=(1, 2, 4), keepdims=True)
            var = ((yg - mu) ** 2).mean(axis=(1, 2, 4), keepdims=True)
            yn = ((yg - mu) * jax.lax.rsqrt(var + self.eps)).reshape(B, H, W, C)
            yn = yn * layer["gamma"] + layer["beta"]
            return yn * jax.nn.sigmoid(yn)

        x = jnp.transpose(hid_nchw, (0, 2, 3, 1)).astype(jnp.float32)
        enc1 = jnp.transpose(enc1_nchw, (0, 2, 3, 1)).astype(jnp.float32)
        for layer in self.dec[:-1]:
            x = convsc_ref(x, layer)
        x = convsc_ref(x + enc1, self.dec[-1])
        y = jnp.einsum("bhwc,oc->bhwo", x, self.ro_w) + self.ro_b
        return jnp.transpose(y, (0, 3, 1, 2))


if __name__ == "__main__":
    key = jax.random.PRNGKey(0)
    B, C_hid, C_out, H, W = 2, 16, 4, 16, 16
    N_S, spatio_kernel = 2, 3

    k_hid, k_enc, k_par = jax.random.split(key, 3)
    hid = jax.random.normal(k_hid, (B, C_hid, H, W), jnp.float32)
    # dec[0] upsamples 2x, so the skip connection lives at (2H, 2W).
    enc1 = jax.random.normal(k_enc, (B, C_hid, 2 * H, 2 * W), jnp.float32)

    model = DecoderPallas(C_hid, C_out, N_S, spatio_kernel, key=k_par)

    y = jax.block_until_ready(model(hid, enc1))
    y_ref = jax.block_until_ready(model.reference(hid, enc1))

    rel_err = float(jnp.max(jnp.abs(y - y_ref)) / (jnp.max(jnp.abs(y_ref)) + 1e-6))
    ok = (
        y.shape == (B, C_out, 2 * H, 2 * W)
        and bool(jnp.all(jnp.isfinite(y)))
        and rel_err < 5e-2
    )
    if ok:
        print("KERNEL_OK")
    else:
        print(f"KERNEL_MISMATCH rel_err={rel_err:.3e}")
</pallas_src>

<mosaic_0001>
module attributes {stable_mosaic.version = 11 : i64} {
  func.func @_convsc_kernel(%arg0: i32, %arg1: memref<1x290x16xbf16, #tpu.memory_space<vmem>>, %arg2: memref<9x16x64xbf16, #tpu.memory_space<vmem>>, %arg3: memref<1x64xf32, #tpu.memory_space<vmem>>, %arg4: memref<1x64xf32, #tpu.memory_space<vmem>>, %arg5: memref<1x64xf32, #tpu.memory_space<vmem>>, %arg6: memref<1x256x64xbf16, #tpu.memory_space<vmem>>) attributes {dimension_semantics = [#tpu.dimension_semantics<parallel>], iteration_bounds = array<i64: 2>, scalar_prefetch = 0 : i64, scratch_operands = 0 : i64, tpu.core_type = #tpu.core_type<tc>, window_params = [{transform_indices = @transform_0, window_bounds = array<i64: 1, 290, 16>}, {pipeline_mode = #tpu.pipeline_mode<synchronous>, transform_indices = @transform_1, window_bounds = array<i64: 9, 16, 64>}, {pipeline_mode = #tpu.pipeline_mode<synchronous>, transform_indices = @transform_2, window_bounds = array<i64: 1, 64>}, {pipeline_mode = #tpu.pipeline_mode<synchronous>, transform_indices = @transform_3, window_bounds = array<i64: 1, 64>}, {pipeline_mode = #tpu.pipeline_mode<synchronous>, transform_indices = @transform_4, window_bounds = array<i64: 1, 64>}, {transform_indices = @transform_5, window_bounds = array<i64: 1, 256, 64>}]} {
    %c0 = arith.constant 0 : index
    %c0_0 = arith.constant 0 : index
    %c0_1 = arith.constant 0 : index
    %0 = vector.load %arg1[%c0, %c0_0, %c0_1] : memref<1x290x16xbf16, #tpu.memory_space<vmem>>, vector<1x290x16xbf16>
    %1 = vector.shape_cast %0 : vector<1x290x16xbf16> to vector<290x16xbf16>
    %2 = tpu.iota {dimensions = array<i32: 0>} : vector<256x1xi32>
    %c15_i32 = arith.constant 15 : i32
    %3 = vector.broadcast %c15_i32 : i32 to vector<256x1xi32>
    %4 = arith.andi %2, %3 : vector<256x1xi32>
    %5 = vector.extract_strided_slice %1 {offsets = [0, 0], sizes = [256, 16], strides = [1, 1]} : vector<290x16xbf16> to vector<256x16xbf16>
    %c1_i32 = arith.constant 1 : i32
    %6 = vector.broadcast %c1_i32 : i32 to vector<256x1xi32>
    %7 = arith.cmpi sge, %4, %6 : vector<256x1xi32>
    %c0_i32 = arith.constant 0 : i32
    %8 = arith.sitofp %c0_i32 : i32 to bf16
    %9 = vector.shape_cast %7 : vector<256x1xi1> to vector<256x1xi1>
    %10 = vector.broadcast %9 : vector<256x1xi1> to vector<256x16xi1>
    %11 = vector.broadcast %8 : bf16 to vector<256x16xbf16>
    %12 = arith.select %10, %5, %11 : vector<256x16xi1>, vector<256x16xbf16>
    %c0_2 = arith.constant 0 : index
    %c0_3 = arith.constant 0 : index
    %c0_4 = arith.constant 0 : index
    %13 = vector.load %arg2[%c0_2, %c0_3, %c0_4] : memref<9x16x64xbf16, #tpu.memory_space<vmem>>, vector<1x16x64xbf16>
    %14 = vector.shape_cast %13 : vector<1x16x64xbf16> to vector<16x64xbf16>
    %cst = arith.constant dense<0.000000e+00> : vector<256x64xf32>
    %15 = tpu.matmul %12, %14, %cst {dimension_numbers = #tpu.dot_dimension_numbers<[1], [0], [0], [1], [0, 0, 1, 1], [], []>} : vector<256x16xbf16>, vector<16x64xbf16>, vector<256x64xf32> -> vector<256x64xf32>
    %16 = vector.extract_strided_slice %1 {offsets = [1, 0], sizes = [256, 16], strides = [1, 1]} : vector<290x16xbf16> to vector<256x16xbf16>
    %c1 = arith.constant 1 : index
    %c0_5 = arith.constant 0 : index
    %c0_6 = arith.constant 0 : index
    %17 = vector.load %arg2[%c1, %c0_5, %c0_6] : memref<9x16x64xbf16, #tpu.memory_space<vmem>>, vector<1x16x64xbf16>
    %18 = vector.shape_cast %17 : vector<1x16x64xbf16> to vector<16x64xbf16>
    %cst_7 = arith.constant dense<0.000000e+00> : vector<256x64xf32>
    %19 = tpu.matmul %16, %18, %cst_7 {dimension_numbers = #tpu.dot_dimension_numbers<[1], [0], [0], [1], [0, 0, 1, 1], [], []>} : vector<256x16xbf16>, vector<16x64xbf16>, vector<256x64xf32> -> vector<256x64xf32>
    %20 = arith.addf %15, %19 : vector<256x64xf32>
    %21 = vector.extract_strided_slice %1 {offsets = [2, 0], sizes = [256, 16], strides = [1, 1]} : vector<290x16xbf16> to vector<256x16xbf16>
    %c15_i32_8 = arith.constant 15 : i32
    %22 = vector.broadcast %c15_i32_8 : i32 to vector<256x1xi32>
    %23 = arith.cmpi slt, %4, %22 : vector<256x1xi32>
    %c0_i32_9 = arith.constant 0 : i32
    %24 = arith.sitofp %c0_i32_9 : i32 to bf16
    %25 = vector.shape_cast %23 : vector<256x1xi1> to vector<256x1xi1>
    %26 = vector.broadcast %25 : vector<256x1xi1> to vector<256x16xi1>
    %27 = vector.broadcast %24 : bf16 to vector<256x16xbf16>
    %28 = arith.select %26, %21, %27 : vector<256x16xi1>, vector<256x16xbf16>
    %c2 = arith.constant 2 : index
    %c0_10 = arith.constant 0 : index
    %c0_11 = arith.constant 0 : index
    %29 = vector.load %arg2[%c2, %c0_10, %c0_11] : memref<9x16x64xbf16, #tpu.memory_space<vmem>>, vector<1x16x64xbf16>
    %30 = vector.shape_cast %29 : vector<1x16x64xbf16> to vector<16x64xbf16>
    %cst_12 = arith.constant dense<0.000000e+00> : vector<256x64xf32>
    %31 = tpu.matmul %28, %30, %cst_12 {dimension_numbers = #tpu.dot_dimension_numbers<[1], [0], [0], [1], [0, 0, 1, 1], [], []>} : vector<256x16xbf16>, vector<16x64xbf16>, vector<256x64xf32> -> vector<256x64xf32>
    %32 = arith.addf %20, %31 : vector<256x64xf32>
    %33 = vector.extract_strided_slice %1 {offsets = [16, 0], sizes = [256, 16], strides = [1, 1]} : vector<290x16xbf16> to vector<256x16xbf16>
    %c1_i32_13 = arith.constant 1 : i32
    %34 = vector.broadcast %c1_i32_13 : i32 to vector<256x1xi32>
    %35 = arith.cmpi sge, %4, %34 : vector<256x1xi32>
    %c0_i32_14 = arith.constant 0 : i32
    %36 = arith.sitofp %c0_i32_14 : i32 to bf16
    %37 = vector.shape_cast %35 : vector<256x1xi1> to vector<256x1xi1>
    %38 = vector.broadcast %37 : vector<256x1xi1> to vector<256x16xi1>
    %39 = vector.broadcast %36 : bf16 to vector<256x16xbf16>
    %40 = arith.select %38, %33, %39 : vector<256x16xi1>, vector<256x16xbf16>
    %c3 = arith.constant 3 : index
    %c0_15 = arith.constant 0 : index
    %c0_16 = arith.constant 0 : index
    %41 = vector.load %arg2[%c3, %c0_15, %c0_16] : memref<9x16x64xbf16, #tpu.memory_space<vmem>>, vector<1x16x64xbf16>
    %42 = vector.shape_cast %41 : vector<1x16x64xbf16> to vector<16x64xbf16>
    %cst_17 = arith.constant dense<0.000000e+00> : vector<256x64xf32>
    %43 = tpu.matmul %40, %42, %cst_17 {dimension_numbers = #tpu.dot_dimension_numbers<[1], [0], [0], [1], [0, 0, 1, 1], [], []>} : vector<256x16xbf16>, vector<16x64xbf16>, vector<256x64xf32> -> vector<256x64xf32>
    %44 = arith.addf %32, %43 : vector<256x64xf32>
    %45 = vector.extract_strided_slice %1 {offsets = [17, 0], sizes = [256, 16], strides = [1, 1]} : vector<290x16xbf16> to vector<256x16xbf16>
    %c4 = arith.constant 4 : index
    %c0_18 = arith.constant 0 : index
    %c0_19 = arith.constant 0 : index
    %46 = vector.load %arg2[%c4, %c0_18, %c0_19] : memref<9x16x64xbf16, #tpu.memory_space<vmem>>, vector<1x16x64xbf16>
    %47 = vector.shape_cast %46 : vector<1x16x64xbf16> to vector<16x64xbf16>
    %cst_20 = arith.constant dense<0.000000e+00> : vector<256x64xf32>
    %48 = tpu.matmul %45, %47, %cst_20 {dimension_numbers = #tpu.dot_dimension_numbers<[1], [0], [0], [1], [0, 0, 1, 1], [], []>} : vector<256x16xbf16>, vector<16x64xbf16>, vector<256x64xf32> -> vector<256x64xf32>
    %49 = arith.addf %44, %48 : vector<256x64xf32>
    %50 = vector.extract_strided_slice %1 {offsets = [18, 0], sizes = [256, 16], strides = [1, 1]} : vector<290x16xbf16> to vector<256x16xbf16>
    %c15_i32_21 = arith.constant 15 : i32
    %51 = vector.broadcast %c15_i32_21 : i32 to vector<256x1xi32>
    %52 = arith.cmpi slt, %4, %51 : vector<256x1xi32>
    %c0_i32_22 = arith.constant 0 : i32
    %53 = arith.sitofp %c0_i32_22 : i32 to bf16
    %54 = vector.shape_cast %52 : vector<256x1xi1> to vector<256x1xi1>
    %55 = vector.broadcast %54 : vector<256x1xi1> to vector<256x16xi1>
    %56 = vector.broadcast %53 : bf16 to vector<256x16xbf16>
    %57 = arith.select %55, %50, %56 : vector<256x16xi1>, vector<256x16xbf16>
    %c5 = arith.constant 5 : index
    %c0_23 = arith.constant 0 : index
    %c0_24 = arith.constant 0 : index
    %58 = vector.load %arg2[%c5, %c0_23, %c0_24] : memref<9x16x64xbf16, #tpu.memory_space<vmem>>, vector<1x16x64xbf16>
    %59 = vector.shape_cast %58 : vector<1x16x64xbf16> to vector<16x64xbf16>
    %cst_25 = arith.constant dense<0.000000e+00> : vector<256x64xf32>
    %60 = tpu.matmul %57, %59, %cst_25 {dimension_numbers = #tpu.dot_dimension_numbers<[1], [0], [0], [1], [0, 0, 1, 1], [], []>} : vector<256x16xbf16>, vector<16x64xbf16>, vector<256x64xf32> -> vector<256x64xf32>
    %61 = arith.addf %49, %60 : vector<256x64xf32>
    %62 = vector.extract_strided_slice %1 {offsets = [32, 0], sizes = [256, 16], strides = [1, 1]} : vector<290x16xbf16> to vector<256x16xbf16>
    %c1_i32_26 = arith.constant 1 : i32
    %63 = vector.broadcast %c1_i32_26 : i32 to vector<256x1xi32>
    %64 = arith.cmpi sge, %4, %63 : vector<256x1xi32>
    %c0_i32_27 = arith.constant 0 : i32
    %65 = arith.sitofp %c0_i32_27 : i32 to bf16
    %66 = vector.shape_cast %64 : vector<256x1xi1> to vector<256x1xi1>
    %67 = vector.broadcast %66 : vector<256x1xi1> to vector<256x16xi1>
    %68 = vector.broadcast %65 : bf16 to vector<256x16xbf16>
    %69 = arith.select %67, %62, %68 : vector<256x16xi1>, vector<256x16xbf16>
    %c6 = arith.constant 6 : index
    %c0_28 = arith.constant 0 : index
    %c0_29 = arith.constant 0 : index
    %70 = vector.load %arg2[%c6, %c0_28, %c0_29] : memref<9x16x64xbf16, #tpu.memory_space<vmem>>, vector<1x16x64xbf16>
    %71 = vector.shape_cast %70 : vector<1x16x64xbf16> to vector<16x64xbf16>
    %cst_30 = arith.constant dense<0.000000e+00> : vector<256x64xf32>
    %72 = tpu.matmul %69, %71, %cst_30 {dimension_numbers = #tpu.dot_dimension_numbers<[1], [0], [0], [1], [0, 0, 1, 1], [], []>} : vector<256x16xbf16>, vector<16x64xbf16>, vector<256x64xf32> -> vector<256x64xf32>
    %73 = arith.addf %61, %72 : vector<256x64xf32>
    %74 = vector.extract_strided_slice %1 {offsets = [33, 0], sizes = [256, 16], strides = [1, 1]} : vector<290x16xbf16> to vector<256x16xbf16>
    %c7 = arith.constant 7 : index
    %c0_31 = arith.constant 0 : index
    %c0_32 = arith.constant 0 : index
    %75 = vector.load %arg2[%c7, %c0_31, %c0_32] : memref<9x16x64xbf16, #tpu.memory_space<vmem>>, vector<1x16x64xbf16>
    %76 = vector.shape_cast %75 : vector<1x16x64xbf16> to vector<16x64xbf16>
    %cst_33 = arith.constant dense<0.000000e+00> : vector<256x64xf32>
    %77 = tpu.matmul %74, %76, %cst_33 {dimension_numbers = #tpu.dot_dimension_numbers<[1], [0], [0], [1], [0, 0, 1, 1], [], []>} : vector<256x16xbf16>, vector<16x64xbf16>, vector<256x64xf32> -> vector<256x64xf32>
    %78 = arith.addf %73, %77 : vector<256x64xf32>
    %79 = vector.extract_strided_slice %1 {offsets = [34, 0], sizes = [256, 16], strides = [1, 1]} : vector<290x16xbf16> to vector<256x16xbf16>
    %c15_i32_34 = arith.constant 15 : i32
    %80 = vector.broadcast %c15_i32_34 : i32 to vector<256x1xi32>
    %81 = arith.cmpi slt, %4, %80 : vector<256x1xi32>
    %c0_i32_35 = arith.constant 0 : i32
    %82 = arith.sitofp %c0_i32_35 : i32 to bf16
    %83 = vector.shape_cast %81 : vector<256x1xi1> to vector<256x1xi1>
    %84 = vector.broadcast %83 : vector<256x1xi1> to vector<256x16xi1>
    %85 = vector.broadcast %82 : bf16 to vector<256x16xbf16>
    %86 = arith.select %84, %79, %85 : vector<256x16xi1>, vector<256x16xbf16>
    %c8 = arith.constant 8 : index
    %c0_36 = arith.constant 0 : index
    %c0_37 = arith.constant 0 : index
    %87 = vector.load %arg2[%c8, %c0_36, %c0_37] : memref<9x16x64xbf16, #tpu.memory_space<vmem>>, vector<1x16x64xbf16>
    %88 = vector.shape_cast %87 : vector<1x16x64xbf16> to vector<16x64xbf16>
    %cst_38 = arith.constant dense<0.000000e+00> : vector<256x64xf32>
    %89 = tpu.matmul %86, %88, %cst_38 {dimension_numbers = #tpu.dot_dimension_numbers<[1], [0], [0], [1], [0, 0, 1, 1], [], []>} : vector<256x16xbf16>, vector<16x64xbf16>, vector<256x64xf32> -> vector<256x64xf32>
    %90 = arith.addf %78, %89 : vector<256x64xf32>
    %c0_39 = arith.constant 0 : index
    %c0_40 = arith.constant 0 : index
    %91 = vector.load %arg3[%c0_39, %c0_40] : memref<1x64xf32, #tpu.memory_space<vmem>>, vector<1x64xf32>
    %92 = vector.broadcast %91 : vector<1x64xf32> to vector<256x64xf32>
    %93 = arith.addf %90, %92 : vector<256x64xf32>
    %c0_41 = arith.constant 0 : index
    %c0_42 = arith.constant 0 : index
    %94 = vector.load %arg4[%c0_41, %c0_42] : memref<1x64xf32, #tpu.memory_space<vmem>>, vector<1x64xf32>
    %c0_43 = arith.constant 0 : index
    %c0_44 = arith.constant 0 : index
    %95 = vector.load %arg5[%c0_43, %c0_44] : memref<1x64xf32, #tpu.memory_space<vmem>>, vector<1x64xf32>
    %cst_45 = arith.constant dense<0.000000e+00> : vector<64xf32>
    %96 = vector.multi_reduction <add>, %93, %cst_45 [0] : vector<256x64xf32> to vector<64xf32>
    %97 = vector.shape_cast %96 : vector<64xf32> to vector<1x64xf32>
    %98 = arith.mulf %93, %93 : vector<256x64xf32>
    %cst_46 = arith.constant dense<0.000000e+00> : vector<64xf32>
    %99 = vector.multi_reduction <add>, %98, %cst_46 [0] : vector<256x64xf32> to vector<64xf32>
    %100 = vector.shape_cast %99 : vector<64xf32> to vector<1x64xf32>
    %101 = tpu.iota {dimensions = array<i32: 1>} : vector<1x64xi32>
    %cst_47 = arith.constant 0.000000e+00 : f32
    %102 = vector.broadcast %cst_47 : f32 to vector<1x64xf32>
    %cst_48 = arith.constant 0.000000e+00 : f32
    %103 = vector.broadcast %cst_48 : f32 to vector<1x64xf32>
    %c0_i32_49 = arith.constant 0 : i32
    %104 = vector.broadcast %c0_i32_49 : i32 to vector<1x64xi32>
    %105 = arith.cmpi sge, %101, %104 : vector<1x64xi32>
    %c32_i32 = arith.constant 32 : i32
    %106 = vector.broadcast %c32_i32 : i32 to vector<1x64xi32>
    %107 = arith.cmpi slt, %101, %106 : vector<1x64xi32>
    %108 = arith.andi %105, %107 : vector<1x64xi1>
    %cst_50 = arith.constant 0.000000e+00 : f32
    %109 = vector.broadcast %cst_50 : f32 to vector<1x64xf32>
    %110 = arith.select %108, %97, %109 : vector<1x64xi1>, vector<1x64xf32>
    %cst_51 = arith.constant dense<0.000000e+00> : vector<1xf32>
    %111 = vector.multi_reduction <add>, %110, %cst_51 [1] : vector<1x64xf32> to vector<1xf32>
    %112 = vector.shape_cast %111 : vector<1xf32> to vector<1x1xf32>
    %cst_52 = arith.constant 1.22070313E-4 : f32
    %113 = vector.broadcast %cst_52 : f32 to vector<1x1xf32>
    %114 = arith.mulf %112, %113 : vector<1x1xf32>
    %cst_53 = arith.constant 0.000000e+00 : f32
    %115 = vector.broadcast %cst_53 : f32 to vector<1x64xf32>
    %116 = arith.select %108, %100, %115 : vector<1x64xi1>, vector<1x64xf32>
    %cst_54 = arith.constant dense<0.000000e+00> : vector<1xf32>
    %117 = vector.multi_reduction <add>, %116, %cst_54 [1] : vector<1x64xf32> to vector<1xf32>
    %118 = vector.shape_cast %117 : vector<1xf32> to vector<1x1xf32>
    %cst_55 = arith.constant 1.22070313E-4 : f32
    %119 = vector.broadcast %cst_55 : f32 to vector<1x1xf32>
    %120 = arith.mulf %118, %119 : vector<1x1xf32>
    %121 = arith.mulf %114, %114 : vector<1x1xf32>
    %122 = arith.subf %120, %121 : vector<1x1xf32>
    %cst_56 = arith.constant 9.99999974E-6 : f32
    %123 = vector.broadcast %cst_56 : f32 to vector<1x1xf32>
    %124 = arith.addf %122, %123 : vector<1x1xf32>
    %125 = math.rsqrt %124 : vector<1x1xf32>
    %126 = vector.shape_cast %114 : vector<1x1xf32> to vector<1x1xf32>
    %127 = vector.broadcast %126 : vector<1x1xf32> to vector<1x64xf32>
    %128 = arith.select %108, %127, %102 : vector<1x64xi1>, vector<1x64xf32>
    %129 = vector.shape_cast %125 : vector<1x1xf32> to vector<1x1xf32>
    %130 = vector.broadcast %129 : vector<1x1xf32> to vector<1x64xf32>
    %131 = arith.select %108, %130, %103 : vector<1x64xi1>, vector<1x64xf32>
    %c32_i32_57 = arith.constant 32 : i32
    %132 = vector.broadcast %c32_i32_57 : i32 to vector<1x64xi32>
    %133 = arith.cmpi sge, %101, %132 : vector<1x64xi32>
    %c64_i32 = arith.constant 64 : i32
    %134 = vector.broadcast %c64_i32 : i32 to vector<1x64xi32>
    %135 = arith.cmpi slt, %101, %134 : vector<1x64xi32>
    %136 = arith.andi %133, %135 : vector<1x64xi1>
    %cst_58 = arith.constant 0.000000e+00 : f32
    %137 = vector.broadcast %cst_58 : f32 to vector<1x64xf32>
    %138 = arith.select %136, %97, %137 : vector<1x64xi1>, vector<1x64xf32>
    %cst_59 = arith.constant dense<0.000000e+00> : vector<1xf32>
    %139 = vector.multi_reduction <add>, %138, %cst_59 [1] : vector<1x64xf32> to vector<1xf32>
    %140 = vector.shape_cast %139 : vector<1xf32> to vector<1x1xf32>
    %cst_60 = arith.constant 1.22070313E-4 : f32
    %141 = vector.broadcast %cst_60 : f32 to vector<1x1xf32>
    %142 = arith.mulf %140, %141 : vector<1x1xf32>
    %cst_61 = arith.constant 0.000000e+00 : f32
    %143 = vector.broadcast %cst_61 : f32 to vector<1x64xf32>
    %144 = arith.select %136, %100, %143 : vector<1x64xi1>, vector<1x64xf32>
    %cst_62 = arith.constant dense<0.000000e+00> : vector<1xf32>
    %145 = vector.multi_reduction <add>, %144, %cst_62 [1] : vector<1x64xf32> to vector<1xf32>
    %146 = vector.shape_cast %145 : vector<1xf32> to vector<1x1xf32>
    %cst_63 = arith.constant 1.22070313E-4 : f32
    %147 = vector.broadcast %cst_63 : f32 to vector<1x1xf32>
    %148 = arith.mulf %146, %147 : vector<1x1xf32>
    %149 = arith.mulf %142, %142 : vector<1x1xf32>
    %150 = arith.subf %148, %149 : vector<1x1xf32>
    %cst_64 = arith.constant 9.99999974E-6 : f32
    %151 = vector.broadcast %cst_64 : f32 to vector<1x1xf32>
    %152 = arith.addf %150, %151 : vector<1x1xf32>
    %153 = math.rsqrt %152 : vector<1x1xf32>
    %154 = vector.shape_cast %142 : vector<1x1xf32> to vector<1x1xf32>
    %155 = vector.broadcast %154 : vector<1x1xf32> to vector<1x64xf32>
    %156 = arith.select %136, %155, %128 : vector<1x64xi1>, vector<1x64xf32>
    %157 = vector.shape_cast %153 : vector<1x1xf32> to vector<1x1xf32>
    %158 = vector.broadcast %157 : vector<1x1xf32> to vector<1x64xf32>
    %159 = arith.select %136, %158, %131 : vector<1x64xi1>, vector<1x64xf32>
    %160 = arith.mulf %159, %94 : vector<1x64xf32>
    %161 = arith.mulf %156, %160 : vector<1x64xf32>
    %162 = arith.subf %95, %161 : vector<1x64xf32>
    %163 = vector.broadcast %160 : vector<1x64xf32> to vector<256x64xf32>
    %164 = arith.mulf %93, %163 : vector<256x64xf32>
    %165 = vector.broadcast %162 : vector<1x64xf32> to vector<256x64xf32>
    %166 = arith.addf %164, %165 : vector<256x64xf32>
    %167 = arith.negf %166 : vector<256x64xf32>
    %168 = math.exp %167 : vector<256x64xf32>
    %cst_65 = arith.constant 1.000000e+00 : f32
    %169 = vector.broadcast %cst_65 : f32 to vector<256x64xf32>
    %170 = arith.addf %169, %168 : vector<256x64xf32>
    %171 = arith.divf %169, %170 : vector<256x64xf32>
    %172 = arith.mulf %166, %171 : vector<256x64xf32>
    %173 = arith.truncf %172 : vector<256x64xf32> to vector<256x64xbf16>
    %c0_66 = arith.constant 0 : index
    %c0_67 = arith.constant 0 : index
    %c0_68 = arith.constant 0 : index
    %174 = vector.load %arg6[%c0_66, %c0_67, %c0_68] : memref<1x256x64xbf16, #tpu.memory_space<vmem>>, vector<1x256x64xbf16>
    %175 = vector.shape_cast %174 : vector<1x256x64xbf16> to vector<256x64xbf16>
    %176 = vector.shape_cast %173 : vector<256x64xbf16> to vector<1x256x64xbf16>
    tpu.vector_store %arg6[%c0_66, %c0_67, %c0_68], %176 {strides = array<i32>} : memref<1x256x64xbf16, #tpu.memory_space<vmem>>, vector<1x256x64xbf16>,
    return
  }
  func.func @transform_0(%arg0: i32) -> (i32, i32, i32) {
    %c0_i32 = arith.constant 0 : i32
    %c0_i32_0 = arith.constant 0 : i32
    %c0_i32_1 = arith.constant 0 : i32
    return %arg0, %c0_i32, %c0_i32_0 : i32, i32, i32
  }
  func.func @transform_1(%arg0: i32) -> (i32, i32, i32) {
    %c0_i32 = arith.constant 0 : i32
    %c0_i32_0 = arith.constant 0 : i32
    %c0_i32_1 = arith.constant 0 : i32
    %c0_i32_2 = arith.constant 0 : i32
    return %c0_i32, %c0_i32_0, %c0_i32_1 : i32, i32, i32
  }
  func.func @transform_2(%arg0: i32) -> (i32, i32) {
    %c0_i32 = arith.constant 0 : i32
    %c0_i32_0 = arith.constant 0 : i32
    %c0_i32_1 = arith.constant 0 : i32
    return %c0_i32, %c0_i32_0 : i32, i32
  }
  func.func @transform_3(%arg0: i32) -> (i32, i32) {
    %c0_i32 = arith.constant 0 : i32
    %c0_i32_0 = arith.constant 0 : i32
    %c0_i32_1 = arith.constant 0 : i32
    return %c0_i32, %c0_i32_0 : i32, i32
  }
  func.func @transform_4(%arg0: i32) -> (i32, i32) {
    %c0_i32 = arith.constant 0 : i32
    %c0_i32_0 = arith.constant 0 : i32
    %c0_i32_1 = arith.constant 0 : i32
    return %c0_i32, %c0_i32_0 : i32, i32
  }
  func.func @transform_5(%arg0: i32) -> (i32, i32, i32) {
    %c0_i32 = arith.constant 0 : i32
    %c0_i32_0 = arith.constant 0 : i32
    %c0_i32_1 = arith.constant 0 : i32
    return %arg0, %c0_i32, %c0_i32_0 : i32, i32, i32
  }
}

</mosaic_0001>

<bundles_post_ra>
// kernel: tpu_custom_call.1
= control target key start
LH: loop header
LB: loop body
LE: loop exit
PB: predicated region body
PF: predicated region fallthrough
CT: control target
= control target key end

     0   :  { %s6019_s18 = smov 0   ;;  %s8307_s0 = inlined_call_operand.vmem [shape: bf16[2,290,16], index: 0, kind: input, shape index: {}]   ;;  %s8308_s1 = inlined_call_operand.vmem [shape: bf16[9,16,64], index: 1, kind: input, shape index: {}]   ;;  %s8309_s2 = inlined_call_operand.vmem [shape: f32[1,64], index: 2, kind: input, shape index: {}]   ;;  %s8310_s3 = inlined_call_operand.vmem [shape: f32[1,64], index: 3, kind: input, shape index: {}]   ;;  %s8311_s4 = inlined_call_operand.vmem [shape: f32[1,64], index: 4, kind: input, shape index: {}]   ;;  %s8312_s5 = inlined_call_operand.vmem [shape: bf16[2,256,64], index: 5, kind: output, shape index: {}]  }
   0x1 LB: > { %s4658_s19 = sadd.s32 4294967295, %s5985_s18   ;;  %p4662_p0 = scmp.ge.s32.totalorder %s5985_s18, 1  ;;  %s5985_s18 = sphi %s6019_s18, %s15_s18  }
   0x2   : > { %p187_p1 = scmp.lt.s32.totalorder %s5985_s18, 3 }
   0x4   : > { %p188_p2 = pnand %p4662_p0, %p187_p1 }
   0x6   : > { %191 = sbr.rel (%p188_p2) target bundleno = 828 (0x33c), region = 40 }
   0xd   : > { %v5783_v0 = vld [vmem:[%s8308_s1 + $0x8] sm:$0xff]   ;;  %p215_p3 = scmp.lt.s32.totalorder %s4658_s19, 1  ;;  %v8313_v1 = vlaneseq  ;;  %v5784_v2 = vld [vmem:[%s8308_s1 + $0x20] sm:$0xff]   ;;  %vm5987_vm0 = vmmov 1   ;;  %vm8361_vm2 = vsmask.f32 7424 }
   0xe   : > { %5208 = vmatprep.subr.bf16.mxu1 %v5783_v0  ;;  %v6041_v4 = vld [vmem:[%s8308_s1] sm:$0xff]   ;;  %5344 = vmatprep.subr.bf16.mxu0 %v5784_v2  ;;  %v6049_v6 = vld [vmem:[%s8308_s1 + $0x28] sm:$0xff]   ;;  %vm6051_vm1 = vmpackc.low %vm5987_vm0, %vm5987_vm0  ;;  %vm8381_vm3 = vcmask 130048   ;;  %v8314_v18 = vmov 0   ;;  %vm1382_vm6 = vcmask 1040384   ;;  %vm1383_vm7 = vcmask 1044484  }
   0xf   : > { %s8903_s19 = smov (!%p215_p3, %s4658_s19), 1  ;;  %v6036_v3 = vshrl.u32 %v8313_v1, 7  ;;  %5209 = vmatpush3.bf16.msra.mxu1 %v5783_v0  ;;  %5345 = vmatpush3.bf16.msra.mxu0 %v5784_v2  ;;  %v6089_v19 = vsel %vm6051_vm1, 65537, %v8314_v18  ;;  %vm6237_vm12 = vmor %vm1382_vm6, %vm1383_vm7  ;;  %vm8357_vm14 = vcmask 1046528  }
  0x10   : > { %s5772_s26 = smul.u32 148, %s8903_s19  ;;  %5242 = vmatprep.subr.bf16.mxu1 %v6041_v4  ;;  %5378 = vmatprep.subr.bf16.mxu0 %v6049_v6  ;;  %s5022_s27 = sshll.u32 %s8903_s19, 7 }
  0x11   : > { %8471 = vst [vmem:[#allocation2_spill] sm:$0xff] %v6036_v3  ;;  %v268_v5 = vadd.s32 16, %v6036_v3  ;;  %v267_v8 = vadd.s32 8, %v6036_v3  ;;  %v6063_v10 = vadd.s32 24, %v6036_v3  ;;  %s8194_s30 = scalar_lea.vmem %s8312_s5, %s5022_s27 }
  0x12   : > { %s6059_s6 = scalar_lea.vmem %s8307_s0, %s5772_s26 }
  0x13   : > { %v300_v9 = vand.u32 15, %v268_v5  ;;  %v6066_v11 = vld [vmem:[%s6059_s6] sm:$0xf]  ;;  %v6069_v12 = vld [vmem:[%s6059_s6 + $0x4] sm:$0xf]  ;;  %v299_v24 = vand.u32 15, %v267_v8 }
  0x14   : > { %v6072_v13 = vld [vmem:[%s6059_s6 + $0x8] sm:$0xf]  ;;  %v6075_v14 = vld [vmem:[%s6059_s6 + $0xc] sm:$0xf]  ;;  %v4668_v16 = vcombine.low %v6066_v11, %v6069_v12  ;;  %v6084_v17 = vld [vmem:[%s6059_s6 + $0x10] sm:$0xf] }
  0x15   : > { %vm6077_vm4 = vcmp.ge.s32.totalorder %v300_v9, 1  ;;  %v6094_v20 = vsel %vm6051_vm1, %v6075_v14, 0  ;;  %v4669_v21 = vcombine.low %v6072_v13, %v6075_v14  ;;  %v6099_v22 = vld [vmem:[%s6059_s6 + $0x14] sm:$0xf]  ;;  %v6102_v23 = vld [vmem:[%s6059_s6 + $0x18] sm:$0xf] }
  0x16   : > { %8476 = vst [vmem:[#allocation3_spill] sm:$0xff] %v6094_v20  ;;  %v580_v25 = vshrl.u32 %v4668_v16, 16  ;;  %v582_v26 = vshll.u32 %v4668_v16, 16  ;;  %v4670_v27 = vcombine.low %v6084_v17, %v6099_v22  ;;  %v6107_v28 = vld [vmem:[%s6059_s6 + $0x1c] sm:$0xf]  ;;  %v301_v29 = vand.u32 15, %v6063_v10  ;;  %vm6156_vm8 = vmpackc.low %vm6077_vm4, %vm6077_vm4 }
  0x17   : > { %v587_v30 = vshll.u32 %v4669_v21, 16  ;;  %v591_v31 = vshrl.u32 %v4669_v21, 16  ;;  %v4671_v32 = vcombine.low %v6102_v23, %v6107_v28  ;;  %v6113_v33 = vld [vmem:[%s6059_s6 + $0x20] sm:$0xf]  ;;  %v6116_v34 = vld [vmem:[%s6059_s6 + $0x24] sm:$0xf] }
  0x18   : > { %v584_v35 = vrot.slane %v582_v26, 1  ;;  %v595_v36 = vshll.u32 %v4670_v27, 16  ;;  %v599_v37 = vshrl.u32 %v4670_v27, 16  ;;  %v4672_v38 = vcombine.low %v6113_v33, %v6116_v34  ;;  %v6121_v39 = vld [vmem:[%s6059_s6 + $0x28] sm:$0xf]  ;;  %v6165_v9 = vld [vmem:[%s8308_s1 + $0x30] sm:$0xff]  }
  0x19   : > { %v589_v40 = vrot.slane %v587_v30, 1  ;;  %v603_v41 = vshll.u32 %v4671_v32, 16  ;;  %v607_v42 = vshrl.u32 %v4671_v32, 16  ;;  %v6124_v43 = vld [vmem:[%s6059_s6 + $0x2c] sm:$0xf]  ;;  %vm6126_vm5 = vcmp.lt.s32.totalorder %v299_v24, 15 }
  0x1a   : > { %v585_v45 = vor.u32 %v584_v35, %v580_v25  ;;  %v597_v46 = vrot.slane %v595_v36, 1  ;;  %v611_v47 = vshll.u32 %v4672_v38, 16  ;;  %v4673_v48 = vcombine.low %v6121_v39, %v6124_v43  ;;  %v6133_v49 = vld [vmem:[%s6059_s6 + $0x30] sm:$0xf]  ;;  %v6136_v50 = vld [vmem:[%s6059_s6 + $0x34] sm:$0xf]  ;;  %vm1319_vm9 = vmpackc.low %vm6126_vm5, %vm6126_vm5 }
  0x1b   : > { %v593_v51 = vor.u32 %v591_v31, %v589_v40  ;;  %v605_v52 = vrot.slane %v603_v41, 1  ;;  %v615_v53 = vshrl.u32 %v4672_v38, 16  ;;  %v4674_v54 = vcombine.low %v6133_v49, %v6136_v50  ;;  %v6141_v55 = vld [vmem:[%s6059_s6 + $0x38] sm:$0xf]  ;;  %v6144_v56 = vld [vmem:[%s6059_s6 + $0x3c] sm:$0xf] }
  0x1c   : > { %v590_v57 = vsel %vm8361_vm2, %v585_v45, %v589_v40  ;;  %v601_v58 = vor.u32 %v599_v37, %v597_v46  ;;  %v613_v59 = vrot.slane %v611_v47, 1  ;;  %v619_v60 = vshll.u32 %v4673_v48, 16  ;;  %v6148_v61 = vld [vmem:[%s6059_s6 + $0x40] sm:$0xf]  ;;  %v6151_v62 = vld [vmem:[%s6059_s6 + $0x44] sm:$0xf] }
  0x1d   : > { %5210 = vmatprep.mubr.msk.bf16.mxu1 %vm8381_vm3, %v590_v57  ;;  %v598_v0 = vsel %vm8361_vm2, %v593_v51, %v597_v46  ;;  %v609_v2 = vor.u32 %v607_v42, %v605_v52  ;;  %v623_v5 = vshrl.u32 %v4673_v48, 16  ;;  %v627_v8 = vshll.u32 %v4674_v54, 16  ;;  %v6175_v25 = vld [vmem:[%s6059_s6 + $0x48] sm:$0xf]  ;;  %v6178_v26 = vld [vmem:[%s6059_s6 + $0x4c] sm:$0xf] }
  0x1e   : > { %5346 = vmatprep.mubr.msk.bf16.mxu0 %vm8381_vm3, %v598_v0  ;;  %5211 = vmatmul.mubr.msk.bf16.vlgmr.msra.gmra.mrb[0].mxu1 %vm8381_vm3, %v598_v0  ;;  %v6170_v15 = vsel %vm8361_vm2, %v601_v58, %v605_v52  ;;  %v617_v16 = vor.u32 %v615_v53, %v613_v59  ;;  %v621_v21 = vrot.slane %v619_v60, 1  ;;  %v4675_v24 = vcombine.low %v6141_v55, %v6144_v56  ;;  %v6183_v27 = vld [vmem:[%s8308_s1 + $0x10] sm:$0xff]  }
  0x1f   : > { %8481 = vst [vmem:[#allocation4_spill] sm:$0xff] %v6170_v15  ;;  %5243 = vmatpush3.bf16.msra.mxu1 %v6041_v4  ;;  %5347 = vmatmul.mubr.msk.bf16.vlgmr.msra.gmra.mrb[0].mxu0 %vm8381_vm3, %v6170_v15  ;;  %v6189_v30 = vsel %vm8361_vm2, %v609_v2, %v613_v59  ;;  %v629_v31 = vrot.slane %v627_v8, 1  ;;  %v631_v32 = vshrl.u32 %v4674_v54, 16  ;;  %v4676_v35 = vcombine.low %v6148_v61, %v6151_v62  ;;  %v6208_v46 = vld [vmem:[%s6059_s6 + $0x50] sm:$0xf] }
  0x20   : > { %8482 = vst [vmem:[#allocation5_spill] sm:$0xff] %v6189_v30  ;;  %5379 = vmatpush3.bf16.msra.mxu0 %v6049_v6  ;;  %5214 = vmatprep.mubr.msk.bf16.mxu1 %vm8381_vm3, %v6170_v15  ;;  %v625_v36 = vor.u32 %v623_v5, %v621_v21  ;;  %v635_v37 = vshll.u32 %v4675_v24, 16  ;;  %v639_v38 = vshrl.u32 %v4675_v24, 16  ;;  %v4677_v42 = vcombine.low %v6175_v25, %v6178_v26  ;;  %v6222_v51 = vld [vmem:[%s6059_s6 + $0x54] sm:$0xf] }
  0x21   : > { %5350 = vmatprep.mubr.msk.bf16.mxu0 %vm8381_vm3, %v6189_v30  ;;  %v633_v40 = vor.u32 %v631_v32, %v629_v31  ;;  %v643_v41 = vshll.u32 %v4676_v35, 16  ;;  %v647_v45 = vshrl.u32 %v4676_v35, 16  ;;  %5412 = vmatprep.subr.bf16.mxu0 %v6165_v9  ;;  %v6211_v6 = vsel %vm8361_vm2, %v617_v16, %v621_v21  ;;  %v6268_v35 = vld [vmem:[%s6059_s6 + $0x58] sm:$0xf] }
  0x22   : > { %8483 = vst [vmem:[#allocation6_spill] sm:$0xff] %v6211_v6  ;;  %v637_v47 = vrot.slane %v635_v37, 1  ;;  %vm1225_vm10 = vcmp.lt.s32.totalorder %v301_v29, 15  ;;  %v1351_v48 = vsel %vm1319_vm9, 65537, %v8314_v18  ;;  %5276 = vmatprep.subr.bf16.mxu1 %v6183_v27  ;;  %v651_v53 = vshll.u32 %v4677_v42, 16 }
  0x23   : > { %v645_v52 = vrot.slane %v643_v41, 1  ;;  %vm1321_vm11 = vmpackc.low %vm1225_vm10, %vm1225_vm10  ;;  %v6226_v54 = vrot.slane %v6089_v19, 7  ;;  %v1387_v57 = vrot.slane %v1351_v48, 7  ;;  %v6229_v10 = vsel %vm8361_vm2, %v625_v36, %v629_v31  ;;  %v6296_v48 = vld [vmem:[%s6059_s6 + $0x64] sm:$0xf] }
  0x24   : > { %8485 = vst [vmem:[#allocation8_spill] sm:$0xff] %v6229_v10  ;;  %v6232_v29 = vsel %vm8361_vm2, %v633_v40, %v637_v47  ;;  %v641_v44 = vor.u32 %v639_v38, %v637_v47  ;;  %v1353_v58 = vsel %vm1321_vm11, 65537, %v8314_v18  ;;  %v4678_v2 = vcombine.low %v6208_v46, %v6222_v51  ;;  %v6283_v40 = vld [vmem:[%s6059_s6 + $0x5c] sm:$0xf]  ;;  %v6293_v47 = vld [vmem:[%s6059_s6 + $0x60] sm:$0xf] }
  0x25   : > { %8484 = vst [vmem:[#allocation7_spill] sm:$0xff] %v6226_v54  ;;  %8486 = vst [vmem:[#allocation9_spill] sm:$0xff] %v6232_v29  ;;  %v649_v60 = vor.u32 %v647_v45, %v645_v52  ;;  %v6242_v19 = vrot.slane %v6226_v54, 4  ;;  %v1389_v0 = vrot.slane %v1387_v57, 4  ;;  %v653_v5 = vrot.slane %v651_v53, 1 }
  0x26   : > { %5215 = vmatmul.mubr.msk.bf16.gmra.mrb[4].mxu1 %vm8381_vm3, %v6189_v30  ;;  %v1393_v8 = vrot.slane %v1353_v58, 7  ;;  %vm8356_vm13 = vcmp.ne.s16.totalorder %v6226_v54, 0  ;;  %v655_v16 = vshrl.u32 %v4677_v42, 16  ;;  %v6254_v21 = vsel %vm8361_vm2, %v641_v44, %v645_v52 }
  0x27   : > { %5351 = vmatmul.mubr.msk.bf16.gmra.mrb[4].mxu0 %vm8381_vm3, %v6211_v6  ;;  %5218 = vmatprep.mubr.msk.bf16.mxu1 %vm8381_vm3, %v6211_v6  ;;  %8489 = vst [vmem:[#allocation10_spill] sm:$0xff] %v6254_v21  ;;  %v6259_v24 = vsel %vm6237_vm12, %v6242_v19, %v1387_v57  ;;  %v1391_v31 = vsel %vm6237_vm12, %v1389_v0, %v6226_v54  ;;  %v2502_v32 = vsel %vm8356_vm13, %v6072_v13, 0  ;;  %v8492_v38 = vmov 0 }
  0x28   : > { %8490 = vst [vmem:[#allocation11_spill] sm:$0xff] %v6259_v24  ;;  %5354 = vmatprep.mubr.msk.bf16.mxu0 %vm8381_vm3, %v6229_v10  ;;  %v6275_v36 = vsel %vm6237_vm12, %v6242_v19, %v1393_v8  ;;  %v1395_v37 = vrot.slane %v1393_v8, 4  ;;  %vm8355_vm15 = vcmp.ne.s16.totalorder %v6259_v24, 0  ;;  %vm6278_vm0 = vcmp.ne.s16.totalorder %v1391_v31, 0  ;;  %v6313_v31 = vld [vmem:[%s6059_s6 + $0x6c] sm:$0xf] }
  0x29   : > { %8491 = vst [vmem:[#allocation12_spill] sm:$0xff] %v6275_v36  ;;  %v8493_v38 = vsel %vm6278_vm0, 4294967295, %v8492_v38  ;;  %vm8330_vm4 = vcmp.ne.s16.totalorder %v6275_v36, 0  ;;  %v2503_v41 = vsel %vm8355_vm15, %v6075_v14, 0  ;;  %v2504_v42 = vsel %vm6278_vm0, %v6084_v17, 0 }
  0x2a   : > { %8494 = vst [vmem:[#allocation13_spill] sm:$0xff] %v8493_v38  ;;  %v657_v45 = vor.u32 %v655_v16, %v653_v5  ;;  %v2505_v52 = vsel %vm8330_vm4, %v6099_v22, 0  ;;  %v4829_v53 = vcombine.low %v2502_v32, %v2503_v41  ;;  %v659_v57 = vshll.u32 %v4678_v2, 16  ;;  %v6310_v16 = vld [vmem:[%s6059_s6 + $0x68] sm:$0xf] }
  0x2b   : > { %v271_v44 = vadd.s32 40, %v6036_v3  ;;  %v6302_v58 = vcombine.low %v2504_v42, %v2505_v52  ;;  %v1397_v14 = vsel %vm6237_vm12, %v1395_v37, %v6226_v54  ;;  %v4679_v0 = vcombine.low %v6268_v35, %v6283_v40 }
  0x2c   : > { %v663_v8 = vshrl.u32 %v4678_v2, 16  ;;  %v6316_v1 = vsel %vm8361_vm2, %v649_v60, %v653_v5  ;;  %v661_v32 = vrot.slane %v659_v57, 1  ;;  %vm6318_vm5 = vcmp.ne.s16.totalorder %v1397_v14, 0 }
  0x2d   : > { %8495 = vst [vmem:[#allocation14_spill] sm:$0xff] %v6316_v1  ;;  %v303_v41 = vand.u32 15, %v271_v44  ;;  %v8496_v42 = vmov 0  ;;  %v2621_v52 = vrot.slane %v4829_v53, 1  ;;  %v667_v4 = vshll.u32 %v4679_v0, 16 }
  0x2e   : > { %v8497_v42 = vsel %vm6318_vm5, 4294967295, %v8496_v42  ;;  %v273_v18 = vadd.s32 56, %v6036_v3  ;;  %5219 = vmatmul.mubr.msk.bf16.gmra.mrb[8].mxu1 %vm8381_vm3, %v6229_v10  ;;  %v2506_v60 = vsel %vm6318_vm5, %v6102_v23, 0  ;;  %v665_v2 = vor.u32 %v663_v8, %v661_v32 }
  0x2f   : > { %8498 = vst [vmem:[#allocation15_spill] sm:$0xff] %v8497_v42  ;;  %vm1227_vm6 = vcmp.lt.s32.totalorder %v303_v41, 15  ;;  %v4680_v5 = vcombine.low %v6293_v47, %v6296_v48  ;;  %5355 = vmatmul.mubr.msk.bf16.gmra.mrb[8].mxu0 %vm8381_vm3, %v6232_v29  ;;  %5222 = vmatprep.mubr.msk.bf16.mxu1 %vm8381_vm3, %v6232_v29  ;;  %v6336_v53 = vsel %vm8361_vm2, %v657_v45, %v661_v32  ;;  %v669_v57 = vrot.slane %v667_v4, 1 }
  0x30   : > { %8499 = vst [vmem:[#allocation16_spill] sm:$0xff] %v6336_v53  ;;  %vm1323_vm7 = vmpackc.low %vm1227_vm6, %vm1227_vm6  ;;  %v305_v44 = vand.u32 15, %v273_v18  ;;  %v671_v14 = vshrl.u32 %v4679_v0, 16  ;;  %5358 = vmatprep.mubr.msk.bf16.mxu0 %vm8381_vm3, %v6254_v21  ;;  %v8500_v8 = vmov 0   ;;  %v275_v10 = vadd.s32 72, %v6036_v3 }
  0x31   : > { %v1355_v41 = vsel %vm1323_vm7, 65537, %v8500_v8  ;;  %v675_v37 = vshll.u32 %v4680_v5, 16  ;;  %v6344_v6 = vcombine.low %v6310_v16, %v6313_v31  ;;  %v8501_v29 = vrot.slane %v6302_v58, 1 }
  0x32   : > { %v1399_v32 = vrot.slane %v1355_v41, 7  ;;  %vm1229_vm9 = vcmp.lt.s32.totalorder %v305_v44, 15  ;;  %v673_v18 = vor.u32 %v671_v14, %v669_v57  ;;  %v6350_v4 = vsel %vm8361_vm2, %v665_v2, %v669_v57 }
  0x33   : > { %v2623_v45 = vsel %vm8357_vm14, %v2621_v52, %v8501_v29  ;;  %8502 = vst [vmem:[#allocation17_spill] sm:$0xff] %v6350_v4  ;;  %vm1325_vm10 = vmpackc.low %vm1229_vm9, %vm1229_vm9  ;;  %v677_v0 = vrot.slane %v675_v37, 1  ;;  %v307_v30 = vand.u32 15, %v275_v10  ;;  %v679_v15 = vshrl.u32 %v4680_v5, 16 }
  0x34   : > { %v6355_v42 = vsel %vm6237_vm12, %v6242_v19, %v1399_v32  ;;  %v1357_v36 = vsel %vm1325_vm10, 65537, %v8500_v8  ;;  %v1401_v38 = vrot.slane %v1399_v32, 4  ;;  %v683_v29 = vshll.u32 %v6344_v6, 16 }
  0x35   : > { %8503 = vst [vmem:[#allocation18_spill] sm:$0xff] %v6355_v42  ;;  %vm8329_vm11 = vcmp.ne.s16.totalorder %v6355_v42, 0  ;;  %v1405_v52 = vrot.slane %v1357_v36, 7  ;;  %vm1231_vm6 = vcmp.lt.s32.totalorder %v307_v30, 15  ;;  %v277_v2 = vadd.s32 88, %v6036_v3 }
  0x36   : > { %v2507_v10 = vsel %vm8329_vm11, %v6107_v28, 0  ;;  %v1403_v37 = vsel %vm6237_vm12, %v1401_v38, %v6226_v54  ;;  %v6368_v5 = vsel %vm8361_vm2, %v673_v18, %v677_v0  ;;  %vm1327_vm7 = vmpackc.low %vm1231_vm6, %vm1231_vm6  ;;  %v681_v57 = vor.u32 %v679_v15, %v677_v0  ;;  %5223 = vmatmul.mubr.msk.bf16.gmra.mrb[12].mxu1 %vm8381_vm3, %v6254_v21 }
  0x37   : > { %8504 = vst [vmem:[#allocation19_spill] sm:$0xff] %v6368_v5  ;;  %v4831_v36 = vcombine.low %v2506_v60, %v2507_v10  ;;  %v6375_v30 = vsel %vm6237_vm12, %v6242_v19, %v1405_v52  ;;  %vm6377_vm9 = vcmp.ne.s16.totalorder %v1403_v37, 0  ;;  %v8506_v44 = vmov 0  ;;  %5359 = vmatmul.mubr.msk.bf16.gmra.mrb[12].mxu0 %vm8381_vm3, %v6316_v1  ;;  %5226 = vmatprep.mubr.msk.bf16.mxu1 %vm8381_vm3, %v6316_v1 }
  0x38   : > { %8505 = vst [vmem:[#allocation20_spill] sm:$0xff] %v6375_v30  ;;  %v8507_v44 = vsel %vm6377_vm9, 4294967295, %v8506_v44  ;;  %v1359_v38 = vsel %vm1327_vm7, 65537, %v8500_v8  ;;  %vm8328_vm10 = vcmp.ne.s16.totalorder %v6375_v30, 0  ;;  %v2508_v15 = vsel %vm6377_vm9, %v6113_v33, 0  ;;  %5380 = vmatprep.mubr.msk.bf16.mxu0 %vm8381_vm3, %v2623_v45 }
  0x39   : > { %8508 = vst [vmem:[#allocation21_spill] sm:$0xff] %v8507_v44  ;;  %v1407_v60 = vrot.slane %v1405_v52, 4  ;;  %v1411_v14 = vrot.slane %v1359_v38, 7  ;;  %v2624_v41 = vrot.slane %v4831_v36, 1  ;;  %v2509_v32 = vsel %vm8328_vm10, %v6116_v34, 0 }
  0x3a   : > { %v685_v18 = vrot.slane %v683_v29, 1  ;;  %v309_v0 = vand.u32 15, %v277_v2  ;;  %v4832_v10 = vcombine.low %v2508_v15, %v2509_v32  ;;  %v6403_v45 = vld [vmem:[%s6059_s6 + $0x70] sm:$0xf]  ;;  %v6406_v36 = vld [vmem:[%s6059_s6 + $0x74] sm:$0xf] }
  0x3b   : > { %v1409_v37 = vsel %vm6237_vm12, %v1407_v60, %v6226_v54  ;;  %v6400_v52 = vsel %vm6237_vm12, %v6242_v19, %v1411_v14  ;;  %v1413_v38 = vrot.slane %v1411_v14, 4  ;;  %v8510_v1 = vrot.slane %v6302_v58, 1  ;;  %v6417_v15 = vld [vmem:[%s6059_s6 + $0x78] sm:$0xf]  ;;  %v6429_v32 = vld [vmem:[%s6059_s6 + $0x7c] sm:$0xf] }
  0x3c   : > { %8509 = vst [vmem:[#allocation22_spill] sm:$0xff] %v6400_v52  ;;  %vm6411_vm6 = vcmp.ne.s16.totalorder %v1409_v37, 0  ;;  %v8511_v2 = vmov 0  ;;  %vm8350_vm7 = vcmp.ne.s16.totalorder %v6400_v52, 0  ;;  %vm1233_vm10 = vcmp.lt.s32.totalorder %v309_v0, 15 }
  0x3d   : > { %v2625_v29 = vsel %vm8357_vm14, %v8510_v1, %v2624_v41  ;;  %v8512_v2 = vsel %vm6411_vm6, 4294967295, %v8511_v2  ;;  %v2626_v60 = vrot.slane %v4832_v10, 1  ;;  %v2510_v14 = vsel %vm6411_vm6, %v6121_v39, 0  ;;  %vm1329_vm11 = vmpackc.low %vm1233_vm10, %vm1233_vm10 }
  0x3e   : > { %8513 = vst [vmem:[#allocation23_spill] sm:$0xff] %v8512_v2  ;;  %v2511_v58 = vsel %vm8350_vm7, %v6124_v43, 0  ;;  %v1415_v1 = vsel %vm6237_vm12, %v1413_v38, %v6226_v54  ;;  %v1361_v0 = vsel %vm1329_vm11, 65537, %v8500_v8  ;;  %v8514_v10 = vmov 0  ;;  %5227 = vmatmul.mubr.msk.bf16.gmra.mrb[16].mxu1 %vm8381_vm3, %v6336_v53 }
  0x3f   : > { %v4833_v37 = vcombine.low %v2510_v14, %v2511_v58  ;;  %vm6432_vm4 = vcmp.ne.s16.totalorder %v1415_v1, 0  ;;  %v4682_v21 = vcombine.low %v6403_v45, %v6406_v36  ;;  %v2627_v52 = vsel %vm8357_vm14, %v2624_v41, %v2626_v60  ;;  %v6446_v14 = vld [vmem:[%s8308_s1 + $0x38] sm:$0xff]   ;;  %5381 = vmatmul.mubr.msk.bf16.vlgmr.msra.gmra.mrb[0].mxu0 %vm8381_vm3, %v2625_v29  ;;  %5230 = vmatprep.mubr.msk.bf16.mxu1 %vm8381_vm3, %v6350_v4 }
  0x40   : > { %v8515_v10 = vsel %vm6432_vm4, 4294967295, %v8514_v10  ;;  %v6440_v2 = vsel %vm8361_vm2, %v681_v57, %v685_v18  ;;  %v1417_v30 = vrot.slane %v1361_v0, 7  ;;  %v687_v38 = vshrl.u32 %v6344_v6, 16  ;;  %8518 = vst [vmem:[#allocation26_spill] sm:$0xff] %v6446_v14  ;;  %5413 = vmatpush3.bf16.msra.mxu0 %v6165_v9  ;;  %5384 = vmatprep.mubr.msk.bf16.mxu0 %vm8381_vm3, %v2627_v52 }
  0x41   : > { %8516 = vst [vmem:[#allocation24_spill] sm:$0xff] %v8515_v10  ;;  %8517 = vst [vmem:[#allocation25_spill] sm:$0xff] %v6440_v2  ;;  %v2628_v58 = vrot.slane %v4833_v37, 1  ;;  %v691_v1 = vshll.u32 %v4682_v21, 16  ;;  %v279_v44 = vadd.s32 104, %v6036_v3  ;;  %v4683_v41 = vcombine.low %v6417_v15, %v6429_v32  ;;  %5446 = vmatprep.subr.bf16.mxu0 %v6446_v14 }
  0x42   : > { %v6459_v6 = vsel %vm6237_vm12, %v6242_v19, %v1417_v30  ;;  %v2512_v57 = vsel %vm6432_vm4, %v6133_v49, 0  ;;  %v689_v37 = vor.u32 %v687_v38, %v685_v18  ;;  %v1419_v0 = vrot.slane %v1417_v30, 4  ;;  %v6475_v18 = vld [vmem:[%s6059_s6 + $0x80] sm:$0xf] }
  0x43   : > { %8519 = vst [vmem:[#allocation27_spill] sm:$0xff] %v6459_v6  ;;  %vm8351_vm11 = vcmp.ne.s16.totalorder %v6459_v6, 0  ;;  %v693_v29 = vrot.slane %v691_v1, 1  ;;  %v311_v53 = vand.u32 15, %v279_v44  ;;  %v695_v4 = vshrl.u32 %v4682_v21, 16 }
  0x44   : > { %v2513_v42 = vsel %vm8351_vm11, %v6136_v50, 0  ;;  %v1421_v10 = vsel %vm6237_vm12, %v1419_v0, %v6226_v54  ;;  %v699_v24 = vshll.u32 %v4683_v41, 16  ;;  %v281_v30 = vadd.s32 120, %v6036_v3 }
  0x45   : > { %v2629_v9 = vsel %vm8357_vm14, %v2626_v60, %v2628_v58  ;;  %v4834_v52 = vcombine.low %v2512_v57, %v2513_v42  ;;  %vm1235_vm10 = vcmp.lt.s32.totalorder %v311_v53, 15  ;;  %vm6479_vm7 = vcmp.ne.s16.totalorder %v1421_v10, 0 }
  0x46   : > { %v8520_v21 = vmov 0  ;;  %v6484_v44 = vsel %vm8361_vm2, %v689_v37, %v693_v29  ;;  %vm1331_vm11 = vmpackc.low %vm1235_vm10, %vm1235_vm10  ;;  %v2514_v38 = vsel %vm6479_vm7, %v6141_v55, 0  ;;  %v701_v1 = vrot.slane %v699_v24, 1  ;;  %5231 = vmatmul.mubr.msk.bf16.gmra.mrb[20].mxu1 %vm8381_vm3, %v6368_v5 }
  0x47   : > { %v8521_v21 = vsel %vm6479_vm7, 4294967295, %v8520_v21  ;;  %8522 = vst [vmem:[#allocation28_spill] sm:$0xff] %v6484_v44  ;;  %v313_v0 = vand.u32 15, %v281_v30  ;;  %v2630_v6 = vrot.slane %v4834_v52, 1  ;;  %v1363_v14 = vsel %vm1331_vm11, 65537, %v8500_v8  ;;  %5385 = vmatmul.mubr.msk.bf16.gmra.mrb[4].mxu0 %vm8381_vm3, %v2629_v9  ;;  %5234 = vmatprep.mubr.msk.bf16.mxu1 %vm8381_vm3, %v6440_v2 }
  0x48   : > { %v4684_v42 = vcombine.low %v6475_v18, %v6475_v18  ;;  %v703_v53 = vshrl.u32 %v4683_v41, 16  ;;  %v1423_v60 = vrot.slane %v1363_v14, 7  ;;  %v697_v10 = vor.u32 %v695_v4, %v693_v29 }
  0x49   : > { %vm1237_vm15 = vcmp.lt.s32.totalorder %v313_v0, 15  ;;  %v283_v57 = vadd.s32 136, %v6036_v3  ;;  %v2631_v37 = vsel %vm8357_vm14, %v2628_v58, %v2630_v6  ;;  %v298_v52 = vand.u32 15, %v6036_v3 }
  0x4a   : > { %vm1333_vm10 = vmpackc.low %vm1237_vm15, %vm1237_vm15  ;;  %v6496_v24 = vor.u32 %v703_v53, %v701_v1  ;;  %v707_v30 = vshll.u32 %v4684_v42, 16  ;;  %v6505_v4 = vsel %vm6237_vm12, %v6242_v19, %v1423_v60  ;;  %v1425_v41 = vrot.slane %v1423_v60, 4  ;;  %5388 = vmatprep.mubr.msk.bf16.mxu0 %vm8381_vm3, %v2631_v37 }
  0x4b   : > { %v1365_v14 = vsel %vm1333_vm10, 65537, %v8500_v8  ;;  %v315_v58 = vand.u32 15, %v283_v57  ;;  %vm8358_vm15 = vcmp.ne.s16.totalorder %v6505_v4, 0  ;;  %vm330_vm11 = vcmp.ge.s32.totalorder %v298_v52, 1 }
  0x4c   : > { %8523 = vst [vmem:[#allocation29_spill] sm:$0xff] %v6496_v24  ;;  %v1429_v29 = vrot.slane %v1365_v14, 7  ;;  %v709_v0 = vrot.slane %v707_v30, 1  ;;  %v2515_v9 = vsel %vm8358_vm15, %v6144_v56, 0  ;;  %v6514_v42 = vsel %vm8361_vm2, %v697_v10, %v701_v1  ;;  %vm6519_vm13 = vmpackc.low %vm330_vm11, %vm330_vm11 }
  0x4d   : > { %8524 = vst [vmem:[#allocation30_spill] sm:$0xff] %v6514_v42  ;;  %v1427_v53 = vsel %vm6237_vm12, %v1425_v41, %v6226_v54  ;;  %vm1239_vm10 = vcmp.lt.s32.totalorder %v315_v58, 15  ;;  %v8525_v60 = vmov 0  ;;  %v4835_v57 = vcombine.low %v2514_v38, %v2515_v9 }
  0x4e   : > { %v8526_v60 = vsel %vm6519_vm13, 4294967295, %v8525_v60  ;;  %v6526_v37 = vsel %vm6237_vm12, %v6242_v19, %v1429_v29  ;;  %vm6528_vm14 = vcmp.ne.s16.totalorder %v1427_v53, 0  ;;  %v8528_v30 = vmov 0  ;;  %vm1335_vm15 = vmpackc.low %vm1239_vm10, %vm1239_vm10  ;;  %5235 = vmatmul.mubr.msk.bf16.gmra.mrb[24].mxu1 %vm8381_vm3, %v6484_v44 }
  0x4f   : > { %8527 = vst [vmem:[#allocation31_spill] sm:$0xff] %v8526_v60  ;;  %v8529_v30 = vsel %vm6528_vm14, 4294967295, %v8528_v30  ;;  %v459_v1 = vsel %vm6051_vm1, %v6069_v12, 0  ;;  %vm8365_vm11 = vcmp.ne.s16.totalorder %v6526_v37, 0  ;;  %v2516_v38 = vsel %vm6528_vm14, %v6148_v61, 0  ;;  %5238 = vmatprep.mubr.msk.bf16.mxu1 %vm8381_vm3, %v6514_v42 }
  0x50   : > { %v1367_v10 = vsel %vm1335_vm15, 65537, %v8500_v8  ;;  %v1431_v52 = vrot.slane %v1429_v29, 4  ;;  %v2632_v14 = vrot.slane %v4835_v57, 1  ;;  %v2517_v41 = vsel %vm8365_vm11, %v6151_v62, 0 }
  0x51   : > { %v710_v58 = vsel %vm8361_vm2, %v6496_v24, %v709_v0  ;;  %v1435_v9 = vrot.slane %v1367_v10, 7  ;;  %v4836_v53 = vcombine.low %v2516_v38, %v2517_v41  ;;  %v458_v2 = vsel %vm6519_vm13, %v6066_v11, 0 }
  0x52   : > { %v1433_v12 = vsel %vm6237_vm12, %v1431_v52, %v6226_v54  ;;  %v285_v29 = vadd.s32 152, %v6036_v3  ;;  %vm8530_vm15 = vcmask 1046528   ;;  %v8532_v38 = vmov 0 }
  0x53   : > { %v2633_v57 = vsel %vm8530_vm15, %v2630_v6, %v2632_v14  ;;  %v6558_v0 = vsel %vm6237_vm12, %v6242_v19, %v1435_v9  ;;  %vm6560_vm10 = vcmp.ne.s16.totalorder %v1433_v12, 0  ;;  %v1437_v10 = vrot.slane %v1435_v9, 4 }
  0x54   : > { %8531 = vst [vmem:[#allocation32_spill] sm:$0xff] %v6558_v0  ;;  %v8533_v38 = vsel %vm6560_vm10, 4294967295, %v8532_v38  ;;  %5389 = vmatmul.mubr.msk.bf16.gmra.mrb[8].mxu0 %vm8381_vm3, %v2633_v57  ;;  %v2634_v11 = vrot.slane %v4836_v53, 1  ;;  %vm8376_vm2 = vcmp.ne.s16.totalorder %v6558_v0, 0  ;;  %v2518_v6 = vsel %vm6560_vm10, %v6175_v25, 0 }
  0x55   : > { %v317_v52 = vand.u32 15, %v285_v29  ;;  %v2519_v41 = vsel %vm8376_vm2, %v6178_v26, 0  ;;  %v1439_v9 = vsel %vm6237_vm12, %v1437_v10, %v6226_v54  ;;  %v287_v12 = vadd.s32 168, %v6036_v3 }
  0x56   : > { %v270_v57 = vadd.s32 32, %v6036_v3  ;;  %v2635_v53 = vsel %vm8530_vm15, %v2632_v14, %v2634_v11  ;;  %v4837_v24 = vcombine.low %v2518_v6, %v2519_v41  ;;  %v4702_v42 = vcombine.low %v458_v2, %v459_v1  ;;  %5239 = vmatmul.mubr.msk.bf16.gmra.mrb[28].mxu1 %vm8381_vm3, %v710_v58 }
  0x57   : > { %vm1241_vm11 = vcmp.lt.s32.totalorder %v317_v52, 15  ;;  %5392 = vmatprep.mubr.msk.bf16.mxu0 %vm8381_vm3, %v2635_v53  ;;  %vm6581_vm14 = vcmp.ne.s16.totalorder %v1439_v9, 0  ;;  %v8534_v29 = vmov 0  ;;  %v319_v44 = vand.u32 15, %v287_v12 }
  0x58   : > { %vm1337_vm10 = vmpackc.low %vm1241_vm11, %vm1241_vm11  ;;  %v8535_v29 = vsel %vm6581_vm14, 4294967295, %v8534_v29  ;;  %v302_v5 = vand.u32 15, %v270_v57  ;;  %v6588_v10 = vsel %vm6051_vm1, %v6099_v22, 0  ;;  %v2636_v0 = vrot.slane %v4837_v24, 1  ;;  %5244 = vmatprep.mubr.msk.bf16.mxu1 %vm8381_vm3, %v4702_v42 }
  0x59   : > { %v1369_v14 = vsel %vm1337_vm10, 65537, %v8500_v8  ;;  %v1915_v2 = vsel %vm6156_vm8, %v6084_v17, 0  ;;  %v289_v1 = vadd.s32 184, %v6036_v3  ;;  %vm1243_vm11 = vcmp.lt.s32.totalorder %v319_v44, 15 }
  0x5a   : > { %v1441_v6 = vrot.slane %v1369_v14, 7  ;;  %vm334_vm15 = vcmp.ge.s32.totalorder %v302_v5, 1  ;;  %v6596_v52 = vcombine.low %v1915_v2, %v6588_v10  ;;  %v8537_v22 = vsel %vm6156_vm8, %v6072_v13, 0  ;;  %vm1339_vm10 = vmpackc.low %vm1243_vm11, %vm1243_vm11 }
  0x5b   : > { %v4703_v24 = vcombine.low %v8537_v22, %v6094_v20  ;;  %vm8538_vm2 = vcmask 1046528   ;;  %v321_v9 = vand.u32 15, %v289_v1  ;;  %v272_v12 = vadd.s32 48, %v6036_v3  ;;  %vm6615_vm7 = vmpackc.low %vm334_vm15, %vm334_vm15 }
  0x5c   : > { %8536 = vst [vmem:[#allocation33_spill] sm:$0xff] %v6596_v52  ;;  %v2637_v41 = vsel %vm8538_vm2, %v2634_v11, %v2636_v0  ;;  %v6609_v5 = vsel %vm6237_vm12, %v6242_v19, %v1441_v6  ;;  %v2520_v44 = vsel %vm6581_vm14, %v6208_v46, 0  ;;  %v1371_v13 = vsel %vm1339_vm10, 65537, %v8500_v8 }
  0x5d   : > { %v1443_v57 = vrot.slane %v1441_v6, 4  ;;  %v8539_v11 = vmov 0  ;;  %5393 = vmatmul.mubr.msk.bf16.gmra.mrb[12].mxu0 %vm8381_vm3, %v2637_v41  ;;  %vm8379_vm2 = vcmp.ne.s16.totalorder %v6609_v5, 0  ;;  %v1447_v58 = vrot.slane %v1371_v13, 7 }
  0x5e   : > { %v8540_v11 = vsel %vm6615_vm7, 4294967295, %v8539_v11  ;;  %vm1245_vm11 = vcmp.lt.s32.totalorder %v321_v9, 15  ;;  %v6625_v53 = vsel %vm6051_vm1, %v6107_v28, 0  ;;  %v2521_v14 = vsel %vm8379_vm2, %v6222_v51, 0 }
  0x5f   : > { %8541 = vst [vmem:[#allocation34_spill] sm:$0xff] %v8540_v11  ;;  %8542 = vst [vmem:[#allocation35_spill] sm:$0xff] %v6625_v53  ;;  %v1445_v2 = vsel %vm6237_vm12, %v1443_v57, %v6226_v54  ;;  %v462_v42 = vsel %vm6615_vm7, %v6084_v17, 0  ;;  %v304_v1 = vand.u32 15, %v272_v12  ;;  %v4838_v6 = vcombine.low %v2520_v44, %v2521_v14 }
  0x60   : > { %vm1341_vm15 = vmpackc.low %vm1245_vm11, %vm1245_vm11  ;;  %v6639_v28 = vsel %vm6237_vm12, %v6242_v19, %v1447_v58  ;;  %vm6641_vm10 = vcmp.ne.s16.totalorder %v1445_v2, 0  ;;  %v8544_v22 = vmov 0  ;;  %v1449_v9 = vrot.slane %v1447_v58, 4 }
  0x61   : > { %8543 = vst [vmem:[#allocation36_spill] sm:$0xff] %v6639_v28  ;;  %v8545_v22 = vsel %vm6641_vm10, 4294967295, %v8544_v22  ;;  %v1373_v41 = vsel %vm1341_vm15, 65537, %v8500_v8  ;;  %vm8380_vm2 = vcmp.ne.s16.totalorder %v6639_v28, 0  ;;  %v2522_v17 = vsel %vm6641_vm10, %v6268_v35, 0 }
  0x62   : > { %v1453_v12 = vrot.slane %v1373_v41, 7  ;;  %v2638_v44 = vrot.slane %v4838_v6, 1  ;;  %v2523_v13 = vsel %vm8380_vm2, %v6283_v40, 0  ;;  %v4704_v57 = vcombine.low %v462_v42, %v6588_v10  ;;  %v6670_v42 = vld [vmem:[%s8308_s1 + $0x18] sm:$0xff]  }
  0x63   : > { %vm336_vm11 = vcmp.ge.s32.totalorder %v304_v1, 1  ;;  %v4839_v14 = vcombine.low %v2522_v17, %v2523_v13  ;;  %v1451_v2 = vsel %vm6237_vm12, %v1449_v9, %v6226_v54  ;;  %v8547_v58 = vmov 0 }
  0x64   : > { %v6660_v52 = vsel %vm6237_vm12, %v6242_v19, %v1453_v12  ;;  %vm6662_vm15 = vmpackc.low %vm336_vm11, %vm336_vm11  ;;  %v291_v6 = vadd.s32 200, %v6036_v3  ;;  %vm8550_vm2 = vcmask 1046528   ;;  %vm6673_vm3 = vcmp.ne.s16.totalorder %v1451_v2, 0 }
  0x65   : > { %8546 = vst [vmem:[#allocation37_spill] sm:$0xff] %v6660_v52  ;;  %v8548_v58 = vsel %vm6662_vm15, 4294967295, %v8547_v58  ;;  %v2639_v1 = vsel %vm8550_vm2, %v2636_v0, %v2638_v44  ;;  %v8551_v41 = vmov 0  ;;  %vm8391_vm10 = vcmp.ne.s16.totalorder %v6660_v52, 0 }
  0x66   : > { %8549 = vst [vmem:[#allocation38_spill] sm:$0xff] %v8548_v58  ;;  %v8552_v41 = vsel %vm6673_vm3, 4294967295, %v8551_v41  ;;  %v464_v17 = vsel %vm6662_vm15, %v6102_v23, 0  ;;  %vm8554_vm11 = vcmask 130048   ;;  %v2640_v9 = vrot.slane %v4839_v14, 1 }
  0x67   : > { %8553 = vst [vmem:[#allocation39_spill] sm:$0xff] %v8552_v41  ;;  %5396 = vmatprep.mubr.msk.bf16.mxu0 %vm8554_vm11, %v2639_v1  ;;  %vm8555_vm14 = vmmov %vm8554_vm11  ;;  %v2524_v13 = vsel %vm6673_vm3, %v6293_v47, 0  ;;  %v2525_v0 = vsel %vm8391_vm10, %v6296_v48, 0  ;;  %v4705_v2 = vcombine.low %v464_v17, %v6625_v53  ;;  %v323_v1 = vand.u32 15, %v291_v6 }
  0x68   : > { %5245 = vmatmul.mubr.msk.bf16.vlgmr.msra.gmra.mrb[0].mxu1 %vm8555_vm14, %v4703_v24  ;;  %vm8556_vm2 = vmmov %vm8554_vm11  ;;  %v6692_v23 = vcombine.low %v2524_v13, %v2525_v0  ;;  %v1455_v20 = vrot.slane %v1453_v12, 4  ;;  %v274_v24 = vadd.s32 64, %v6036_v3  ;;  %vm8557_vm14 = vcmask 1046528  }
  0x69   : > { %5277 = vmatpush3.bf16.msra.mxu1 %v6183_v27  ;;  %5248 = vmatprep.mubr.msk.bf16.mxu1 %vm8556_vm2, %v4704_v57  ;;  %v2641_v14 = vsel %vm8557_vm14, %v2638_v44, %v2640_v9  ;;  %v6699_v41 = vsel %vm6051_vm1, %v6116_v34, 0  ;;  %v293_v52 = vadd.s32 216, %v6036_v3  ;;  %v276_v17 = vadd.s32 80, %v6036_v3  ;;  %vm8559_vm11 = vmmov %vm8556_vm2 }
  0x6a   : > { %8558 = vst [vmem:[#allocation40_spill] sm:$0xff] %v6699_v41  ;;  %5310 = vmatprep.subr.bf16.mxu1 %v6670_v42  ;;  %5397 = vmatmul.mubr.msk.bf16.gmra.mrb[16].mxu0 %vm8559_vm11, %v2641_v14  ;;  %v2642_v27 = vrot.slane %v6692_v23, 1  ;;  %vm1247_vm2 = vcmp.lt.s32.totalorder %v323_v1, 15  ;;  %v1457_v12 = vsel %vm6237_vm12, %v1455_v20, %v6226_v54  ;;  %v306_v44 = vand.u32 15, %v274_v24 }
  0x6b   : > { %vm1343_vm14 = vmpackc.low %vm1247_vm2, %vm1247_vm2  ;;  %vm6709_vm10 = vcmp.ne.s16.totalorder %v1457_v12, 0  ;;  %v8560_v34 = vmov 0  ;;  %v325_v57 = vand.u32 15, %v293_v52  ;;  %v308_v6 = vand.u32 15, %v276_v17 }
  0x6c   : > { %v8561_v34 = vsel %vm6709_vm10, 4294967295, %v8560_v34  ;;  %v6716_v13 = vsel %vm6051_vm1, %v6124_v43, 0  ;;  %vm8563_vm11 = vcmask 1046528   ;;  %v1375_v23 = vsel %vm1343_vm14, 65537, %v8500_v8 }
  0x6d   : > { %8562 = vst [vmem:[#allocation41_spill] sm:$0xff] %v8561_v34  ;;  %v2643_v0 = vsel %vm8563_vm11, %v2640_v9, %v2642_v27  ;;  %v2526_v20 = vsel %vm6709_vm10, %v6310_v16, 0  ;;  %vm338_vm2 = vcmp.ge.s32.totalorder %v306_v44, 1  ;;  %vm8564_vm3 = vcmask 130048  }
  0x6e   : > { %5400 = vmatprep.mubr.msk.bf16.mxu0 %vm8564_vm3, %v2643_v0  ;;  %v1459_v1 = vrot.slane %v1375_v23, 7  ;;  %vm6724_vm4 = vmpackc.low %vm338_vm2, %vm338_vm2  ;;  %vm1249_vm6 = vcmp.lt.s32.totalorder %v325_v57, 15  ;;  %vm340_vm9 = vcmp.ge.s32.totalorder %v308_v6, 1  ;;  %v295_v43 = vadd.s32 232, %v6036_v3 }
  0x6f   : > { %v466_v9 = vsel %vm6724_vm4, %v6113_v33, 0  ;;  %vm1345_vm14 = vmpackc.low %vm1249_vm6, %vm1249_vm6  ;;  %v278_v24 = vadd.s32 96, %v6036_v3  ;;  %v6736_v14 = vsel %vm6051_vm1, %v6136_v50, 0  ;;  %v297_v17 = vadd.s32 248, %v6036_v3 }
  0x70   : > { %5249 = vmatmul.mubr.msk.bf16.gmra.mrb[4].mxu1 %vm8564_vm3, %v4705_v2  ;;  %v6743_v12 = vsel %vm6237_vm12, %v6242_v19, %v1459_v1  ;;  %v4706_v44 = vcombine.low %v466_v9, %v6699_v41  ;;  %v1377_v33 = vsel %vm1345_vm14, 65537, %v8500_v8  ;;  %v1461_v57 = vrot.slane %v1459_v1, 4  ;;  %vm6747_vm6 = vmpackc.low %vm340_vm9, %vm340_vm9 }
  0x71   : > { %8567 = vst [vmem:[#allocation42_spill] sm:$0xff] %v6743_v12  ;;  %vm8404_vm11 = vcmp.ne.s16.totalorder %v6743_v12, 0  ;;  %v1465_v50 = vrot.slane %v1377_v33, 7  ;;  %v468_v2 = vsel %vm6747_vm6, %v6121_v39, 0  ;;  %v327_v0 = vand.u32 15, %v295_v43  ;;  %vm8570_vm2 = vmmov %vm8564_vm3 }
  0x72   : > { %v2527_v23 = vsel %vm8404_vm11, %v6313_v31, 0  ;;  %5252 = vmatprep.mubr.msk.bf16.mxu1 %vm8570_vm2, %v4706_v44  ;;  %v1463_v1 = vsel %vm6237_vm12, %v1461_v57, %v6226_v54  ;;  %v4707_v9 = vcombine.low %v468_v2, %v6716_v13  ;;  %v310_v34 = vand.u32 15, %v278_v24 }
  0x73   : > { %v4841_v28 = vcombine.low %v2526_v20, %v2527_v23  ;;  %v6766_v33 = vsel %vm6237_vm12, %v6242_v19, %v1465_v50  ;;  %vm6768_vm9 = vcmp.ne.s16.totalorder %v1463_v1, 0  ;;  %v8572_v39 = vmov 0 }
  0x74   : > { %8571 = vst [vmem:[#allocation43_spill] sm:$0xff] %v6766_v33  ;;  %v8573_v39 = vsel %vm6768_vm9, 4294967295, %v8572_v39  ;;  %vm1251_vm14 = vcmp.lt.s32.totalorder %v327_v0, 15  ;;  %vm8409_vm3 = vcmp.ne.s16.totalorder %v6766_v33, 0  ;;  %v2528_v43 = vsel %vm6768_vm9, %v6403_v45, 0 }
  0x75   : > { %8574 = vst [vmem:[#allocation44_spill] sm:$0xff] %v8573_v39  ;;  %vm1347_vm2 = vmpackc.low %vm1251_vm14, %vm1251_vm14  ;;  %v1467_v44 = vrot.slane %v1465_v50, 4  ;;  %vm342_vm11 = vcmp.ge.s32.totalorder %v310_v34, 1  ;;  %v2644_v20 = vrot.slane %v4841_v28, 1  ;;  %v2529_v24 = vsel %vm8409_vm3, %v6406_v36, 0 }
  0x76   : > { %v1379_v57 = vsel %vm1347_vm2, 65537, %v8500_v8  ;;  %vm6780_vm10 = vmpackc.low %vm342_vm11, %vm342_vm11  ;;  %v8575_v2 = vmov 0  ;;  %v329_v0 = vand.u32 15, %v297_v17  ;;  %v4842_v23 = vcombine.low %v2528_v43, %v2529_v24 }
  0x77   : > { %v8576_v2 = vsel %vm6780_vm10, 4294967295, %v8575_v2  ;;  %v1469_v1 = vsel %vm6237_vm12, %v1467_v44, %v6226_v54  ;;  %v1471_v39 = vrot.slane %v1379_v57, 7  ;;  %v470_v28 = vsel %vm6780_vm10, %v6133_v49, 0 }
  0x78   : > { %vm8577_vm14 = vcmask 1046528   ;;  %vm6791_vm3 = vcmp.ne.s16.totalorder %v1469_v1, 0  ;;  %v8578_v50 = vmov 0  ;;  %v4708_v33 = vcombine.low %v470_v28, %v6736_v14 }
  0x79   : > { %v2645_v34 = vsel %vm8577_vm14, %v2642_v27, %v2644_v20  ;;  %v8579_v50 = vsel %vm6791_vm3, 4294967295, %v8578_v50  ;;  %vm1253_vm11 = vcmp.lt.s32.totalorder %v329_v0, 15  ;;  %vm8581_vm2 = vcmask 130048  }
  0x7a   : > { %8580 = vst [vmem:[#allocation45_spill] sm:$0xff] %v8579_v50  ;;  %5401 = vmatmul.mubr.msk.bf16.gmra.mrb[20].mxu0 %vm8581_vm2, %v2645_v34  ;;  %v2646_v17 = vrot.slane %v4842_v23, 1  ;;  %vm8582_vm9 = vmmov %vm8581_vm2  ;;  %v6801_v43 = vsel %vm6237_vm12, %v6242_v19, %v1471_v39  ;;  %v2530_v49 = vsel %vm6791_vm3, %v6417_v15, 0  ;;  %v1473_v27 = vrot.slane %v1471_v39, 4  ;;  %v8630_v50 = vld [vmem:[#allocation12_spill] sm:$0xff] }
  0x7b   : > { %5253 = vmatmul.mubr.msk.bf16.gmra.mrb[8].mxu1 %vm8582_vm9, %v4707_v9  ;;  %8583 = vst [vmem:[#allocation46_spill] sm:$0xff] %v6801_v43  ;;  %vm1349_vm14 = vmpackc.low %vm1253_vm11, %vm1253_vm11  ;;  %vm8418_vm5 = vcmp.ne.s16.totalorder %v6801_v43, 0  ;;  %v280_v9 = vadd.s32 112, %v6036_v3  ;;  %vm8585_vm9 = vcmask 1046528   ;;  %v6866_v43 = vsel %vm6051_vm1, %v6151_v62, 0 }
  0x7c   : > { %vm8584_vm10 = vmmov %vm8581_vm2  ;;  %v1381_v44 = vsel %vm1349_vm14, 65537, %v8500_v8  ;;  %v2647_v24 = vsel %vm8585_vm9, %v2644_v20, %v2646_v17  ;;  %v2531_v57 = vsel %vm8418_vm5, %v6429_v32, 0  ;;  %v1475_v0 = vsel %vm6237_vm12, %v1473_v27, %v6226_v54  ;;  %v6840_v27 = vld [vmem:[%s6059_s6 + $0x88] sm:$0xf]  ;;  %v8706_v7 = vld [vmem:[#allocation44_spill] sm:$0xff] }
  0x7d   : > { %5256 = vmatprep.mubr.msk.bf16.mxu1 %vm8584_vm10, %v4708_v33  ;;  %v1477_v39 = vrot.slane %v1381_v44, 7  ;;  %vm8586_vm11 = vmmov %vm8581_vm2  ;;  %v4843_v23 = vcombine.low %v2530_v49, %v2531_v57  ;;  %v6819_v33 = vld [vmem:[%s6059_s6 + $0x84] sm:$0xf]  ;;  %vm6821_vm10 = vcmp.ne.s16.totalorder %v1475_v0, 0  ;;  %v8588_v8 = vmov 0  ;;  %8592 = vst [vmem:[#allocation50_spill] sm:$0xff] %v6840_v27 }
  0x7e   : > { %5404 = vmatprep.mubr.msk.bf16.mxu0 %vm8586_vm11, %v2647_v24  ;;  %8587 = vst [vmem:[#allocation47_spill] sm:$0xff] %v6819_v33  ;;  %v8589_v8 = vsel %vm6821_vm10, 4294967295, %v8588_v8  ;;  %v312_v1 = vand.u32 15, %v280_v9  ;;  %v282_v20 = vadd.s32 128, %v6036_v3  ;;  %v2532_v34 = vsel %vm6821_vm10, %v6475_v18, 0 }
  0x7f   : > { %8590 = vst [vmem:[#allocation48_spill] sm:$0xff] %v8589_v8  ;;  %v6829_v28 = vsel %vm6237_vm12, %v6242_v19, %v1477_v39  ;;  %v6837_v49 = vsel %vm6051_vm1, %v6144_v56, 0  ;;  %v6842_v44 = vrot.slane %v1477_v39, 4  ;;  %v2648_v9 = vrot.slane %v4843_v23, 1 }
  0x80   : > { %8591 = vst [vmem:[#allocation49_spill] sm:$0xff] %v6829_v28  ;;  %vm8423_vm2 = vcmp.ne.s16.totalorder %v6829_v28, 0  ;;  %vm344_vm14 = vcmp.ge.s32.totalorder %v312_v1, 1  ;;  %v314_v59 = vand.u32 15, %v282_v20  ;;  %v284_v56 = vadd.s32 144, %v6036_v3 }
  0x81   : > { %8593 = vst [vmem:[#allocation51_spill] sm:$0xff] %v6842_v44  ;;  %v2533_v19 = vsel %vm8423_vm2, %v6819_v33, 0  ;;  %vm6848_vm12 = vmpackc.low %vm344_vm14, %vm344_vm14  ;;  %vm8422_vm9 = vcmp.ne.s16.totalorder %v6842_v44, 0  ;;  %vm8596_vm11 = vcmask 1046528   ;;  %vm8597_vm5 = vcmask 130048  }
  0x82   : > { %v2649_v57 = vsel %vm8596_vm11, %v2646_v17, %v2648_v9  ;;  %v4844_v0 = vcombine.low %v2532_v34, %v2533_v19  ;;  %v472_v39 = vsel %vm6848_vm12, %v6141_v55, 0  ;;  %v2534_v23 = vsel %vm8422_vm9, %v6840_v27, 0  ;;  %v6873_v55 = vld [vmem:[%s6059_s6 + $0x10] sm:$0xf]  ;;  %vm8602_vm2 = vmmov %vm8597_vm5  ;;  %v7073_v28 = vld [vmem:[%s6059_s6 + $0x1c] sm:$0xf] }
  0x83   : > { %5405 = vmatmul.mubr.msk.bf16.gmra.mrb[24].mxu0 %vm8597_vm5, %v2649_v57  ;;  %v4709_v1 = vcombine.low %v472_v39, %v6837_v49  ;;  %v4845_v20 = vcombine.low %v2534_v23, %v2534_v23  ;;  %vm346_vm14 = vcmp.ge.s32.totalorder %v314_v59, 1  ;;  %8600 = vst [vmem:[#allocation52_spill] sm:$0xff] %v6873_v55  ;;  %v2901_v19 = vsel %vm6519_vm13, %v6873_v55, 0  ;;  %vm8605_vm13 = vmmov %vm8602_vm2 }
  0x84   : > { %v2650_v17 = vrot.slane %v4844_v0, 1  ;;  %vm6868_vm11 = vmpackc.low %vm346_vm14, %vm346_vm14  ;;  %v316_v57 = vand.u32 15, %v284_v56  ;;  %v286_v39 = vadd.s32 160, %v6036_v3  ;;  %v6886_v0 = vsel %vm6051_vm1, %v6178_v26, 0  ;;  %8646 = vst [vmem:[#allocation57_spill] sm:$0xff] %v7073_v28 }
  0x85   : > { %5257 = vmatmul.mubr.msk.bf16.gmra.mrb[12].mxu1 %vm8597_vm5, %v4709_v1  ;;  %v2652_v59 = vrot.slane %v4845_v20, 1  ;;  %v474_v62 = vsel %vm6868_vm11, %v6148_v61, 0  ;;  %vm8601_vm14 = vcmask 1046528   ;;  %v4865_v1 = vcombine.low %v2901_v19, %v6588_v10 }
  0x86   : > { %v2651_v23 = vsel %vm8601_vm14, %v2648_v9, %v2650_v17  ;;  %v4710_v60 = vcombine.low %v474_v62, %v6866_v43  ;;  %vm348_vm9 = vcmp.ge.s32.totalorder %v316_v57, 1  ;;  %v318_v56 = vand.u32 15, %v286_v39  ;;  %v6920_v62 = vld [vmem:[%s6059_s6 + $0x18] sm:$0xf] }
  0x87   : > { %5408 = vmatprep.mubr.msk.bf16.mxu0 %vm8602_vm2, %v2651_v23  ;;  %vm6892_vm5 = vmpackc.low %vm348_vm9, %vm348_vm9  ;;  %v6899_v61 = vsel %vm6051_vm1, %v6222_v51, 0  ;;  %v288_v26 = vadd.s32 176, %v6036_v3  ;;  %v2653_v9 = vsel %vm8601_vm14, %v2650_v17, %v2652_v59  ;;  %v290_v19 = vadd.s32 192, %v6036_v3  ;;  %8608 = vst [vmem:[#allocation53_spill] sm:$0xff] %v6920_v62 }
  0x88   : > { %5260 = vmatprep.mubr.msk.bf16.mxu1 %vm8605_vm13, %v4710_v60  ;;  %v476_v10 = vsel %vm6892_vm5, %v6175_v25, 0  ;;  %vm350_vm2 = vcmp.ge.s32.totalorder %v318_v56, 1  ;;  %v8606_v39 = vmov 0  ;;  %v292_v59 = vadd.s32 208, %v6036_v3 }
  0x89   : > { %v4711_v57 = vcombine.low %v476_v10, %v6886_v0  ;;  %vm6909_vm9 = vmpackc.low %vm350_vm2, %vm350_vm2  ;;  %v320_v51 = vand.u32 15, %v288_v26  ;;  %v322_v60 = vand.u32 15, %v290_v19  ;;  %v2903_v23 = vsel %vm6156_vm8, %v6920_v62, 0 }
  0x8a   : > { %v8607_v39 = vsel %vm6909_vm9, 4294967295, %v8606_v39  ;;  %v478_v17 = vsel %vm6909_vm9, %v6208_v46, 0  ;;  %vm8609_vm2 = vmmov %vm8605_vm13  ;;  %v324_v46 = vand.u32 15, %v292_v59  ;;  %v294_v26 = vadd.s32 224, %v6036_v3 }
  0x8b   : > { %5409 = vmatmul.mubr.msk.bf16.gmra.mrb[28].mxu0 %vm8605_vm13, %v2653_v9  ;;  %v4712_v25 = vcombine.low %v478_v17, %v6899_v61  ;;  %vm352_vm14 = vcmp.ge.s32.totalorder %v320_v51, 1  ;;  %vm354_vm10 = vcmp.ge.s32.totalorder %v322_v60, 1  ;;  %vm8612_vm13 = vmmov %vm8609_vm2  ;;  %v6933_v9 = vld [vmem:[%s6059_s6 + $0x20] sm:$0xf]  ;;  %v6949_v19 = vsel %vm6051_vm1, %v6283_v40, 0 }
  0x8c   : > { %5414 = vmatprep.mubr.msk.bf16.mxu0 %vm8609_vm2, %v4865_v1  ;;  %vm6926_vm3 = vmpackc.low %vm352_vm14, %vm352_vm14  ;;  %8613 = vst [vmem:[#allocation54_spill] sm:$0xff] %v6933_v9  ;;  %v2905_v10 = vsel %vm6615_vm7, %v6933_v9, 0  ;;  %v4866_v51 = vcombine.low %v2903_v23, %v6625_v53  ;;  %v6958_v60 = vsel %vm6051_vm1, %v6296_v48, 0  ;;  %v296_v59 = vadd.s32 240, %v6036_v3 }
  0x8d   : > { %5261 = vmatmul.mubr.msk.bf16.gmra.mrb[16].mxu1 %vm8612_vm13, %v4711_v57  ;;  %vm6938_vm9 = vmpackc.low %vm354_vm10, %vm354_vm10  ;;  %v480_v1 = vsel %vm6926_vm3, %v6268_v35, 0  ;;  %v326_v57 = vand.u32 15, %v294_v26  ;;  %v4867_v35 = vcombine.low %v2905_v10, %v6699_v41  ;;  %vm356_vm10 = vcmp.ge.s32.totalorder %v324_v46, 1  ;;  %v6971_v26 = vld [vmem:[%s6059_s6 + $0x28] sm:$0xf]  ;;  %v8620_v10 = vld [vmem:[#allocation26_spill] sm:$0xff] }
  0x8e   : > { %vm8616_vm8 = vmmov %vm8609_vm2  ;;  %v482_v17 = vsel %vm6938_vm9, %v6293_v47, 0  ;;  %v4713_v40 = vcombine.low %v480_v1, %v6949_v19  ;;  %v2907_v48 = vsel %vm6662_vm15, %v6971_v26, 0  ;;  %v6983_v1 = vld [vmem:[%s6059_s6 + $0x30] sm:$0xf]  ;;  %v7002_v3 = vsel %vm6051_vm1, %v6313_v31, 0  ;;  %v8626_v31 = vld [vmem:[#allocation11_spill] sm:$0xff] }
  0x8f   : > { %5264 = vmatprep.mubr.msk.bf16.mxu1 %vm8616_vm8, %v4712_v25  ;;  %vm358_vm14 = vcmp.ge.s32.totalorder %v326_v57, 1  ;;  %v6966_v25 = vld [vmem:[%s8308_s1 + $0x40] sm:$0xff]   ;;  %v4714_v23 = vcombine.low %v482_v17, %v6958_v60  ;;  %vm6976_vm13 = vmpackc.low %vm356_vm10, %vm356_vm10  ;;  %v2909_v57 = vsel %vm6724_vm4, %v6983_v1, 0  ;;  %v328_v17 = vand.u32 15, %v296_v59 }
  0x90   : > { %8617 = vst [vmem:[#allocation55_spill] sm:$0xff] %v6966_v25  ;;  %vm8621_vm8 = vmmov %vm8609_vm2  ;;  %v4869_v59 = vcombine.low %v2909_v57, %v6736_v14  ;;  %v5951_v41 = vld [vmem:[%s6059_s6 + $0x4] sm:$0xf]  ;;  %v7020_v57 = vld [vmem:[%s6059_s6 + $0x8] sm:$0xf]  ;;  %vm8631_vm15 = vcmp.ne.s16.totalorder %v8630_v50, 0 }
  0x91   : > { %vm8624_vm10 = vmmov %vm8621_vm8  ;;  %8628 = vst [vmem:[#allocation26_spill] sm:$0xff] %v7020_v57  ;;  %v1515_v11 = vsel %vm6278_vm0, %v7020_v57, 0  ;;  %v8633_v53 = vmov 0  ;;  %v8644_v57 = vld [vmem:[#allocation21_spill] sm:$0xff]  ;;  %v1921_v8 = vsel %vm6724_vm4, %v6971_v26, 0  ;;  %vm8671_vm4 = vnez %v8521_v21 }
  0x92   : > { %v1525_v6 = vsel %vm8671_vm4, %v6983_v1, 0  ;;  %v1939_v63 = vsel %vm6976_vm13, %v6403_v45, 0 }
  0x93   : > { %5415 = vmatmul.mubr.msk.bf16.vlgmr.msra.gmra.mrb[0].mxu0 %vm8609_vm2, %v4866_v51  ;;  %vm6988_vm2 = vmpackc.low %vm358_vm14, %vm358_vm14  ;;  %vm8625_vm14 = vcmp.ne.s16.totalorder %v6226_v54, 0 }
  0x94   : > { %5447 = vmatpush3.bf16.msra.mxu0 %v8620_v10  ;;  %5418 = vmatprep.mubr.msk.bf16.mxu0 %vm8621_vm8, %v4867_v35  ;;  %v4868_v35 = vcombine.low %v2907_v48, %v6716_v13  ;;  %v484_v10 = vsel %vm6976_vm13, %v6310_v16, 0  ;;  %v5950_v48 = vld [vmem:[%s6059_s6] sm:$0xf]  ;;  %v1941_v46 = vsel %vm6988_vm2, %v6417_v15, 0 }
  0x95   : > { %5265 = vmatmul.mubr.msk.bf16.gmra.mrb[20].mxu1 %vm8624_vm10, %v4713_v40  ;;  %5480 = vmatprep.subr.bf16.mxu0 %v6966_v25  ;;  %v486_v40 = vsel %vm6988_vm2, %v6403_v45, 0  ;;  %v1513_v16 = vsel %vm8625_vm14, %v5950_v48, 0  ;;  %vm360_vm10 = vcmp.ge.s32.totalorder %v328_v17, 1  ;;  %v5953_v25 = vld [vmem:[%s6059_s6 + $0xc] sm:$0xf]  ;;  %v4715_v44 = vcombine.low %v484_v10, %v7002_v3 }
  0x96   : > { %5268 = vmatprep.mubr.msk.bf16.mxu1 %vm8621_vm8, %v4714_v23  ;;  %v7011_v23 = vsel %vm6051_vm1, %v6406_v36, 0  ;;  %vm8627_vm8 = vcmp.ne.s16.totalorder %v8626_v31, 0  ;;  %v1516_v36 = vsel %vm8631_vm15, %v5953_v25, 0  ;;  %vm8632_vm14 = vcmask 130048   ;;  %v7032_v17 = vld [vmem:[%s6059_s6 + $0x38] sm:$0xf] }
  0x97   : > { %v1514_v58 = vsel %vm8627_vm8, %v5951_v41, 0  ;;  %v4716_v48 = vcombine.low %v486_v40, %v7011_v23  ;;  %v2911_v41 = vsel %vm6747_vm6, %v7032_v17, 0  ;;  %vm7037_vm8 = vmpackc.low %vm360_vm10, %vm360_vm10  ;;  %v4738_v50 = vcombine.low %v1515_v11, %v1516_v36  ;;  %v7044_v25 = vld [vmem:[%s6059_s6 + $0x40] sm:$0xf]  ;;  %v8639_v40 = vld [vmem:[#allocation15_spill] sm:$0xff] }
  0x98   : > { %v8634_v53 = vsel %vm7037_vm8, 4294967295, %v8633_v53  ;;  %v4737_v31 = vcombine.low %v1513_v16, %v1514_v58  ;;  %vm8635_vm15 = vmmov %vm8632_vm14  ;;  %v4870_v10 = vcombine.low %v2911_v41, %v6837_v49  ;;  %v488_v58 = vsel %vm7037_vm8, %v6417_v15, 0  ;;  %v7063_v36 = vld [vmem:[%s6059_s6 + $0x14] sm:$0xf] }
  0x99   : > { %vm8636_vm0 = vmmov %vm8632_vm14  ;;  %v7057_v11 = vsel %vm6051_vm1, %v6429_v32, 0  ;;  %8641 = vst [vmem:[#allocation56_spill] sm:$0xff] %v7063_v36  ;;  %vm8645_vm10 = vnez %v8644_v57  ;;  %vm8650_vm8 = vcmask 1046528  }
  0x9a   : > { %vm8638_vm7 = vmmov %vm8636_vm0  ;;  %v1519_v32 = vsel %vm8645_vm10, %v6920_v62, 0  ;;  %v8659_v62 = vld [vmem:[#allocation24_spill] sm:$0xff] }
  0x9b   : > { %5419 = vmatmul.mubr.msk.bf16.gmra.mrb[4].mxu0 %vm8632_vm14, %v4868_v35  ;;  %vm8637_vm14 = vnez %v8576_v2 }
  0x9c   : > { %5422 = vmatprep.mubr.msk.bf16.mxu0 %vm8635_vm15, %v4869_v59  ;;  %v2913_v35 = vsel %vm8637_vm14, %v7044_v25, 0  ;;  %v1634_v59 = vrot.slane %v4738_v50, 1  ;;  %v8647_v50 = vld [vmem:[#allocation20_spill] sm:$0xff]  ;;  %v1925_v52 = vsel %vm8637_vm14, %v7032_v17, 0  ;;  %vm8673_vm14 = vnez %v8529_v30 }
  0x9d   : > { %5269 = vmatmul.mubr.msk.bf16.gmra.mrb[24].mxu1 %vm8636_vm0, %v4715_v44  ;;  %v1633_v44 = vrot.slane %v4737_v31, 1  ;;  %vm8640_vm0 = vnez %v8639_v40  ;;  %v4871_v54 = vcombine.low %v2913_v35, %v6866_v43  ;;  %vm8648_vm15 = vcmp.ne.s16.totalorder %v8647_v50, 0  ;;  %v7083_v35 = vld [vmem:[%s6059_s6 + $0x48] sm:$0xf] }
  0x9e   : > { %5272 = vmatprep.mubr.msk.bf16.mxu1 %vm8638_vm7, %v4716_v48  ;;  %v1517_v16 = vsel %vm8640_vm0, %v6873_v55, 0  ;;  %v8642_v48 = vld [vmem:[#allocation18_spill] sm:$0xff]  ;;  %v1520_v31 = vsel %vm8648_vm15, %v7073_v28, 0  ;;  %v4717_v40 = vcombine.low %v488_v58, %v7057_v11  ;;  %vm8649_vm0 = vcmask 130048   ;;  %v7090_v58 = vld [vmem:[%s6059_s6 + $0x50] sm:$0xf] }
  0x9f   : > { %vm8643_vm7 = vcmp.ne.s16.totalorder %v8642_v48, 0  ;;  %v1635_v48 = vsel %vm8650_vm8, %v1633_v44, %v1634_v59  ;;  %v2915_v57 = vsel %vm6848_vm12, %v7083_v35, 0  ;;  %vm8652_vm10 = vmmov %vm8649_vm0  ;;  %vm8660_vm15 = vnez %v8659_v62 }
  0xa0   : > { %v1518_v41 = vsel %vm8643_vm7, %v7063_v36, 0  ;;  %v4740_v36 = vcombine.low %v1519_v32, %v1520_v31  ;;  %vm8651_vm7 = vmmov %vm8649_vm0  ;;  %v7101_v31 = vld [vmem:[%s6059_s6 + $0x24] sm:$0xf]  ;;  %v7165_v2 = vcombine.low %v1925_v52, %v6837_v49 }
  0xa1   : > { %v4739_v55 = vcombine.low %v1517_v16, %v1518_v41  ;;  %vm8653_vm8 = vmmov %vm8649_vm0  ;;  %v8654_v41 = vld [vmem:[#allocation23_spill] sm:$0xff]  ;;  %8656 = vst [vmem:[#allocation58_spill] sm:$0xff] %v7101_v31  ;;  %v7217_v52 = vld [vmem:[%s6059_s6 + $0x44] sm:$0xf] }
  0xa2   : > { %v1638_v16 = vrot.slane %v4740_v36, 1 }
  0xa3   : > { %5423 = vmatmul.mubr.msk.bf16.gmra.mrb[8].mxu0 %vm8649_vm0, %v4870_v10  ;;  %v2917_v10 = vsel %vm6868_vm11, %v7090_v58, 0  ;;  %v1636_v44 = vrot.slane %v4739_v55, 1  ;;  %vm8655_vm0 = vnez %v8654_v41  ;;  %v7111_v55 = vld [vmem:[%s6059_s6 + $0x2c] sm:$0xf] }
  0xa4   : > { %5426 = vmatprep.mubr.msk.bf16.mxu0 %vm8651_vm7, %v4871_v54  ;;  %v4872_v54 = vcombine.low %v2915_v57, %v6886_v0  ;;  %v1521_v32 = vsel %vm8655_vm0, %v6933_v9, 0  ;;  %v4873_v28 = vcombine.low %v2917_v10, %v6899_v61  ;;  %8661 = vst [vmem:[#allocation59_spill] sm:$0xff] %v7111_v55  ;;  %v8662_v57 = vld [vmem:[#allocation27_spill] sm:$0xff]  ;;  %v7118_v9 = vld [vmem:[%s6059_s6 + $0x58] sm:$0xf] }
  0xa5   : > { %5273 = vmatmul.mubr.msk.bf16.gmra.mrb[28].mxu1 %vm8652_vm10, %v4717_v40  ;;  %v8657_v40 = vld [vmem:[#allocation22_spill] sm:$0xff]  ;;  %vm8663_vm7 = vcmp.ne.s16.totalorder %v8662_v57, 0 }
  0xa6   : > { %5278 = vmatprep.mubr.msk.bf16.mxu1 %vm8653_vm8, %v1635_v48  ;;  %vm8658_vm10 = vcmp.ne.s16.totalorder %v8657_v40, 0  ;;  %v1523_v48 = vsel %vm8660_vm15, %v6971_v26, 0  ;;  %v1524_v36 = vsel %vm8663_vm7, %v7111_v55, 0  ;;  %vm8664_vm8 = vcmask 1046528  }
  0xa7   : > { %v1522_v50 = vsel %vm8658_vm10, %v7101_v31, 0  ;;  %v1637_v41 = vsel %vm8664_vm8, %v1634_v59, %v1636_v44  ;;  %v2919_v40 = vsel %vm6892_vm5, %v7118_v9, 0  ;;  %vm8665_vm10 = vnez %v8607_v39  ;;  %vm8667_vm0 = vmmov %vm8664_vm8 }
  0xa8   : > { %v2921_v10 = vsel %vm8665_vm10, %v6293_v47, 0  ;;  %v4741_v62 = vcombine.low %v1521_v32, %v1522_v50  ;;  %vm8666_vm15 = vcmask 130048   ;;  %v1639_v31 = vsel %vm8667_vm0, %v1636_v44, %v1638_v16 }
  0xa9   : > { %v4742_v57 = vcombine.low %v1523_v48, %v1524_v36  ;;  %vm8668_vm7 = vmmov %vm8666_vm15  ;;  %v4874_v59 = vcombine.low %v2919_v40, %v6949_v19  ;;  %v4875_v55 = vcombine.low %v2921_v10, %v6958_v60  ;;  %v1923_v47 = vsel %vm6747_vm6, %v6983_v1, 0  ;;  %v7191_v36 = vld [vmem:[%s6059_s6 + $0x68] sm:$0xf] }
  0xaa   : > { %vm8669_vm8 = vmmov %vm8668_vm7  ;;  %v7141_v50 = vcombine.low %v1921_v8, %v6716_v13  ;;  %v7144_v44 = vcombine.low %v1923_v47, %v6736_v14  ;;  %vm8672_vm6 = vcmp.ne.s16.totalorder %v6505_v4, 0  ;;  %v7161_v14 = vld [vmem:[%s8308_s1 + $0x20] sm:$0xff]   ;;  %v1527_v8 = vsel %vm8673_vm14, %v7032_v17, 0  ;;  %8677 = vst [vmem:[#allocation60_spill] sm:$0xff] %v7191_v36 }
  0xab   : > { %5427 = vmatmul.mubr.msk.bf16.gmra.mrb[12].mxu0 %vm8666_vm15, %v4872_v54  ;;  %vm8670_vm0 = vmmov %vm8668_vm7  ;;  %v1642_v54 = vrot.slane %v4742_v57, 1  ;;  %vm8674_vm15 = vcmp.ne.s16.totalorder %v6526_v37, 0  ;;  %v1927_v32 = vsel %vm6848_vm12, %v7044_v25, 0  ;;  %v2923_v24 = vsel %vm6926_vm3, %v7191_v36, 0 }
  0xac   : > { %5430 = vmatprep.mubr.msk.bf16.mxu0 %vm8668_vm7, %v4873_v28  ;;  %v1640_v28 = vrot.slane %v4741_v62, 1  ;;  %v7171_v62 = vld [vmem:[%s6059_s6 + $0x3c] sm:$0xf]  ;;  %v7183_v49 = vcombine.low %v1927_v32, %v6866_v43  ;;  %vm8675_vm7 = vcmask 1046528   ;;  %v1931_v43 = vsel %vm6892_vm5, %v7090_v58, 0 }
  0xad   : > { %5279 = vmatmul.mubr.msk.bf16.vlgmr.msra.gmra.mrb[0].mxu1 %vm8669_vm8, %v1637_v41  ;;  %v1528_v41 = vsel %vm8674_vm15, %v7171_v62, 0  ;;  %vm8676_vm8 = vmmov %vm8670_vm0  ;;  %v1933_v20 = vsel %vm8665_vm10, %v7118_v9, 0  ;;  %vm8681_vm5 = vnez %v8533_v38  ;;  %vm8685_vm10 = vcmp.ne.s16.totalorder %v6609_v5, 0 }
  0xae   : > { %5311 = vmatpush3.bf16.msra.mxu1 %v6670_v42  ;;  %5282 = vmatprep.mubr.msk.bf16.mxu1 %vm8670_vm0, %v1639_v31  ;;  %v7153_v42 = vld [vmem:[%s6059_s6 + $0x34] sm:$0xf]  ;;  %v1929_v31 = vsel %vm6868_vm11, %v7083_v35, 0  ;;  %v1641_v40 = vsel %vm8675_vm7, %v1638_v16, %v1640_v28  ;;  %vm8678_vm12 = vmmov %vm8675_vm7  ;;  %v4744_v10 = vcombine.low %v1527_v8, %v1528_v41  ;;  %v7206_v16 = vcombine.low %v1931_v43, %v6899_v61  ;;  %v7230_v41 = vld [vmem:[%s6059_s6 + $0x4c] sm:$0xf] }
  0xaf   : > { %v1526_v13 = vsel %vm8672_vm6, %v7153_v42, 0  ;;  %5514 = vmatprep.subr.bf16.mxu1 %v7161_v14  ;;  %v7187_v57 = vcombine.low %v1929_v31, %v6886_v0  ;;  %v1643_v34 = vsel %vm8678_vm12, %v1640_v28, %v1642_v54  ;;  %vm8679_vm11 = vmmov %vm8670_vm0  ;;  %v2925_v0 = vsel %vm6938_vm9, %v6403_v45, 0  ;;  %v7236_v31 = vld [vmem:[%s6059_s6 + $0x60] sm:$0xf] }
  0xb0   : > { %v4743_v48 = vcombine.low %v1525_v6, %v1526_v13  ;;  %vm8680_vm6 = vmmov %vm8670_vm0  ;;  %v1646_v47 = vrot.slane %v4744_v10, 1  ;;  %v1529_v28 = vsel %vm8681_vm5, %v7044_v25, 0  ;;  %v8682_v6 = vld [vmem:[#allocation32_spill] sm:$0xff]  ;;  %v7223_v13 = vcombine.low %v1933_v20, %v6949_v19 }
  0xb1   : > { %vm8683_vm15 = vcmp.ne.s16.totalorder %v8682_v6, 0  ;;  %v4877_v8 = vcombine.low %v2925_v0, %v7011_v23  ;;  %vm8684_vm7 = vnez %v8535_v29  ;;  %v1532_v32 = vsel %vm8685_vm10, %v7230_v41, 0 }
  0xb2   : > { %v1530_v61 = vsel %vm8683_vm15, %v7217_v52, 0  ;;  %v1531_v39 = vsel %vm8684_vm7, %v7083_v35, 0  ;;  %v2927_v10 = vsel %vm6976_vm13, %v6417_v15, 0  ;;  %v2929_v0 = vsel %vm6988_vm2, %v6475_v18, 0  ;;  %v7291_v15 = vld [vmem:[%s6059_s6 + $0x5c] sm:$0xf] }
  0xb3   : > { %5431 = vmatmul.mubr.msk.bf16.gmra.mrb[16].mxu0 %vm8676_vm8, %v4874_v59  ;;  %v4876_v59 = vcombine.low %v2923_v24, %v7002_v3  ;;  %vm8686_vm8 = vmmov %vm8678_vm12  ;;  %v4745_v24 = vcombine.low %v1529_v28, %v1530_v61  ;;  %v4746_v43 = vcombine.low %v1531_v39, %v1532_v32  ;;  %vm8691_vm13 = vnez %v8545_v22  ;;  %v7279_v28 = vld [vmem:[%s6059_s6 + $0x54] sm:$0xf]  ;;  %v8694_v32 = vld [vmem:[#allocation39_spill] sm:$0xff] }
  0xb4   : > { %5434 = vmatprep.mubr.msk.bf16.mxu0 %vm8679_vm11, %v4875_v55  ;;  %v1644_v55 = vrot.slane %v4743_v48, 1  ;;  %vm8687_vm12 = vmmov %vm8670_vm0  ;;  %v1533_v20 = vsel %vm8691_vm13, %v7090_v58, 0  ;;  %v8692_v61 = vld [vmem:[#allocation36_spill] sm:$0xff]  ;;  %vm8695_vm15 = vnez %v8694_v32  ;;  %vm8698_vm10 = vnez %v8634_v53 }
  0xb5   : > { %5283 = vmatmul.mubr.msk.bf16.gmra.mrb[4].mxu1 %vm8670_vm0, %v1641_v40  ;;  %v1935_v40 = vsel %vm6926_vm3, %v7236_v31, 0  ;;  %vm8688_vm11 = vmmov %vm8686_vm8  ;;  %v1648_v45 = vrot.slane %v4745_v24, 1  ;;  %v1535_v51 = vsel %vm8695_vm15, %v7118_v9, 0  ;;  %v1943_v24 = vsel %vm8698_vm10, %v6475_v18, 0 }
  0xb6   : > { %5286 = vmatprep.mubr.msk.bf16.mxu1 %vm8680_vm6, %v1643_v34  ;;  %v7242_v19 = vcombine.low %v1935_v40, %v6958_v60  ;;  %v1645_v48 = vsel %vm8686_vm8, %v1642_v54, %v1644_v55  ;;  %v1937_v34 = vsel %vm6938_vm9, %v7191_v36, 0  ;;  %v1647_v56 = vsel %vm8688_vm11, %v1644_v55, %v1646_v47  ;;  %vm8689_vm3 = vmmov %vm8670_vm0  ;;  %v8696_v40 = vld [vmem:[#allocation37_spill] sm:$0xff] }
  0xb7   : > { %v7254_v60 = vcombine.low %v1937_v34, %v7002_v3  ;;  %vm8690_vm9 = vmmov %vm8670_vm0  ;;  %v1944_v54 = vsel %vm6051_vm1, %v6819_v33, 0  ;;  %v7268_v3 = vcombine.low %v1939_v63, %v7011_v23  ;;  %v1650_v55 = vrot.slane %v4746_v43, 1  ;;  %v7300_v34 = vld [vmem:[%s6059_s6 + $0x8c] sm:$0xf] }
  0xb8   : > { %vm8693_vm6 = vcmp.ne.s16.totalorder %v8692_v61, 0  ;;  %v4879_v39 = vcombine.low %v2929_v0, %v1944_v54  ;;  %vm8697_vm2 = vcmp.ne.s16.totalorder %v8696_v40, 0  ;;  %vm8700_vm11 = vmmov %vm8686_vm8  ;;  %v2931_v0 = vsel %vm8698_vm10, %v6840_v27, 0 }
  0xb9   : > { %v1534_v23 = vsel %vm8693_vm6, %v7279_v28, 0  ;;  %v1651_v43 = vsel %vm8700_vm11, %v1648_v45, %v1650_v55 }
  0xbb   : > { %5435 = vmatmul.mubr.msk.bf16.gmra.mrb[20].mxu0 %vm8687_vm12, %v4876_v59  ;;  %v4878_v59 = vcombine.low %v2927_v10, %v7057_v11  ;;  %v1649_v10 = vsel %vm8686_vm8, %v1646_v47, %v1648_v45  ;;  %vm8699_vm12 = vmmov %vm8670_vm0  ;;  %v8703_v45 = vld [vmem:[#allocation41_spill] sm:$0xff] }
  0xbc   : > { %5438 = vmatprep.mubr.msk.bf16.mxu0 %vm8689_vm3, %v4877_v8  ;;  %v7285_v8 = vcombine.low %v1941_v46, %v7057_v11  ;;  %v7302_v11 = vcombine.low %v1943_v24, %v1944_v54  ;;  %vm8701_vm3 = vmmov %vm8670_vm0  ;;  %v2932_v54 = vsel %vm6051_vm1, %v7300_v34, 0  ;;  %vm8704_vm6 = vnez %v8703_v45 }
  0xbd   : > { %5287 = vmatmul.mubr.msk.bf16.gmra.mrb[8].mxu1 %vm8690_vm9, %v1645_v48  ;;  %v1536_v48 = vsel %vm8697_vm2, %v7291_v15, 0  ;;  %vm8702_vm9 = vmmov %vm8670_vm0  ;;  %vm8705_vm2 = vcmp.ne.s16.totalorder %v6743_v12, 0  ;;  %vm8707_vm1 = vnez %v8706_v7 }
  0xbe   : > { %5290 = vmatprep.mubr.msk.bf16.mxu1 %vm8670_vm0, %v1647_v56  ;;  %v4747_v56 = vcombine.low %v1533_v20, %v1534_v23  ;;  %v4748_v63 = vcombine.low %v1535_v51, %v1536_v48  ;;  %v1537_v20 = vsel %vm8704_vm6, %v7236_v31, 0  ;;  %v7320_v23 = vld [vmem:[%s6059_s6 + $0x64] sm:$0xf]  ;;  %v7329_v51 = vld [vmem:[%s6059_s6 + $0x6c] sm:$0xf] }
  0xbf   : > { %v1538_v53 = vsel %vm8705_vm2, %v7320_v23, 0  ;;  %8708 = vst [vmem:[#allocation32_spill] sm:$0xff] %v7329_v51  ;;  %v8709_v48 = vld [vmem:[#allocation43_spill] sm:$0xff] }
  0xc0   : > { %v1652_v47 = vrot.slane %v4747_v56, 1  ;;  %v1654_v46 = vrot.slane %v4748_v63, 1  ;;  %vm8710_vm10 = vcmp.ne.s16.totalorder %v8709_v48, 0  ;;  %v4749_v12 = vcombine.low %v1537_v20, %v1538_v53  ;;  %v8716_v48 = vld [vmem:[#allocation51_spill] sm:$0xff] }
  0xc1   : > { %v1540_v24 = vsel %vm8710_vm10, %v7329_v51, 0 }
  0xc2   : > { %v1653_v7 = vsel %vm8700_vm11, %v1650_v55, %v1652_v47  ;;  %v1656_v20 = vrot.slane %v4749_v12, 1 }
  0xc3   : > { %5439 = vmatmul.mubr.msk.bf16.gmra.mrb[24].mxu0 %vm8699_vm12, %v4878_v59  ;;  %v4880_v59 = vcombine.low %v2931_v0, %v2932_v54  ;;  %v7341_v0 = vld [vmem:[%s6059_s6 + $0x90] sm:$0x1] }
  0xc4   : > { %5442 = vmatprep.mubr.msk.bf16.mxu0 %vm8701_vm3, %v4879_v39  ;;  %v1539_v39 = vsel %vm8707_vm1, %v7191_v36, 0  ;;  %vm8717_vm3 = vcmp.ne.s16.totalorder %v8716_v48, 0 }
  0xc5   : > { %5291 = vmatmul.mubr.msk.bf16.gmra.mrb[12].mxu1 %vm8702_vm9, %v1649_v10  ;;  %v8711_v10 = vld [vmem:[#allocation48_spill] sm:$0xff]  ;;  %v3522_v45 = vsel %vm8717_vm3, %v7341_v0, 0  ;;  %vm8718_vm9 = vmmov %vm8670_vm0  ;;  %v4750_v51 = vcombine.low %v1539_v39, %v1540_v24 }
  0xc6   : > { %5294 = vmatprep.mubr.msk.bf16.mxu1 %vm8670_vm0, %v1651_v43  ;;  %vm8712_vm8 = vnez %v8711_v10  ;;  %v8713_v43 = vld [vmem:[#allocation49_spill] sm:$0xff]  ;;  %vm8719_vm0 = vmmov %vm8700_vm11  ;;  %v4937_v36 = vcombine.low %v3522_v45, %v3522_v45  ;;  %v7363_v39 = vld [vmem:[%s6059_s6 + $0x74] sm:$0xf] }
  0xc7   : > { %v3520_v56 = vsel %vm8712_vm8, %v6840_v27, 0  ;;  %vm8714_vm12 = vcmp.ne.s16.totalorder %v8713_v43, 0  ;;  %v1655_v40 = vsel %vm8719_vm0, %v1652_v47, %v1654_v46  ;;  %vm8721_vm2 = vmmov %vm8718_vm9  ;;  %v1658_v53 = vrot.slane %v4750_v51, 1  ;;  %v8726_v45 = vld [vmem:[#allocation46_spill] sm:$0xff] }
  0xc8   : > { %v3521_v63 = vsel %vm8714_vm12, %v7300_v34, 0  ;;  %vm8722_vm10 = vmmov %vm8721_vm2  ;;  %v3640_v55 = vrot.slane %v4937_v36, 1  ;;  %vm8727_vm3 = vcmp.ne.s16.totalorder %v8726_v45, 0 }
  0xc9   : > { %v7343_v54 = vcombine.low %v3520_v56, %v3521_v63  ;;  %v8720_v56 = vld [vmem:[#allocation4_spill] sm:$0xff]  ;;  %vm8723_vm12 = vmmov %vm8721_vm2  ;;  %v1542_v24 = vsel %vm8727_vm3, %v7363_v39, 0 }
  0xca   : > { %v7357_v63 = vld [vmem:[%s6059_s6 + $0x70] sm:$0xf]  ;;  %vm8736_vm3 = vmmov %vm8722_vm10 }
  0xcb   : > { %8715 = vst [vmem:[#allocation36_spill] sm:$0xff] %v7343_v54  ;;  %5443 = vmatmul.mubr.msk.bf16.gmra.mrb[28].mxu0 %vm8718_vm9, %v4880_v59  ;;  %v8464_v32 = vrot.slane %v7343_v54, 1  ;;  %v8724_v59 = vld [vmem:[#allocation45_spill] sm:$0xff]  ;;  %vm8728_vm9 = vmmov %vm8719_vm0  ;;  %vm8730_vm0 = vcmp.ne.s16.totalorder %v8713_v43, 0  ;;  %v8735_v54 = vld [vmem:[#allocation6_spill] sm:$0xff] }
  0xcc   : > { %5448 = vmatprep.mubr.msk.bf16.mxu0 %vm8721_vm2, %v8720_v56  ;;  %vm8725_vm11 = vnez %v8724_v59  ;;  %vm8731_vm2 = vmmov %vm8728_vm9  ;;  %v8732_v59 = vld [vmem:[#allocation5_spill] sm:$0xff] }
  0xcd   : > { %5295 = vmatmul.mubr.msk.bf16.gmra.mrb[16].mxu1 %vm8722_vm10, %v1653_v7  ;;  %v1541_v47 = vsel %vm8725_vm11, %v7357_v63, 0  ;;  %v7371_v36 = vsel %vm8728_vm9, %v8464_v32, %v3640_v55  ;;  %v7380_v7 = vld [vmem:[%s6059_s6 + $0x7c] sm:$0xf]  ;;  %v1657_v56 = vsel %vm8731_vm2, %v1654_v46, %v1656_v20  ;;  %vm8738_vm9 = vmmov %vm8736_vm3 }
  0xce   : > { %5298 = vmatprep.mubr.msk.bf16.mxu1 %vm8723_vm12, %v1655_v40  ;;  %8729 = vst [vmem:[#allocation48_spill] sm:$0xff] %v7371_v36  ;;  %v7374_v40 = vld [vmem:[%s6059_s6 + $0x78] sm:$0xf]  ;;  %v1544_v51 = vsel %vm8730_vm0, %v7380_v7, 0  ;;  %v4751_v45 = vcombine.low %v1541_v47, %v1542_v24  ;;  %vm8733_vm12 = vmmov %vm8731_vm2  ;;  %v8734_v36 = vld [vmem:[#allocation55_spill] sm:$0xff]  ;;  %vm8739_vm0 = vcmp.ne.s16.totalorder %v8716_v48, 0 }
  0xcf   : > { %v1543_v12 = vsel %vm8712_vm8, %v7374_v40, 0  ;;  %v1659_v55 = vsel %vm8733_vm12, %v1656_v20, %v1658_v53  ;;  %vm8737_vm8 = vmmov %vm8736_vm3  ;;  %v1545_v46 = vsel %vm8739_vm0, %v6475_v18, 0  ;;  %v8740_v20 = vld [vmem:[#allocation8_spill] sm:$0xff] }
  0xd0   : > { %v4752_v32 = vcombine.low %v1543_v12, %v1544_v51  ;;  %v1660_v10 = vrot.slane %v4751_v45, 1  ;;  %v4753_v47 = vcombine.low %v1545_v46, %v1545_v46  ;;  %vm8742_vm12 = vmmov %vm8731_vm2  ;;  %v8747_v45 = vld [vmem:[#allocation31_spill] sm:$0xff]  ;;  %v8751_v51 = vld [vmem:[#allocation10_spill] sm:$0xff] }
  0xd1   : > { %vm8748_vm11 = vnez %v8747_v45  ;;  %vm8749_vm0 = vmmov %vm8731_vm2  ;;  %v8771_v45 = vld [vmem:[#allocation40_spill] sm:$0xff] }
  0xd2   : > { %v1662_v43 = vrot.slane %v4752_v32, 1  ;;  %v1664_v32 = vrot.slane %v4753_v47, 1 }
  0xd3   : > { %5449 = vmatmul.mubr.msk.bf16.vlgmr.msra.gmra.mrb[0].mxu0 %vm8722_vm10, %v8732_v59  ;;  %v1661_v59 = vsel %vm8731_vm2, %v1658_v53, %v1660_v10  ;;  %vm8741_vm10 = vmmov %vm8736_vm3  ;;  %v8750_v53 = vld [vmem:[#allocation3_spill] sm:$0xff] }
  0xd4   : > { %5481 = vmatpush3.bf16.msra.mxu0 %v8734_v36  ;;  %5452 = vmatprep.mubr.msk.bf16.mxu0 %vm8736_vm3, %v8735_v54  ;;  %v1663_v24 = vsel %vm8742_vm12, %v1660_v10, %v1662_v43  ;;  %v8743_v36 = vld [vmem:[#allocation9_spill] sm:$0xff]  ;;  %v8746_v54 = vld [vmem:[#allocation26_spill] sm:$0xff]  ;;  %v1665_v48 = vsel %vm8749_vm0, %v1662_v43, %v1664_v32  ;;  %vm8752_vm2 = vmmov %vm8736_vm3 }
  0xd5   : > { %5299 = vmatmul.mubr.msk.bf16.gmra.mrb[20].mxu1 %vm8737_vm8, %v1657_v56  ;;  %vm8744_vm8 = vmmov %vm8736_vm3  ;;  %v1913_v18 = vsel %vm8748_vm11, %v8746_v54, 0  ;;  %v8753_v56 = vld [vmem:[#allocation14_spill] sm:$0xff]  ;;  %v8761_v43 = vld [vmem:[#allocation16_spill] sm:$0xff] }
  0xd6   : > { %5302 = vmatprep.mubr.msk.bf16.mxu1 %vm8738_vm9, %v1659_v55  ;;  %vm8745_vm9 = vmmov %vm8736_vm3  ;;  %v4773_v12 = vcombine.low %v1913_v18, %v8750_v53  ;;  %v8757_v55 = vld [vmem:[#allocation53_spill] sm:$0xff]  ;;  %v8758_v10 = vld [vmem:[#allocation34_spill] sm:$0xff] }
  0xd7   : > { %vm8755_vm12 = vmmov %vm8752_vm2  ;;  %v8769_v32 = vld [vmem:[#allocation38_spill] sm:$0xff] }
  0xd8   : > { %vm8762_vm11 = vmmov %vm8752_vm2  ;;  %v7435_v53 = vld [vmem:[%s6059_s6 + $0x80] sm:$0xf] }
  0xd9   : > { %vm8766_vm0 = vmmov %vm8752_vm2  ;;  %8774 = vst [vmem:[#allocation49_spill] sm:$0xff] %v7435_v53 }
  0xdb   : > { %5453 = vmatmul.mubr.msk.bf16.gmra.mrb[4].mxu0 %vm8741_vm10, %v8740_v20  ;;  %vm8754_vm10 = vmmov %vm8752_vm2  ;;  %v8763_v20 = vld [vmem:[#allocation17_spill] sm:$0xff] }
  0xdc   : > { %5456 = vmatprep.mubr.msk.bf16.mxu0 %vm8736_vm3, %v8743_v36  ;;  %vm8756_vm3 = vmmov %vm8752_vm2  ;;  %v8768_v36 = vld [vmem:[#allocation54_spill] sm:$0xff] }
  0xdd   : > { %5303 = vmatmul.mubr.msk.bf16.gmra.mrb[24].mxu1 %vm8744_vm8, %v1661_v59  ;;  %vm8759_vm8 = vnez %v8758_v10  ;;  %v8760_v59 = vld [vmem:[#allocation35_spill] sm:$0xff] }
  0xde   : > { %5306 = vmatprep.mubr.msk.bf16.mxu1 %vm8745_vm9, %v1663_v24  ;;  %v1917_v46 = vsel %vm8759_vm8, %v8757_v55, 0  ;;  %vm8764_vm9 = vmmov %vm8752_vm2  ;;  %v8765_v24 = vld [vmem:[#allocation33_spill] sm:$0xff] }
  0xdf   : > { %v4775_v47 = vcombine.low %v1917_v46, %v8760_v59  ;;  %vm8777_vm8 = vmmov %vm8766_vm0  ;;  %v8779_v59 = vld [vmem:[#allocation28_spill] sm:$0xff] }
  0xe3   : > { %5457 = vmatmul.mubr.msk.bf16.gmra.mrb[8].mxu0 %vm8752_vm2, %v8751_v51  ;;  %vm8767_vm2 = vmmov %vm8766_vm0  ;;  %v8775_v51 = vld [vmem:[#allocation25_spill] sm:$0xff] }
  0xe4   : > { %5460 = vmatprep.mubr.msk.bf16.mxu0 %vm8754_vm10, %v8753_v56  ;;  %vm8770_vm10 = vnez %v8769_v32  ;;  %v4901_v32 = vcombine.low %v7341_v0, %v7341_v0 }
  0xe5   : > { %5307 = vmatmul.mubr.msk.bf16.gmra.mrb[28].mxu1 %vm8755_vm12, %v1665_v48  ;;  %v1919_v54 = vsel %vm8770_vm10, %v8768_v36, 0  ;;  %v8772_v48 = vld [vmem:[#allocation19_spill] sm:$0xff]  ;;  %vm8773_vm12 = vmmov %vm8766_vm0 }
  0xe6   : > { %5312 = vmatprep.mubr.msk.bf16.mxu1 %vm8756_vm3, %v4773_v12  ;;  %v4776_v18 = vcombine.low %v1919_v54, %v8771_v45  ;;  %v4808_v12 = vcombine.low %v7435_v53, %v6819_v33  ;;  %vm8776_vm3 = vmmov %vm8766_vm0  ;;  %v8785_v45 = vld [vmem:[#allocation7_spill] sm:$0xff]  ;;  %v3281_v53 = vshll.u32 %v4901_v32, 16 }
  0xe7   : > { %vm8783_vm10 = vmmov %vm8766_vm0 }
  0xe8   : > { %v2285_v56 = vshll.u32 %v4808_v12, 16  ;;  %v2289_v10 = vshrl.u32 %v4808_v12, 16  ;;  %v8787_v12 = vld [vmem:[#allocation56_spill] sm:$0xff] }
  0xeb   : > { %5461 = vmatmul.mubr.msk.bf16.gmra.mrb[12].mxu0 %vm8762_vm11, %v8761_v43  ;;  %vm8778_vm11 = vmmov %vm8766_vm0 }
  0xec   : > { %5464 = vmatprep.mubr.msk.bf16.mxu0 %vm8764_vm9, %v8763_v20  ;;  %vm8780_vm9 = vmmov %vm8766_vm0 }
  0xed   : > { %5313 = vmatmul.mubr.msk.bf16.vlgmr.msra.gmra.mrb[0].mxu1 %vm8766_vm0, %v8765_v24  ;;  %v8781_v24 = vld [vmem:[#allocation30_spill] sm:$0xff] }
  0xee   : > { %5515 = vmatpush3.bf16.msra.mxu1 %v7161_v14  ;;  %5316 = vmatprep.mubr.msk.bf16.mxu1 %vm8767_vm2, %v4775_v47  ;;  %v4900_v14 = vcombine.low %v6840_v27, %v7300_v34  ;;  %v2287_v47 = vrot.slane %v2285_v56, 1  ;;  %vm8782_vm2 = vmmov %vm8766_vm0  ;;  %v8788_v56 = vld [vmem:[#allocation11_spill] sm:$0xff]  ;;  %v8790_v27 = vld [vmem:[#allocation13_spill] sm:$0xff] }
  0xf0   : > { %v3273_v46 = vshll.u32 %v4900_v14, 16  ;;  %v7454_v34 = vor.u32 %v2289_v10, %v2287_v47 }
  0xf2   : > { %v3275_v54 = vrot.slane %v3273_v46, 1  ;;  %v8795_v46 = vld [vmem:[#allocation29_spill] sm:$0xff] }
  0xf3   : > { %5465 = vmatmul.mubr.msk.bf16.gmra.mrb[16].mxu0 %vm8773_vm12, %v8772_v48  ;;  %vm8786_vm12 = vcmp.ne.s16.totalorder %v8785_v45, 0 }
  0xf4   : > { %5468 = vmatprep.mubr.msk.bf16.mxu0 %vm8776_vm3, %v8775_v51  ;;  %vm8789_vm3 = vcmp.ne.s16.totalorder %v8788_v56, 0 }
  0xf5   : > { %5317 = vmatmul.mubr.msk.bf16.gmra.mrb[4].mxu1 %vm8777_vm8, %v4776_v18  ;;  %vm8791_vm8 = vnez %v8790_v27 }
  0xf6   : > { %5320 = vmatprep.mubr.msk.bf16.mxu1 %vm8778_vm11, %v7141_v50  ;;  %v8784_v50 = vld [vmem:[#allocation52_spill] sm:$0xff]  ;;  %v3492_v0 = vsel %vm8791_vm8, %v8757_v55, 0  ;;  %v3283_v55 = vrot.slane %v3281_v53, 1 }
  0xf7   : > { %v3490_v18 = vsel %vm8786_vm12, %v8784_v50, 0  ;;  %vm8799_vm12 = vmmov %vm8782_vm2 }
  0xfb   : > { %5469 = vmatmul.mubr.msk.bf16.gmra.mrb[20].mxu0 %vm8780_vm9, %v8779_v59  ;;  %v8792_v59 = vld [vmem:[#allocation57_spill] sm:$0xff]  ;;  %vm8796_vm9 = vsmask.f32 7424 }
  0xfc   : > { %5472 = vmatprep.mubr.msk.bf16.mxu0 %vm8766_vm0, %v8781_v24  ;;  %v3491_v24 = vsel %vm8789_vm3, %v8787_v12, 0  ;;  %v7472_v33 = vsel %vm8796_vm9, %v8795_v46, %v2287_v47  ;;  %vm8797_vm0 = vmmov %vm8796_vm9  ;;  %v8802_v12 = vld [vmem:[#allocation58_spill] sm:$0xff] }
  0xfd   : > { %5321 = vmatmul.mubr.msk.bf16.gmra.mrb[8].mxu1 %vm8782_vm2, %v7144_v44  ;;  %v8793_v44 = vld [vmem:[#allocation12_spill] sm:$0xff]  ;;  %v3276_v50 = vsel %vm8797_vm0, %v7454_v34, %v3275_v54  ;;  %v4921_v45 = vcombine.low %v3490_v18, %v3491_v24  ;;  %v8806_v18 = vld [vmem:[#allocation21_spill] sm:$0xff] }
  0xfe   : > { %5324 = vmatprep.mubr.msk.bf16.mxu1 %vm8783_vm10, %v7165_v2  ;;  %vm8794_vm11 = vcmp.ne.s16.totalorder %v8793_v44, 0  ;;  %v3277_v2 = vshrl.u32 %v4900_v14, 16  ;;  %vm8798_vm10 = vmmov %vm8782_vm2  ;;  %v8800_v14 = vld [vmem:[#allocation15_spill] sm:$0xff]  ;;  %v8803_v44 = vld [vmem:[#allocation18_spill] sm:$0xff]  ;;  %vm8807_vm9 = vnez %v8806_v18 }
  0xff   : > { %v3493_v10 = vsel %vm8794_vm11, %v8792_v59, 0  ;;  %v3609_v59 = vrot.slane %v4921_v45, 1  ;;  %vm8801_vm3 = vnez %v8800_v14  ;;  %vm8804_vm8 = vcmp.ne.s16.totalorder %v8803_v44, 0  ;;  %vm8805_vm11 = vmmov %vm8782_vm2  ;;  %v8823_v14 = vld [vmem:[#allocation27_spill] sm:$0xff] }
 0x100   : > { %v4922_v56 = vcombine.low %v3492_v0, %v3493_v10  ;;  %v3279_v27 = vor.u32 %v3277_v2, %v3275_v54  ;;  %v3494_v32 = vsel %vm8801_vm3, %v8768_v36, 0  ;;  %v3495_v24 = vsel %vm8804_vm8, %v8802_v12, 0  ;;  %v8808_v54 = vld [vmem:[#allocation59_spill] sm:$0xff]  ;;  %v8809_v0 = vld [vmem:[#allocation20_spill] sm:$0xff]  ;;  %vm8814_vm3 = vmmov %vm8805_vm11 }
 0x101   : > { %v3496_v53 = vsel %vm8807_vm9, %v6971_v26, 0  ;;  %vm8810_vm0 = vcmp.ne.s16.totalorder %v8809_v0, 0  ;;  %v4923_v46 = vcombine.low %v3494_v32, %v3495_v24  ;;  %vm8815_vm8 = vmmov %vm8814_vm3  ;;  %v8816_v26 = vld [vmem:[#allocation23_spill] sm:$0xff] }
 0x102   : > { %v3610_v47 = vrot.slane %v4922_v56, 1  ;;  %v8818_v56 = vld [vmem:[#allocation22_spill] sm:$0xff] }
 0x103   : > { %5473 = vmatmul.mubr.msk.bf16.gmra.mrb[24].mxu0 %vm8782_vm2, %v7472_v33  ;;  %vm8811_vm2 = vsmask.f32 7424  ;;  %vm8819_vm9 = vcmp.ne.s16.totalorder %v8818_v56, 0 }
 0x104   : > { %5476 = vmatprep.mubr.msk.bf16.mxu0 %vm8798_vm10, %v3276_v50  ;;  %v3284_v10 = vsel %vm8811_vm2, %v3279_v27, %v3283_v55  ;;  %vm8812_vm10 = vcmask 1046528   ;;  %v3612_v50 = vrot.slane %v4923_v46, 1  ;;  %v3499_v27 = vsel %vm8819_vm9, %v7153_v42, 0  ;;  %v8821_v55 = vld [vmem:[#allocation24_spill] sm:$0xff]  ;;  %v8858_v46 = vld [vmem:[#allocation42_spill] sm:$0xff] }
 0x105   : > { %5325 = vmatmul.mubr.msk.bf16.gmra.mrb[12].mxu1 %vm8799_vm12, %v7183_v49  ;;  %v3497_v49 = vsel %vm8810_vm0, %v8808_v54, 0  ;;  %v3611_v36 = vsel %vm8812_vm10, %v3609_v59, %v3610_v47  ;;  %vm8813_vm12 = vmmov %vm8805_vm11  ;;  %vm8822_vm2 = vnez %v8821_v55  ;;  %vm8824_vm10 = vcmp.ne.s16.totalorder %v8823_v14, 0  ;;  %v8850_v54 = vld [vmem:[#allocation37_spill] sm:$0xff] }
 0x106   : > { %5328 = vmatprep.mubr.msk.bf16.mxu1 %vm8805_vm11, %v7187_v57  ;;  %v4924_v2 = vcombine.low %v3496_v53, %v3497_v49  ;;  %vm8817_vm11 = vnez %v8816_v26  ;;  %vm8820_vm0 = vmmov %vm8814_vm3  ;;  %v3500_v59 = vsel %vm8822_vm2, %v7032_v17, 0  ;;  %v3502_v17 = vsel %vm8671_vm4, %v7044_v25, 0  ;;  %v8849_v53 = vld [vmem:[#allocation32_spill] sm:$0xff] }
 0x107   : > { %v3498_v45 = vsel %vm8817_vm11, %v6983_v1, 0  ;;  %vm8828_vm11 = vmmov %vm8820_vm0 }
 0x108   : > { %v3614_v57 = vrot.slane %v4924_v2, 1  ;;  %v4925_v12 = vcombine.low %v3498_v45, %v3499_v27  ;;  %vm8829_vm9 = vmmov %vm8820_vm0  ;;  %v8870_v27 = vld [vmem:[#allocation45_spill] sm:$0xff] }
 0x10a   : > { %v3616_v42 = vrot.slane %v4925_v12, 1 }
 0x10b   : > { %5477 = vmatmul.mubr.msk.bf16.gmra.mrb[28].mxu0 %vm8813_vm12, %v3284_v10  ;;  %vm8825_vm12 = vcmask 1046528   ;;  %v3514_v10 = vsel %vm8704_vm6, %v7357_v63, 0 }
 0x10c   : > { %5482 = vmatprep.mubr.msk.bf16.mxu0 %vm8814_vm3, %v3611_v36  ;;  %v3613_v32 = vsel %vm8825_vm12, %v3610_v47, %v3612_v50  ;;  %vm8826_vm3 = vmmov %vm8825_vm12  ;;  %v3504_v47 = vsel %vm8673_vm14, %v7083_v35, 0  ;;  %vm8837_vm14 = vcmp.ne.s16.totalorder %v8682_v6, 0 }
 0x10d   : > { %5329 = vmatmul.mubr.msk.bf16.gmra.mrb[16].mxu1 %vm8815_vm8, %v7206_v16  ;;  %v3501_v16 = vsel %vm8824_vm10, %v7171_v62, 0  ;;  %v3615_v1 = vsel %vm8826_vm3, %v3612_v50, %v3614_v57  ;;  %vm8827_vm8 = vmmov %vm8820_vm0  ;;  %vm8832_vm10 = vcmp.ne.s16.totalorder %v6526_v37, 0  ;;  %v3506_v37 = vsel %vm8681_vm5, %v7090_v58, 0 }
 0x10e   : > { %5332 = vmatprep.mubr.msk.bf16.mxu1 %vm8820_vm0, %v7223_v13  ;;  %v4926_v44 = vcombine.low %v3500_v59, %v3501_v16  ;;  %vm8830_vm0 = vcmp.ne.s16.totalorder %v6505_v4, 0  ;;  %vm8831_vm2 = vmmov %vm8827_vm8  ;;  %v3507_v35 = vsel %vm8837_vm14, %v7279_v28, 0  ;;  %v8847_v28 = vld [vmem:[#allocation60_spill] sm:$0xff]  ;;  %v3516_v50 = vsel %vm8707_vm1, %v7374_v40, 0  ;;  %v8869_v40 = vld [vmem:[#allocation49_spill] sm:$0xff] }
 0x10f   : > { %v3503_v62 = vsel %vm8830_vm0, %v7217_v52, 0  ;;  %vm8833_vm12 = vmmov %vm8826_vm3  ;;  %v3508_v52 = vsel %vm8684_vm7, %v7118_v9, 0  ;;  %vm8839_vm0 = vcmp.ne.s16.totalorder %v6609_v5, 0  ;;  %v3510_v5 = vsel %vm8691_vm13, %v7236_v31, 0  ;;  %v8873_v59 = vld [vmem:[#allocation46_spill] sm:$0xff]  ;;  %v8875_v16 = vld [vmem:[#allocation28_spill] sm:$0xff] }
 0x110   : > { %v3618_v13 = vrot.slane %v4926_v44, 1  ;;  %v3617_v24 = vsel %vm8833_vm12, %v3614_v57, %v3616_v42  ;;  %v4927_v18 = vcombine.low %v3502_v17, %v3503_v62  ;;  %vm8834_vm4 = vmmov %vm8831_vm2  ;;  %vm8845_vm7 = vcmp.ne.s16.totalorder %v8692_v61, 0  ;;  %v8862_v57 = vld [vmem:[#allocation43_spill] sm:$0xff]  ;;  %v8882_v17 = vld [vmem:[#allocation30_spill] sm:$0xff] }
 0x111   : > { %vm8842_vm5 = vmmov %vm8834_vm4  ;;  %v3511_v9 = vsel %vm8845_vm7, %v7320_v23, 0  ;;  %vm8871_vm1 = vnez %v8870_v27 }
 0x112   : > { %v3619_v21 = vsel %vm8826_vm3, %v3616_v42, %v3618_v13  ;;  %v3620_v4 = vrot.slane %v4927_v18, 1  ;;  %vm8843_vm12 = vmmov %vm8834_vm4  ;;  %v4931_v49 = vcombine.low %v3510_v5, %v3511_v9  ;;  %v3518_v55 = vsel %vm8871_vm1, %v8869_v40, 0 }
 0x113   : > { %5483 = vmatmul.mubr.msk.bf16.vlgmr.msra.gmra.mrb[0].mxu0 %vm8827_vm8, %v3613_v32  ;;  %vm8835_vm8 = vmmov %vm8831_vm2  ;;  %v8877_v32 = vld [vmem:[#allocation50_spill] sm:$0xff]  ;;  %vm3930_vm1 = vcmask 523264  }
 0x114   : > { %5486 = vmatprep.mubr.msk.bf16.mxu0 %vm8828_vm11, %v3615_v1  ;;  %vm8836_vm11 = vmmov %vm8831_vm2  ;;  %v3628_v61 = vrot.slane %v4931_v49, 1  ;;  %v4809_v12 = vcombine.low %v8877_v32, %v8877_v32 }
 0x115   : > { %5333 = vmatmul.mubr.msk.bf16.gmra.mrb[20].mxu1 %vm8829_vm9, %v7242_v19  ;;  %v3505_v19 = vsel %vm8832_vm10, %v7230_v41, 0  ;;  %vm8838_vm9 = vmmov %vm8831_vm2  ;;  %v3509_v41 = vsel %vm8839_vm0, %v7291_v15, 0  ;;  %v3512_v15 = vsel %vm8695_vm15, %v8847_v28, 0  ;;  %vm8859_vm15 = vcmp.ne.s16.totalorder %v8858_v46, 0 }
 0x116   : > { %5336 = vmatprep.mubr.msk.bf16.mxu1 %vm8831_vm2, %v7254_v60  ;;  %v4928_v25 = vcombine.low %v3504_v47, %v3505_v19  ;;  %vm8840_vm2 = vmmov %vm8826_vm3  ;;  %v4930_v58 = vcombine.low %v3508_v52, %v3509_v41  ;;  %v3515_v36 = vsel %vm8859_vm15, %v7363_v39, 0  ;;  %v2293_v42 = vshll.u32 %v4809_v12, 16  ;;  %v8885_v19 = vld [vmem:[#allocation36_spill] sm:$0xff] }
 0x117   : > { %v3621_v60 = vsel %vm8840_vm2, %v3618_v13, %v3620_v4  ;;  %vm8841_vm10 = vmmov %vm8840_vm2  ;;  %v4933_v45 = vcombine.low %v3514_v10, %v3515_v36 }
 0x118   : > { %v3622_v30 = vrot.slane %v4928_v25, 1  ;;  %vm8844_vm3 = vmmov %vm8834_vm4  ;;  %v3626_v29 = vrot.slane %v4930_v58, 1  ;;  %v2295_v62 = vrot.slane %v2293_v42, 1  ;;  %v8892_v25 = vld [vmem:[#allocation48_spill] sm:$0xff] }
 0x119   : > { %vm8853_vm14 = vmmov %vm8840_vm2  ;;  %v3632_v39 = vrot.slane %v4933_v45, 1 }
 0x11a   : > { %v3623_v38 = vsel %vm8841_vm10, %v3620_v4, %v3622_v30  ;;  %vm8854_vm13 = vmmov %vm8844_vm3  ;;  %vm8863_vm10 = vcmp.ne.s16.totalorder %v8862_v57, 0 }
 0x11b   : > { %5487 = vmatmul.mubr.msk.bf16.gmra.mrb[4].mxu0 %vm8834_vm4, %v3617_v24  ;;  %vm8846_vm4 = vmmov %vm8844_vm3  ;;  %v8886_v24 = vrot.slane %v8885_v19, 1 }
 0x11c   : > { %5490 = vmatprep.mubr.msk.bf16.mxu0 %vm8835_vm8, %v3619_v21  ;;  %vm8851_vm8 = vcmp.ne.s16.totalorder %v8850_v54, 0  ;;  %vm8856_vm0 = vmmov %vm8844_vm3 }
 0x11d   : > { %5337 = vmatmul.mubr.msk.bf16.gmra.mrb[24].mxu1 %vm8836_vm11, %v7268_v3  ;;  %v4929_v3 = vcombine.low %v3506_v37, %v3507_v35  ;;  %vm8852_vm11 = vmmov %vm8840_vm2 }
 0x11e   : > { %5340 = vmatprep.mubr.msk.bf16.mxu1 %vm8838_vm9, %v7285_v8  ;;  %vm8855_vm9 = vmmov %vm8844_vm3  ;;  %v7647_v8 = vld [vmem:[%s8309_s2] ss:$0 sm:$0xff] }
 0x11f   : > { %v3624_v6 = vrot.slane %v4929_v3, 1  ;;  %vm8860_vm2 = vmmov %vm8856_vm0 }
 0x120   : > { %vm8866_vm6 = vmmov %vm8856_vm0 }
 0x121   : > { %v3625_v0 = vsel %vm8852_vm11, %v3622_v30, %v3624_v6  ;;  %v3627_v22 = vsel %vm8853_vm14, %v3624_v6, %v3626_v29  ;;  %vm8868_vm7 = vmmov %vm8856_vm0 }
 0x122   : > { %vm8883_vm15 = vmmov %vm8856_vm0 }
 0x123   : > { %5491 = vmatmul.mubr.msk.bf16.gmra.mrb[8].mxu0 %vm8842_vm5, %v3621_v60  ;;  %vm8864_vm5 = vmmov %vm8852_vm11 }
 0x124   : > { %5494 = vmatprep.mubr.msk.bf16.mxu0 %vm8843_vm12, %v3623_v38  ;;  %v3629_v26 = vsel %vm8864_vm5, %v3626_v29, %v3628_v61  ;;  %vm8865_vm12 = vmmov %vm8864_vm5 }
 0x125   : > { %5341 = vmatmul.mubr.msk.bf16.gmra.mrb[28].mxu1 %vm8844_vm3, %v7302_v11  ;;  %v3513_v11 = vsel %vm8851_vm8, %v8849_v53, 0  ;;  %vm8867_vm3 = vmmov %vm8856_vm0 }
 0x126   : > { %5362 = vmatprep.mubr.msk.bf16.mxu1 %vm8846_vm4, %v8761_v43  ;;  %v4932_v31 = vcombine.low %v3512_v15, %v3513_v11  ;;  %vm8874_vm4 = vcmp.ne.s16.totalorder %v8873_v59, 0  ;;  %vm8876_vm8 = vmmov %vm8856_vm0 }
 0x127   : > { %vm8878_vm11 = vmmov %vm8864_vm5 }
 0x128   : > { %v3630_v23 = vrot.slane %v4932_v31, 1  ;;  %vm8879_vm14 = vmmov %vm8864_vm5 }
 0x12a   : > { %v3631_v63 = vsel %vm8865_vm12, %v3628_v61, %v3630_v23  ;;  %v3633_v1 = vsel %vm8878_vm11, %v3630_v23, %v3632_v39  ;;  %vm8889_vm12 = vmmov %vm8856_vm0 }
 0x12b   : > { %5495 = vmatmul.mubr.msk.bf16.gmra.mrb[12].mxu0 %vm8854_vm13, %v3625_v0  ;;  %vm8880_vm13 = vmmov %vm8856_vm0 }
 0x12c   : > { %5498 = vmatprep.mubr.msk.bf16.mxu0 %vm8855_vm9, %v3627_v22  ;;  %vm8881_vm9 = vmmov %vm8856_vm0 }
 0x12d   : > { %5363 = vmatmul.mubr.msk.bf16.vlgmr.msra.gmra.mrb[16].mxu1 %vm8856_vm0, %v8763_v20  ;;  %v3517_v20 = vsel %vm8863_vm10, %v7380_v7, 0  ;;  %v8872_v7 = vld [vmem:[#allocation47_spill] sm:$0xff] }
 0x12e   : > { %5366 = vmatprep.mubr.msk.bf16.mxu1 %vm8860_vm2, %v8772_v48  ;;  %v4934_v56 = vcombine.low %v3516_v50, %v3517_v20  ;;  %v3519_v14 = vsel %vm8874_vm4, %v8872_v7, 0  ;;  %vm8884_vm2 = vmmov %vm8864_vm5  ;;  %vm8888_vm5 = vsmask.f32 7424 }
 0x12f   : > { %v4935_v44 = vcombine.low %v3518_v55, %v3519_v14  ;;  %vm8887_vm10 = vmmov %vm8884_vm2  ;;  %v2296_v21 = vsel %vm8888_vm5, %v7454_v34, %v2295_v62 }
 0x130   : > { %v3634_v48 = vrot.slane %v4934_v56, 1 }
 0x131   : > { %v3636_v13 = vrot.slane %v4935_v44, 1 }
 0x133   : > { %5499 = vmatmul.mubr.msk.bf16.gmra.mrb[16].mxu0 %vm8866_vm6, %v3629_v26  ;;  %v3637_v47 = vsel %vm8884_vm2, %v3634_v48, %v3636_v13  ;;  %v3639_v18 = vsel %vm8887_vm10, %v3636_v13, %v8886_v24  ;;  %vm8890_vm6 = vmmov %vm8856_vm0 }
 0x134   : > { %5502 = vmatprep.mubr.msk.bf16.mxu0 %vm8867_vm3, %v3631_v63  ;;  %vm8891_vm3 = vmmov %vm8856_vm0 }
 0x135   : > { %5367 = vmatmul.mubr.msk.bf16.gmra.mrb[20].mxu1 %vm8868_vm7, %v8775_v51  ;;  %v3635_v51 = vsel %vm8879_vm14, %v3632_v39, %v3634_v48  ;;  %vm8893_vm7 = vmmov %vm8856_vm0 }
 0x136   : > { %5370 = vmatprep.mubr.msk.bf16.mxu1 %vm8876_vm8, %v8875_v16 }
 0x13b   : > { %5503 = vmatmul.mubr.msk.bf16.gmra.mrb[20].mxu0 %vm8880_vm13, %v3633_v1  ;;  %vm4570_vm13 = vcmask 519168  }
 0x13c   : > { %5506 = vmatprep.mubr.msk.bf16.mxu0 %vm8881_vm9, %v3635_v51 }
 0x13d   : > { %5371 = vmatmul.mubr.msk.bf16.gmra.mrb[24].mxu1 %vm8856_vm0, %v8882_v17 }
 0x13e   : > { %5374 = vmatprep.mubr.msk.bf16.mxu1 %vm8883_vm15, %v7472_v33 }
 0x143   : > { %5507 = vmatmul.mubr.msk.bf16.gmra.mrb[24].mxu0 %vm8889_vm12, %v3637_v47 }
 0x144   : > { %5510 = vmatprep.mubr.msk.bf16.mxu0 %vm8890_vm6, %v3639_v18 }
 0x145   : > { %5375 = vmatmul.mubr.msk.bf16.gmra.mrb[28].mxu1 %vm8891_vm3, %v2296_v21 }
 0x14b   : > { %5511 = vmatmul.mubr.msk.bf16.gmra.mrb[28].mxu0 %vm8893_vm7, %v8892_v25 }
 0x1c0   : > { %v5314_v33 = vpop.f32.mrb[0].mxu1 }
 0x1c1   : > { %v2116_v4 = vpop.f32.mrb[1].mxu1 }
 0x1c2   : > { %v5315_v30 = vpop.f32.mrb[2].mxu1 }
 0x1c3   : > { %v2119_v37 = vpop.f32.mrb[3].mxu1 }
 0x1c8   : > { %v5318_v35 = vpop.f32.mrb[4].mxu1 }
 0x1c9   : > { %v2132_v52 = vpop.f32.mrb[5].mxu1 }
 0x1ca   : > { %v5319_v41 = vpop.f32.mrb[6].mxu1 }
 0x1cb   : > { %v2135_v60 = vpop.f32.mrb[7].mxu1 }
 0x1d0   : > { %v5322_v3 = vpop.f32.mrb[8].mxu1 }
 0x1d1   : > { %v7630_v38 = vpop.f32.mrb[9].mxu1 }
 0x1d2   : > { %v7632_v34 = vpop.f32.mrb[10].mxu1 }
 0x1d3   : > { %v7634_v58 = vpop.f32.mrb[11].mxu1 }
 0x1d8   : > { %v7636_v6 = vpop.f32.mrb[12].mxu1 }
 0x1d9   : > { %v7638_v29 = vpop.f32.mrb[13].mxu1 }
 0x1da   : > { %v7640_v5 = vpop.f32.mrb[14].mxu1 }
 0x1db   : > { %v7642_v9 = vpop.f32.mrb[15].mxu1 }
 0x1e6   : > { %v5484_v28 = vpop.f32.mrb[0].mxu0 }
 0x1e7   : > { %v5516_v15 = vadd.f32 %v5484_v28, %v5314_v33  ;;  %v3730_v53 = vpop.f32.mrb[1].mxu0 }
 0x1e8   : > { %v5517_v54 = vadd.f32 %v3730_v53, %v2116_v4  ;;  %v5485_v11 = vpop.f32.mrb[2].mxu0 }
 0x1e9   : > { %v7650_v0 = vadd.f32 %v5516_v15, %v7647_v8  ;;  %v5518_v49 = vadd.f32 %v5485_v11, %v5315_v30  ;;  %v3733_v22 = vpop.f32.mrb[3].mxu0 }
 0x1ea   : > { %v7653_v31 = vadd.f32 %v5517_v54, %v7647_v8  ;;  %v5519_v61 = vadd.f32 %v3733_v22, %v2119_v37 }
 0x1eb   : > { %v7658_v43 = vadd.f32 %v5518_v49, %v7647_v8  ;;  %v4002_v46 = vmul.f32 %v7650_v0, %v7650_v0  ;;  %v3934_v20 = vsel %vm3930_vm1, %v7650_v0, 0.0 }
 0x1ec   : > { %v4000_v23 = vmul.f32 %v7653_v31, %v7653_v31  ;;  %v7661_v10 = vadd.f32 %v5519_v61, %v7647_v8  ;;  %v3931_v36 = vsel %vm3930_vm1, %v7653_v31, 0.0 }
 0x1ed   : > { %v4003_v39 = vmul.f32 %v7658_v43, %v7658_v43  ;;  %v4035_v55 = vsel %vm3930_vm1, %v4002_v46, 0.0  ;;  %v3936_v32 = vsel %vm3930_vm1, %v7658_v43, 0.0 }
 0x1ee   : > { %v3932_v2 = vsel %vm3930_vm1, %v7661_v10, 0.0  ;;  %v4001_v50 = vmul.f32 %v7661_v10, %v7661_v10  ;;  %v5488_v57 = vpop.f32.mrb[4].mxu0  ;;  %v4032_v56 = vsel %vm3930_vm1, %v4000_v23, 0.0 }
 0x1ef   : > { %v3933_v26 = vadd.f32 %v3932_v2, %v3931_v36  ;;  %v5520_v45 = vadd.f32 %v5488_v57, %v5318_v35  ;;  %v3746_v63 = vpop.f32.mrb[5].mxu0  ;;  %v4037_v13 = vsel %vm3930_vm1, %v4003_v39, 0.0 }
 0x1f0   : > { %v4033_v48 = vsel %vm3930_vm1, %v4001_v50, 0.0  ;;  %v5521_v40 = vadd.f32 %v3746_v63, %v2132_v52  ;;  %v5489_v27 = vpop.f32.mrb[6].mxu0 }
 0x1f1   : > { %v3935_v7 = vadd.f32 %v3934_v20, %v3933_v26  ;;  %v4034_v59 = vadd.f32 %v4033_v48, %v4032_v56  ;;  %v5522_v14 = vadd.f32 %v5489_v27, %v5319_v41  ;;  %v3749_v16 = vpop.f32.mrb[7].mxu0  ;;  %v7681_v12 = vadd.f32 %v5520_v45, %v7647_v8 }
 0x1f2   : > { %v7684_v1 = vadd.f32 %v5521_v40, %v7647_v8  ;;  %v5523_v44 = vadd.f32 %v3749_v16, %v2135_v60 }
 0x1f3   : > { %v4036_v51 = vadd.f32 %v4035_v55, %v4034_v59  ;;  %v3937_v42 = vadd.f32 %v3936_v32, %v3935_v7  ;;  %v7695_v18 = vadd.f32 %v5522_v14, %v7647_v8  ;;  %v4006_v21 = vmul.f32 %v7681_v12, %v7681_v12 }
 0x1f4   : > { %v3938_v17 = vsel %vm3930_vm1, %v7684_v1, 0.0  ;;  %v4004_v62 = vmul.f32 %v7684_v1, %v7684_v1  ;;  %v7692_v47 = vadd.f32 %v5523_v44, %v7647_v8  ;;  %v3942_v60 = vsel %vm3930_vm1, %v7681_v12, 0.0 }
 0x1f5   : > { %v3939_v19 = vadd.f32 %v3938_v17, %v3937_v42  ;;  %v4038_v24 = vadd.f32 %v4037_v13, %v4036_v51  ;;  %v4007_v53 = vmul.f32 %v7695_v18, %v7695_v18  ;;  %v3944_v61 = vsel %vm3930_vm1, %v7695_v18, 0.0 }
 0x1f6   : > { %v4039_v25 = vsel %vm3930_vm1, %v4004_v62, 0.0  ;;  %v3940_v33 = vsel %vm3930_vm1, %v7692_v47, 0.0  ;;  %v5492_v4 = vpop.f32.mrb[8].mxu0  ;;  %v4005_v35 = vmul.f32 %v7692_v47, %v7692_v47 }
 0x1f7   : > { %v4040_v30 = vadd.f32 %v4039_v25, %v4038_v24  ;;  %v3941_v37 = vadd.f32 %v3940_v33, %v3939_v19  ;;  %v5524_v52 = vadd.f32 %v5492_v4, %v5322_v3  ;;  %v3762_v41 = vpop.f32.mrb[9].mxu0  ;;  %v4045_v26 = vsel %vm3930_vm1, %v4007_v53, 0.0 }
 0x1f8   : > { %v5525_v28 = vadd.f32 %v3762_v41, %v7630_v38  ;;  %v5493_v15 = vpop.f32.mrb[10].mxu0  ;;  %v4041_v11 = vsel %vm3930_vm1, %v4005_v35, 0.0  ;;  %v4043_v38 = vsel %vm3930_vm1, %v4006_v21, 0.0 }
 0x1f9   : > { %v3943_v54 = vadd.f32 %v3942_v60, %v3941_v37  ;;  %v5526_v49 = vadd.f32 %v5493_v15, %v7632_v34  ;;  %v3765_v22 = vpop.f32.mrb[11].mxu0  ;;  %v4042_v3 = vadd.f32 %v4041_v11, %v4040_v30  ;;  %v7719_v36 = vadd.f32 %v5524_v52, %v7647_v8 }
 0x1fa   : > { %v7714_v23 = vadd.f32 %v5525_v28, %v7647_v8  ;;  %v5527_v46 = vadd.f32 %v3765_v22, %v7634_v58 }
 0x1fb   : > { %v3945_v2 = vadd.f32 %v3944_v61, %v3943_v54  ;;  %v4044_v50 = vadd.f32 %v4043_v38, %v4042_v3  ;;  %v7730_v58 = vadd.f32 %v5526_v49, %v7647_v8  ;;  %v4010_v27 = vmul.f32 %v7719_v36, %v7719_v36 }
 0x1fc   : > { %v3946_v34 = vsel %vm3930_vm1, %v7714_v23, 0.0  ;;  %v4008_v57 = vmul.f32 %v7714_v23, %v7714_v23  ;;  %v7726_v20 = vadd.f32 %v5527_v46, %v7647_v8  ;;  %v3950_v14 = vsel %vm3930_vm1, %v7719_v36, 0.0 }
 0x1fd   : > { %v3947_v45 = vadd.f32 %v3946_v34, %v3945_v2  ;;  %v4046_v63 = vadd.f32 %v4045_v26, %v4044_v50  ;;  %v4011_v13 = vmul.f32 %v7730_v58, %v7730_v58  ;;  %v4051_v4 = vsel %vm3930_vm1, %v4010_v27, 0.0 }
 0x1fe   : > { %v4047_v56 = vsel %vm3930_vm1, %v4008_v57, 0.0  ;;  %v3948_v39 = vsel %vm3930_vm1, %v7726_v20, 0.0  ;;  %v4009_v48 = vmul.f32 %v7726_v20, %v7726_v20  ;;  %v5496_v40 = vpop.f32.mrb[12].mxu0 }
 0x1ff   : > { %v3949_v55 = vadd.f32 %v3948_v39, %v3947_v45  ;;  %v5528_v7 = vadd.f32 %v5496_v40, %v7636_v6  ;;  %v3778_v59 = vpop.f32.mrb[13].mxu0  ;;  %v4048_v16 = vadd.f32 %v4047_v56, %v4046_v63  ;;  %v3952_v6 = vsel %vm3930_vm1, %v7730_v58, 0.0 }
 0x200   : > { %v4049_v32 = vsel %vm3930_vm1, %v4009_v48, 0.0  ;;  %v5529_v44 = vadd.f32 %v3778_v59, %v7638_v29  ;;  %v5497_v51 = vpop.f32.mrb[14].mxu0  ;;  %v5364_v42 = vpop.f32.mrb[16].mxu1 }
 0x201   : > { %v3951_v17 = vadd.f32 %v3950_v14, %v3949_v55  ;;  %v5530_v62 = vadd.f32 %v5497_v51, %v7640_v5  ;;  %v3781_v19 = vpop.f32.mrb[15].mxu0  ;;  %v2407_v24 = vpop.f32.mrb[17].mxu1  ;;  %v4050_v21 = vadd.f32 %v4049_v32, %v4048_v16  ;;  %v7755_v30 = vadd.f32 %v5528_v7, %v7647_v8 }
 0x202   : > { %v7750_v25 = vadd.f32 %v5529_v44, %v7647_v8  ;;  %v5531_v33 = vadd.f32 %v3781_v19, %v7642_v9  ;;  %v5365_v29 = vpop.f32.mrb[18].mxu1  ;;  %v4053_v9 = vsel %vm3930_vm1, %v4011_v13, 0.0 }
 0x203   : > { %v3953_v37 = vadd.f32 %v3952_v6, %v3951_v17  ;;  %v2410_v35 = vpop.f32.mrb[19].mxu1  ;;  %v4052_v5 = vadd.f32 %v4051_v4, %v4050_v21  ;;  %v7766_v15 = vadd.f32 %v5530_v62, %v7647_v8  ;;  %v4014_v61 = vmul.f32 %v7755_v30, %v7755_v30 }
 0x204   : > { %v3954_v52 = vsel %vm3930_vm1, %v7750_v25, 0.0  ;;  %v4012_v41 = vmul.f32 %v7750_v25, %v7750_v25  ;;  %v7762_v60 = vadd.f32 %v5531_v33, %v7647_v8  ;;  %v3958_v2 = vsel %vm3930_vm1, %v7755_v30, 0.0 }
 0x205   : > { %v3955_v28 = vadd.f32 %v3954_v52, %v3953_v37  ;;  %v4054_v53 = vadd.f32 %v4053_v9, %v4052_v5  ;;  %v4015_v63 = vmul.f32 %v7766_v15, %v7766_v15  ;;  %v3960_v27 = vsel %vm3930_vm1, %v7766_v15, 0.0 }
 0x206   : > { %v4055_v54 = vsel %vm3930_vm1, %v4012_v41, 0.0  ;;  %v3956_v11 = vsel %vm3930_vm1, %v7762_v60, 0.0  ;;  %v4013_v49 = vmul.f32 %v7762_v60, %v7762_v60  ;;  %v5500_v22 = vpop.f32.mrb[16].mxu0  ;;  %v4059_v16 = vsel %vm3930_vm1, %v4014_v61, 0.0 }
 0x207   : > { %v3957_v3 = vadd.f32 %v3956_v11, %v3955_v28  ;;  %v5532_v46 = vadd.f32 %v5500_v22, %v5364_v42  ;;  %v3794_v38 = vpop.f32.mrb[17].mxu0  ;;  %v4056_v50 = vadd.f32 %v4055_v54, %v4054_v53  ;;  %v4061_v19 = vsel %vm3930_vm1, %v4015_v63, 0.0 }
 0x208   : > { %v4057_v34 = vsel %vm3930_vm1, %v4013_v49, 0.0  ;;  %v5533_v57 = vadd.f32 %v3794_v38, %v2407_v24  ;;  %v5501_v26 = vpop.f32.mrb[18].mxu0  ;;  %v5368_v45 = vpop.f32.mrb[20].mxu1 }
 0x209   : > { %v3959_v56 = vadd.f32 %v3958_v2, %v3957_v3  ;;  %v5534_v39 = vadd.f32 %v5501_v26, %v5365_v29  ;;  %v3797_v48 = vpop.f32.mrb[19].mxu0  ;;  %v2423_v40 = vpop.f32.mrb[21].mxu1  ;;  %v4058_v55 = vadd.f32 %v4057_v34, %v4056_v50  ;;  %v7787_v32 = vadd.f32 %v5532_v46, %v7647_v8 }
 0x20a   : > { %v7783_v7 = vadd.f32 %v5533_v57, %v7647_v8  ;;  %v5535_v59 = vadd.f32 %v3797_v48, %v2410_v35  ;;  %v5369_v14 = vpop.f32.mrb[22].mxu1 }
 0x20b   : > { %v3961_v44 = vadd.f32 %v3960_v27, %v3959_v56  ;;  %v2426_v51 = vpop.f32.mrb[23].mxu1  ;;  %v4060_v42 = vadd.f32 %v4059_v16, %v4058_v55  ;;  %v7798_v6 = vadd.f32 %v5534_v39, %v7647_v8  ;;  %v4018_v35 = vmul.f32 %v7787_v32, %v7787_v32 }
 0x20c   : > { %v3962_v13 = vsel %vm3930_vm1, %v7783_v7, 0.0  ;;  %v4016_v17 = vmul.f32 %v7783_v7, %v7783_v7  ;;  %v7794_v62 = vadd.f32 %v5535_v59, %v7647_v8  ;;  %v3966_v9 = vsel %vm3930_vm1, %v7787_v32, 0.0 }
 0x20d   : > { %v3963_v24 = vadd.f32 %v3962_v13, %v3961_v44  ;;  %v4062_v21 = vadd.f32 %v4061_v19, %v4060_v42  ;;  %v4019_v22 = vmul.f32 %v7798_v6, %v7798_v6  ;;  %v3968_v2 = vsel %vm3930_vm1, %v7798_v6, 0.0 }
 0x20e   : > { %v4063_v33 = vsel %vm3930_vm1, %v4016_v17, 0.0  ;;  %v3964_v29 = vsel %vm3930_vm1, %v7794_v62, 0.0  ;;  %v4017_v4 = vmul.f32 %v7794_v62, %v7794_v62  ;;  %v5504_v37 = vpop.f32.mrb[20].mxu0 }
 0x20f   : > { %v3965_v5 = vadd.f32 %v3964_v29, %v3963_v24  ;;  %v5536_v52 = vadd.f32 %v5504_v37, %v5368_v45  ;;  %v3810_v41 = vpop.f32.mrb[21].mxu0  ;;  %v4064_v28 = vadd.f32 %v4063_v33, %v4062_v21  ;;  %v4067_v45 = vsel %vm3930_vm1, %v4018_v35, 0.0 }
 0x210   : > { %v4065_v53 = vsel %vm3930_vm1, %v4017_v4, 0.0  ;;  %v5537_v54 = vadd.f32 %v3810_v41, %v2423_v40  ;;  %v5505_v11 = vpop.f32.mrb[22].mxu0  ;;  %v5372_v49 = vpop.f32.mrb[24].mxu1  ;;  %v4069_v59 = vsel %vm3930_vm1, %v4019_v22, 0.0 }
 0x211   : > { %v3967_v61 = vadd.f32 %v3966_v9, %v3965_v5  ;;  %v5538_v3 = vadd.f32 %v5505_v11, %v5369_v14  ;;  %v3813_v46 = vpop.f32.mrb[23].mxu0  ;;  %v2439_v38 = vpop.f32.mrb[25].mxu1  ;;  %v4066_v50 = vadd.f32 %v4065_v53, %v4064_v28  ;;  %v7819_v63 = vadd.f32 %v5536_v52, %v7647_v8 }
 0x212   : > { %v7815_v34 = vadd.f32 %v5537_v54, %v7647_v8  ;;  %v5539_v57 = vadd.f32 %v3813_v46, %v2426_v51  ;;  %v5373_v26 = vpop.f32.mrb[26].mxu1 }
 0x213   : > { %v3969_v56 = vadd.f32 %v3968_v2, %v3967_v61  ;;  %v2442_v39 = vpop.f32.mrb[27].mxu1  ;;  %v4068_v48 = vadd.f32 %v4067_v45, %v4066_v50  ;;  %v7830_v16 = vadd.f32 %v5538_v3, %v7647_v8  ;;  %v4022_v19 = vmul.f32 %v7819_v63, %v7819_v63 }
 0x214   : > { %v3970_v40 = vsel %vm3930_vm1, %v7815_v34, 0.0  ;;  %v4020_v27 = vmul.f32 %v7815_v34, %v7815_v34  ;;  %v7826_v55 = vadd.f32 %v5539_v57, %v7647_v8  ;;  %v3974_v29 = vsel %vm3930_vm1, %v7819_v63, 0.0 }
 0x215   : > { %v3971_v14 = vadd.f32 %v3970_v40, %v3969_v56  ;;  %v4070_v44 = vadd.f32 %v4069_v59, %v4068_v48  ;;  %v4023_v41 = vmul.f32 %v7830_v16, %v7830_v16  ;;  %v3976_v11 = vsel %vm3930_vm1, %v7830_v16, 0.0 }
 0x216   : > { %v4071_v51 = vsel %vm3930_vm1, %v4020_v27, 0.0  ;;  %v3972_v42 = vsel %vm3930_vm1, %v7826_v55, 0.0  ;;  %v4021_v13 = vmul.f32 %v7826_v55, %v7826_v55  ;;  %v5508_v17 = vpop.f32.mrb[24].mxu0  ;;  %v4075_v46 = vsel %vm3930_vm1, %v4022_v19, 0.0 }
 0x217   : > { %v3973_v24 = vadd.f32 %v3972_v42, %v3971_v14  ;;  %v5540_v21 = vadd.f32 %v5508_v17, %v5372_v49  ;;  %v3826_v33 = vpop.f32.mrb[25].mxu0  ;;  %v4072_v4 = vadd.f32 %v4071_v51, %v4070_v44 }
 0x218   : > { %v4073_v37 = vsel %vm3930_vm1, %v4021_v13, 0.0  ;;  %v5541_v35 = vadd.f32 %v3826_v33, %v2439_v38  ;;  %v5509_v5 = vpop.f32.mrb[26].mxu0  ;;  %v5376_v52 = vpop.f32.mrb[28].mxu1 }
 0x219   : > { %v3975_v9 = vadd.f32 %v3974_v29, %v3973_v24  ;;  %v5542_v28 = vadd.f32 %v5509_v5, %v5373_v26  ;;  %v3829_v53 = vpop.f32.mrb[27].mxu0  ;;  %v2455_v54 = vpop.f32.mrb[29].mxu1  ;;  %v4074_v49 = vadd.f32 %v4073_v37, %v4072_v4  ;;  %v7851_v38 = vadd.f32 %v5540_v21, %v7647_v8 }
 0x21a   : > { %v7847_v22 = vadd.f32 %v5541_v35, %v7647_v8  ;;  %v5543_v61 = vadd.f32 %v3829_v53, %v2442_v39  ;;  %v5377_v3 = vpop.f32.mrb[30].mxu1  ;;  %v4077_v39 = vsel %vm3930_vm1, %v4023_v41, 0.0 }
 0x21b   : > { %v3977_v2 = vadd.f32 %v3976_v11, %v3975_v9  ;;  %v2458_v50 = vpop.f32.mrb[31].mxu1  ;;  %v4076_v57 = vadd.f32 %v4075_v46, %v4074_v49  ;;  %v7862_v40 = vadd.f32 %v5542_v28, %v7647_v8  ;;  %v4026_v42 = vmul.f32 %v7851_v38, %v7851_v38 }
 0x21c   : > { %v3978_v26 = vsel %vm3930_vm1, %v7847_v22, 0.0  ;;  %v4024_v45 = vmul.f32 %v7847_v22, %v7847_v22  ;;  %v7858_v56 = vadd.f32 %v5543_v61, %v7647_v8  ;;  %v3982_v24 = vsel %vm3930_vm1, %v7851_v38, 0.0 }
 0x21d   : > { %v3979_v48 = vadd.f32 %v3978_v26, %v3977_v2  ;;  %v4078_v27 = vadd.f32 %v4077_v39, %v4076_v57  ;;  %v4027_v37 = vmul.f32 %v7862_v40, %v7862_v40  ;;  %v3984_v9 = vsel %vm3930_vm1, %v7862_v40, 0.0 }
 0x21e   : > { %v4079_v59 = vsel %vm3930_vm1, %v4024_v45, 0.0  ;;  %v3980_v14 = vsel %vm3930_vm1, %v7858_v56, 0.0  ;;  %v4025_v44 = vmul.f32 %v7858_v56, %v7858_v56  ;;  %v5512_v51 = vpop.f32.mrb[28].mxu0  ;;  %v4083_v11 = vsel %vm3930_vm1, %v4026_v42, 0.0 }
 0x21f   : > { %v3981_v13 = vadd.f32 %v3980_v14, %v3979_v48  ;;  %v5544_v17 = vadd.f32 %v5512_v51, %v5376_v52  ;;  %v3842_v19 = vpop.f32.mrb[29].mxu0  ;;  %v4080_v21 = vadd.f32 %v4079_v59, %v4078_v27  ;;  %v4085_v57 = vsel %vm3930_vm1, %v4027_v37, 0.0 }
 0x220   : > { %v4081_v33 = vsel %vm3930_vm1, %v4025_v44, 0.0  ;;  %v5545_v29 = vadd.f32 %v3842_v19, %v2455_v54  ;;  %v5513_v4 = vpop.f32.mrb[30].mxu0 }
 0x221   : > { %v3983_v35 = vadd.f32 %v3982_v24, %v3981_v13  ;;  %v5546_v5 = vadd.f32 %v5513_v4, %v5377_v3  ;;  %v3845_v41 = vpop.f32.mrb[31].mxu0  ;;  %v4082_v28 = vadd.f32 %v4081_v33, %v4080_v21  ;;  %v7883_v49 = vadd.f32 %v5544_v17, %v7647_v8 }
 0x222   : > { %v7879_v52 = vadd.f32 %v5545_v29, %v7647_v8  ;;  %v5547_v53 = vadd.f32 %v3845_v41, %v2458_v50 }
 0x223   : > { %v3985_v54 = vadd.f32 %v3984_v9, %v3983_v35  ;;  %v4084_v61 = vadd.f32 %v4083_v11, %v4082_v28  ;;  %v7894_v50 = vadd.f32 %v5546_v5, %v7647_v8  ;;  %v4030_v59 = vmul.f32 %v7883_v49, %v7883_v49 }
 0x224   : > { %v3986_v46 = vsel %vm3930_vm1, %v7879_v52, 0.0  ;;  %v4028_v3 = vmul.f32 %v7879_v52, %v7879_v52  ;;  %v7890_v2 = vadd.f32 %v5547_v53, %v7647_v8  ;;  %v3990_v44 = vsel %vm3930_vm1, %v7883_v49, 0.0 }
 0x225   : > { %v3987_v26 = vadd.f32 %v3986_v46, %v3985_v54  ;;  %v4086_v45 = vadd.f32 %v4085_v57, %v4084_v61  ;;  %v4031_v42 = vmul.f32 %v7894_v50, %v7894_v50  ;;  %v3992_v17 = vsel %vm3930_vm1, %v7894_v50, 0.0 }
 0x226   : > { %v4087_v39 = vsel %vm3930_vm1, %v4028_v3, 0.0  ;;  %v3988_v48 = vsel %vm3930_vm1, %v7890_v2, 0.0  ;;  %v4029_v27 = vmul.f32 %v7890_v2, %v7890_v2  ;;  %v4091_v24 = vsel %vm3930_vm1, %v4030_v59, 0.0 }
 0x227   : > { %v3989_v14 = vadd.f32 %v3988_v48, %v3987_v26  ;;  %v4088_v51 = vadd.f32 %v4087_v39, %v4086_v45  ;;  %v4093_v29 = vsel %vm3930_vm1, %v4031_v42, 0.0  ;;  %v8894_v9 = vlaneseq }
 0x228   : > { %v4089_v8 = vsel %vm3930_vm1, %v4029_v27, 0.0 }
 0x229   : > { %v3991_v13 = vadd.f32 %v3990_v44, %v3989_v14  ;;  %v4090_v19 = vadd.f32 %v4089_v8, %v4088_v51  ;;  %v4102_v28 = vand.u32 127, %v8894_v9 }
 0x22b   : > { %v3993_v21 = vadd.f32 %v3992_v17, %v3991_v13  ;;  %v4092_v33 = vadd.f32 %v4091_v24, %v4090_v19  ;;  %vm4122_vm4 = vcmp.ge.s32.totalorder %v4102_v28, 32  ;;  %vm4123_vm8 = vcmp.lt.s32.totalorder %v4102_v28, 64 }
 0x22c   : > { %vm4104_vm11 = vcmp.lt.s32.totalorder %v4102_v28, 32  ;;  %vm7913_vm14 = vmand %vm4122_vm4, %vm4123_vm8 }
 0x22d   : > { %v3994_v4 = vrot.slane %v3993_v21, 4  ;;  %v4094_v37 = vadd.f32 %v4093_v29, %v4092_v33 }
 0x22f   : > { %v3995_v35 = vadd.f32 %v3994_v4, %v3993_v21  ;;  %v4095_v5 = vrot.slane %v4094_v37, 4 }
 0x231   : > { %v3996_v41 = vrot.slane %v3995_v35, 2  ;;  %v4096_v53 = vadd.f32 %v4095_v5, %v4094_v37 }
 0x233   : > { %v3997_v11 = vadd.f32 %v3996_v41, %v3995_v35  ;;  %v4097_v54 = vrot.slane %v4096_v53, 2 }
 0x235   : > { %v3998_v61 = vrot.slane %v3997_v11, 1  ;;  %v4098_v46 = vadd.f32 %v4097_v54, %v4096_v53 }
 0x237   : > { %v3999_v3 = vadd.f32 %v3998_v61, %v3997_v11  ;;  %v4099_v57 = vrot.slane %v4098_v46, 1  ;;  %v3928_v61 = vld [vmem:[%s8310_s3] sm:$0x1] }
 0x239   : > { %v4106_v45 = vsel %vm4104_vm11, %v3999_v3, 0.0  ;;  %v4100_v48 = vadd.f32 %v4099_v57, %v4098_v46  ;;  %v4125_v27 = vsel %vm7913_vm14, %v3999_v3, 0.0 }
 0x23a   : > { %v4107_v39 = vsel %vm3930_vm1, %v4106_v45, 0.0  ;;  %v4126_v44 = vsel %vm3930_vm1, %v4125_v27, 0.0  ;;  %v8897_v27 = vld [vmem:[#allocation2_spill] sm:$0xff] }
 0x23b   : > { %4108 = vadd.xlane.f32.xlu0 %v4107_v39  ;;  %v4111_v59 = vsel %vm4104_vm11, %v4100_v48, 0.0  ;;  %v4130_v51 = vsel %vm7913_vm14, %v4100_v48, 0.0  ;;  %v3929_v48 = vld [vmem:[%s8311_s4] sm:$0x1] }
 0x23c   : > { %v4112_v14 = vsel %vm3930_vm1, %v4111_v59, 0.0  ;;  %v4131_v8 = vsel %vm3930_vm1, %v4130_v51, 0.0  ;;  %v4146_v59 = vsub.s32 0, %v8897_v27 }
 0x23d   : > { %4113 = vadd.xlane.f32.xlu1 %v4112_v14 }
 0x23f   : > { %4127 = vadd.xlane.f32.xlu0 %v4126_v44 }
 0x241   : > { %4132 = vadd.xlane.f32.xlu1 %v4131_v8 }
 0x2c8   : > { %v4109_v42 = vpop.xlane.xlu0 %4108 }
 0x2c9   : > { %v4110_v13 = vmul.f32 0.00012207031, %v4109_v42 }
 0x2ca   : > { %v4114_v19 = vpop.xlane.xlu1 %4113 }
 0x2cb   : > { %v4116_v17 = vmul.f32 %v4110_v13, %v4110_v13  ;;  %v4115_v24 = vmul.f32 0.00012207031, %v4114_v19  ;;  %v4120_v57 = vsel %vm4104_vm11, %v4110_v13, 0.0 }
 0x2cc   : > { %v4128_v21 = vpop.xlane.xlu0 %4127 }
 0x2cd   : > { %v4129_v33 = vmul.f32 0.00012207031, %v4128_v21  ;;  %v4117_v29 = vsub.f32 %v4115_v24, %v4116_v17 }
 0x2ce   : > { %v4133_v37 = vpop.xlane.xlu1 %4132 }
 0x2cf   : > { %v4135_v4 = vmul.f32 %v4129_v33, %v4129_v33  ;;  %v4118_v35 = vadd.f32 1e-05, %v4117_v29  ;;  %v4134_v5 = vmul.f32 0.00012207031, %v4133_v37  ;;  %v4139_v45 = vsel %vm7913_vm14, %v4129_v33, %v4120_v57 }
 0x2d1   : > { %v4136_v41 = vsub.f32 %v4134_v5, %v4135_v4  ;;  %5813 = vrsqrt.f32 %v4118_v35 }
 0x2d3   : > { %v4137_v9 = vadd.f32 1e-05, %v4136_v41 }
 0x2d5   : > { %5815 = vrsqrt.f32 %v4137_v9 }
 0x2db   : > { %v5814_v53 = vpop.eup %5813 }
 0x2dc   : > { %v4121_v54 = vsel %vm4104_vm11, %v5814_v53, 0.0 }
 0x2df   : > { %v5816_v11 = vpop.eup %5815 }
 0x2e0   : > { %v4140_v46 = vsel %vm7913_vm14, %v5816_v11, %v4121_v54 }
 0x2e1   : > { %v4141_v3 = vmul.f32 %v4140_v46, %v3928_v61 }
 0x2e3   : > { %v4142_v39 = vmul.f32 %v4141_v3, %v4139_v45  ;;  %v7940_v44 = vrot.slane %v4141_v3, %v4146_v59 }
 0x2e5   : > { %v4143_v14 = vsub.f32 %v3929_v48, %v4142_v39  ;;  %v4148_v8 = vmul.f32 %v7940_v44, %v7653_v31  ;;  %v4149_v28 = vmul.f32 %v7940_v44, %v7661_v10  ;;  %v4150_v26 = vmul.f32 %v7940_v44, %v7650_v0 }
 0x2e6   : > { %v4151_v42 = vmul.f32 %v7940_v44, %v7658_v43  ;;  %v4152_v13 = vmul.f32 %v7940_v44, %v7684_v1  ;;  %v4153_v10 = vmul.f32 %v7940_v44, %v7692_v47  ;;  %v4154_v43 = vmul.f32 %v7940_v44, %v7681_v12 }
 0x2e7   : > { %v7942_v51 = vrot.slane %v4143_v14, %v4146_v59  ;;  %v4155_v24 = vmul.f32 %v7940_v44, %v7695_v18  ;;  %v4156_v21 = vmul.f32 %v7940_v44, %v7714_v23  ;;  %v4157_v37 = vmul.f32 %v7940_v44, %v7726_v20 }
 0x2e8   : > { %v4158_v35 = vmul.f32 %v7940_v44, %v7719_v36  ;;  %v4159_v9 = vmul.f32 %v7940_v44, %v7730_v58  ;;  %v4160_v11 = vmul.f32 %v7940_v44, %v7750_v25  ;;  %v4161_v61 = vmul.f32 %v7940_v44, %v7762_v60 }
 0x2e9   : > { %v7955_v17 = vadd.f32 %v7942_v51, %v4148_v8  ;;  %v7958_v19 = vadd.f32 %v7942_v51, %v4149_v28  ;;  %v7961_v31 = vadd.f32 %v7942_v51, %v4150_v26  ;;  %v7966_v0 = vadd.f32 %v7942_v51, %v4151_v42 }
 0x2ea   : > { %v7971_v1 = vadd.f32 %v7942_v51, %v4152_v13  ;;  %v7978_v33 = vadd.f32 %v7942_v51, %v4153_v10  ;;  %v7981_v47 = vadd.f32 %v7942_v51, %v4154_v43  ;;  %v7989_v18 = vadd.f32 %v7942_v51, %v4155_v24 }
 0x2eb   : > { %v4956_v29 = vmul.f32 -1.442695, %v7955_v17  ;;  %v4957_v4 = vmul.f32 -1.442695, %v7958_v19  ;;  %v4958_v12 = vmul.f32 -1.442695, %v7961_v31  ;;  %v7995_v5 = vadd.f32 %v7942_v51, %v4156_v21 }
 0x2ec   : > { %v4959_v23 = vmul.f32 -1.442695, %v7966_v0  ;;  %v4960_v41 = vmul.f32 -1.442695, %v7971_v1  ;;  %v8001_v53 = vadd.f32 %v7942_v51, %v4157_v37  ;;  %v4961_v20 = vmul.f32 -1.442695, %v7978_v33 }
 0x2ed   : > { %5817 = vpow2.f32 %v4956_v29  ;;  %v8007_v36 = vadd.f32 %v7942_v51, %v4158_v35  ;;  %v4962_v54 = vmul.f32 -1.442695, %v7981_v47  ;;  %v8013_v58 = vadd.f32 %v7942_v51, %v4159_v9 }
 0x2ee   : > { %5819 = vpow2.f32 %v4957_v4  ;;  %v4963_v46 = vmul.f32 -1.442695, %v7989_v18  ;;  %v4162_v3 = vmul.f32 %v7940_v44, %v7755_v30  ;;  %v8019_v25 = vadd.f32 %v7942_v51, %v4160_v11 }
 0x2ef   : > { %5821 = vpow2.f32 %v4958_v12  ;;  %v4964_v57 = vmul.f32 -1.442695, %v7995_v5  ;;  %v4163_v45 = vmul.f32 %v7940_v44, %v7766_v15  ;;  %v8025_v60 = vadd.f32 %v7942_v51, %v4161_v61 }
 0x2f0   : > { %5823 = vpow2.f32 %v4959_v23  ;;  %v4965_v39 = vmul.f32 -1.442695, %v8001_v53  ;;  %v4164_v48 = vmul.f32 %v7940_v44, %v7783_v7  ;;  %v8031_v30 = vadd.f32 %v7942_v51, %v4162_v3 }
 0x2f1   : > { %5825 = vpow2.f32 %v4960_v41  ;;  %v4966_v27 = vmul.f32 -1.442695, %v8007_v36  ;;  %v4165_v59 = vmul.f32 %v7940_v44, %v7794_v62  ;;  %v8037_v15 = vadd.f32 %v7942_v51, %v4163_v45 }
 0x2f2   : > { %5827 = vpow2.f32 %v4961_v20  ;;  %v4967_v14 = vmul.f32 -1.442695, %v8013_v58  ;;  %v4166_v8 = vmul.f32 %v7940_v44, %v7787_v32  ;;  %v8043_v7 = vadd.f32 %v7942_v51, %v4164_v48 }
 0x2f3   : > { %5829 = vpow2.f32 %v4962_v54  ;;  %v4968_v28 = vmul.f32 -1.442695, %v8019_v25  ;;  %v4167_v26 = vmul.f32 %v7940_v44, %v7798_v6  ;;  %v8049_v62 = vadd.f32 %v7942_v51, %v4165_v59 }
 0x2f4   : > { %5831 = vpow2.f32 %v4963_v46  ;;  %v4969_v42 = vmul.f32 -1.442695, %v8025_v60  ;;  %v4168_v32 = vmul.f32 %v7940_v44, %v7815_v34  ;;  %v8057_v10 = vadd.f32 %v7942_v51, %v4166_v8 }
 0x2f5   : > { %5833 = vpow2.f32 %v4964_v57  ;;  %v4970_v43 = vmul.f32 -1.442695, %v8031_v30  ;;  %v4169_v6 = vmul.f32 %v7940_v44, %v7826_v55  ;;  %v8065_v21 = vadd.f32 %v7942_v51, %v4167_v26 }
 0x2f6   : > { %5835 = vpow2.f32 %v4965_v39  ;;  %v4971_v29 = vmul.f32 -1.442695, %v8037_v15  ;;  %v4170_v34 = vmul.f32 %v7940_v44, %v7819_v63  ;;  %v8073_v12 = vadd.f32 %v7942_v51, %v4168_v32 }
 0x2f7   : > { %v8052_v13 = vpop.eup %5817  ;;  %5837 = vpow2.f32 %v4966_v27  ;;  %v4972_v37 = vmul.f32 -1.442695, %v8043_v7  ;;  %v4171_v55 = vmul.f32 %v7940_v44, %v7830_v16  ;;  %v8081_v35 = vadd.f32 %v7942_v51, %v4169_v6 }
 0x2f8   : > { %v8060_v24 = vpop.eup %5819  ;;  %5839 = vpow2.f32 %v4967_v14  ;;  %v4973_v41 = vmul.f32 -1.442695, %v8049_v62  ;;  %v4172_v63 = vmul.f32 %v7940_v44, %v7847_v22  ;;  %v8089_v20 = vadd.f32 %v7942_v51, %v4170_v34 }
 0x2f9   : > { %v8068_v4 = vpop.eup %5821  ;;  %5841 = vpow2.f32 %v4968_v28  ;;  %v4974_v11 = vmul.f32 -1.442695, %v8057_v10  ;;  %v4173_v16 = vmul.f32 %v7940_v44, %v7858_v56  ;;  %v8097_v61 = vadd.f32 %v7942_v51, %v4171_v55 }
 0x2fa   : > { %v8076_v23 = vpop.eup %5823  ;;  %5843 = vpow2.f32 %v4969_v42  ;;  %v4975_v46 = vmul.f32 -1.442695, %v8065_v21  ;;  %v4174_v22 = vmul.f32 %v7940_v44, %v7851_v38  ;;  %v8105_v57 = vadd.f32 %v7942_v51, %v4172_v63 }
 0x2fb   : > { %v8084_v9 = vpop.eup %5825  ;;  %5845 = vpow2.f32 %v4970_v43  ;;  %v4976_v45 = vmul.f32 -1.442695, %v8073_v12  ;;  %v4175_v56 = vmul.f32 %v7940_v44, %v7862_v40  ;;  %v8113_v48 = vadd.f32 %v7942_v51, %v4173_v16 }
 0x2fc   : > { %v8092_v54 = vpop.eup %5827  ;;  %5847 = vpow2.f32 %v4971_v29  ;;  %v4977_v27 = vmul.f32 -1.442695, %v8081_v35  ;;  %v4176_v38 = vmul.f32 %v7940_v44, %v7879_v52  ;;  %v8121_v14 = vadd.f32 %v7942_v51, %v4174_v22 }
 0x2fd   : > { %v8100_v3 = vpop.eup %5829  ;;  %5849 = vpow2.f32 %v4972_v37  ;;  %v4978_v8 = vmul.f32 -1.442695, %v8089_v20  ;;  %v4177_v40 = vmul.f32 %v7940_v44, %v7890_v2  ;;  %v8127_v26 = vadd.f32 %v7942_v51, %v4175_v56 }
 0x2fe   : > { %v8108_v39 = vpop.eup %5831  ;;  %5851 = vpow2.f32 %v4973_v41  ;;  %v4979_v42 = vmul.f32 -1.442695, %v8097_v61  ;;  %v4178_v52 = vmul.f32 %v7940_v44, %v7883_v49  ;;  %v8133_v43 = vadd.f32 %v7942_v51, %v4176_v38 }
 0x2ff   : > { %v8116_v59 = vpop.eup %5833  ;;  %5853 = vpow2.f32 %v4974_v11  ;;  %v4980_v6 = vmul.f32 -1.442695, %v8105_v57  ;;  %v4179_v2 = vmul.f32 %v7940_v44, %v7894_v50  ;;  %v8139_v34 = vadd.f32 %v7942_v51, %v4177_v40 }
 0x300   : > { %v5836_v28 = vpop.eup %5835  ;;  %5855 = vpow2.f32 %v4975_v46  ;;  %v4981_v37 = vmul.f32 -1.442695, %v8113_v48  ;;  %v8143_v41 = vadd.f32 %v7942_v51, %v4178_v52  ;;  %v4982_v49 = vmul.f32 -1.442695, %v8121_v14 }
 0x301   : > { %v5838_v32 = vpop.eup %5837  ;;  %5857 = vpow2.f32 %v4976_v45  ;;  %v8147_v11 = vadd.f32 %v7942_v51, %v4179_v2  ;;  %v4983_v50 = vmul.f32 -1.442695, %v8127_v26  ;;  %v4984_v16 = vmul.f32 -1.442695, %v8133_v43 }
 0x302   : > { %v5840_v29 = vpop.eup %5839  ;;  %5859 = vpow2.f32 %v4977_v27  ;;  %8898 = vst [vmem:[#allocation51_spill] sm:$0xff] %v8143_v41  ;;  %v4985_v22 = vmul.f32 -1.442695, %v8139_v34  ;;  %v4986_v56 = vmul.f32 -1.442695, %v8143_v41 }
 0x303   : > { %v5842_v55 = vpop.eup %5841  ;;  %5861 = vpow2.f32 %v4978_v8  ;;  %8899 = vst [vmem:[#allocation4_spill] sm:$0xff] %v8147_v11  ;;  %v4987_v51 = vmul.f32 -1.442695, %v8147_v11  ;;  %v4314_v8 = vadd.f32 1.0, %v8052_v13 }
 0x304   : > { %v5844_v63 = vpop.eup %5843  ;;  %5863 = vpow2.f32 %v4979_v42  ;;  %v4315_v42 = vadd.f32 1.0, %v8060_v24 }
 0x305   : > { %v5846_v44 = vpop.eup %5845  ;;  %5865 = vpow2.f32 %v4980_v6  ;;  %v4316_v6 = vadd.f32 1.0, %v8068_v4 }
 0x306   : > { %v5848_v46 = vpop.eup %5847  ;;  %5867 = vpow2.f32 %v4981_v37  ;;  %v4317_v37 = vadd.f32 1.0, %v8076_v23 }
 0x307   : > { %v5850_v45 = vpop.eup %5849  ;;  %5869 = vpow2.f32 %v4982_v49  ;;  %v4329_v41 = vadd.f32 1.0, %v5848_v46 }
 0x308   : > { %v5852_v27 = vpop.eup %5851  ;;  %5871 = vpow2.f32 %v4983_v50  ;;  %v4318_v50 = vadd.f32 1.0, %v8084_v9  ;;  %v4322_v9 = vadd.f32 1.0, %v8116_v59  ;;  %v4327_v59 = vadd.f32 1.0, %v5844_v63 }
 0x309   : > { %v5854_v38 = vpop.eup %5853  ;;  %5873 = vpow2.f32 %v4984_v16  ;;  %v4319_v16 = vadd.f32 1.0, %v8092_v54  ;;  %v4323_v54 = vadd.f32 1.0, %v5836_v28  ;;  %v4328_v28 = vadd.f32 1.0, %v5846_v44 }
 0x30a   : > { %v8155_v40 = vpop.eup %5855  ;;  %5875 = vpow2.f32 %v4985_v22  ;;  %v4320_v22 = vadd.f32 1.0, %v8100_v3  ;;  %v4331_v44 = vadd.f32 1.0, %v5852_v27 }
 0x30b   : > { %v8158_v52 = vpop.eup %5857  ;;  %5877 = vpow2.f32 %v4986_v56  ;;  %v4321_v56 = vadd.f32 1.0, %v8108_v39 }
 0x30c   : > { %v8161_v2 = vpop.eup %5859  ;;  %5879 = vpow2.f32 %v4987_v51 }
 0x30d   : > { %v8164_v49 = vpop.eup %5861  ;;  %5881 = vrcp.f32 %v4314_v8 }
 0x30e   : > { %v8167_v13 = vpop.eup %5863  ;;  %5883 = vrcp.f32 %v4315_v42  ;;  %v4324_v42 = vadd.f32 1.0, %v5838_v32 }
 0x30f   : > { %v8170_v24 = vpop.eup %5865  ;;  %5885 = vrcp.f32 %v4316_v6  ;;  %v4325_v6 = vadd.f32 1.0, %v5840_v29  ;;  %v4330_v29 = vadd.f32 1.0, %v5850_v45  ;;  %v4333_v45 = vadd.f32 1.0, %v8155_v40 }
 0x310   : > { %v8173_v4 = vpop.eup %5867  ;;  %5887 = vrcp.f32 %v4317_v37  ;;  %v4326_v37 = vadd.f32 1.0, %v5842_v55  ;;  %v4335_v40 = vadd.f32 1.0, %v8161_v2  ;;  %v4337_v2 = vadd.f32 1.0, %v8167_v13 }
 0x311   : > { %v8176_v23 = vpop.eup %5869  ;;  %5889 = vrcp.f32 %v4318_v50  ;;  %v4339_v13 = vadd.f32 1.0, %v8173_v4 }
 0x312   : > { %v8179_v51 = vpop.eup %5871  ;;  %5891 = vrcp.f32 %v4319_v16 }
 0x313   : > { %v8181_v8 = vpop.eup %5873  ;;  %5893 = vrcp.f32 %v4320_v22  ;;  %v4341_v4 = vadd.f32 1.0, %v8179_v51 }
 0x314   : > { %v8183_v3 = vpop.eup %5875  ;;  %5895 = vrcp.f32 %v4321_v56 }
 0x315   : > { %v8185_v39 = vpop.eup %5877  ;;  %5897 = vrcp.f32 %v4322_v9  ;;  %v4343_v51 = vadd.f32 1.0, %v8183_v3 }
 0x316   : > { %v8187_v11 = vpop.eup %5879  ;;  %5899 = vrcp.f32 %v4323_v54 }
 0x317   : > { %v5882_v50 = vpop.eup %5881  ;;  %5901 = vrcp.f32 %v4324_v42  ;;  %v4345_v3 = vadd.f32 1.0, %v8187_v11 }
 0x318   : > { %v5884_v16 = vpop.eup %5883  ;;  %5903 = vrcp.f32 %v4325_v6  ;;  %v4410_v32 = vmul.f32 %v5882_v50, %v7955_v17  ;;  %v4332_v17 = vadd.f32 1.0, %v5854_v38 }
 0x319   : > { %v5886_v22 = vpop.eup %5885  ;;  %5905 = vrcp.f32 %v4326_v37  ;;  %v4411_v55 = vmul.f32 %v5884_v16, %v7958_v19 }
 0x31a   : > { %v5888_v63 = vpop.eup %5887  ;;  %5907 = vrcp.f32 %v4327_v59  ;;  %v4412_v46 = vmul.f32 %v5886_v22, %v7961_v31  ;;  %v5023_v56 = vpack.c.bf16 %v4410_v32, %v4410_v32  ;;  %v4334_v31 = vadd.f32 1.0, %v8158_v52 }
 0x31b   : > { %v5890_v9 = vpop.eup %5889  ;;  %5909 = vrcp.f32 %v4328_v28  ;;  %v4413_v54 = vmul.f32 %v5888_v63, %v7966_v0  ;;  %v5024_v42 = vpack.c.bf16 %v4411_v55, %v4411_v55  ;;  %v4336_v52 = vadd.f32 1.0, %v8164_v49 }
 0x31c   : > { %v5892_v6 = vpop.eup %5891  ;;  %5911 = vrcp.f32 %v4329_v41  ;;  %v4414_v19 = vmul.f32 %v5890_v9, %v7971_v1  ;;  %v5025_v37 = vpack.c.bf16 %v4412_v46, %v4412_v46  ;;  %4571 = vst.msk [vmem:[%s8194_s30] sm:$0xf] %vm4570_vm13, %v5023_v56  ;;  %v4338_v49 = vadd.f32 1.0, %v8170_v24 }
 0x31d   : > { %v5894_v27 = vpop.eup %5893  ;;  %5913 = vrcp.f32 %v4330_v29  ;;  %v4415_v38 = vmul.f32 %v5892_v6, %v7978_v33  ;;  %v5026_v59 = vpack.c.bf16 %v4413_v54, %v4413_v54  ;;  %4572 = vst.msk [vmem:[%s8194_s30 + $0x4] sm:$0xf] %vm4570_vm13, %v5024_v42  ;;  %v4340_v24 = vadd.f32 1.0, %v8176_v23 }
 0x31e   : > { %v5896_v0 = vpop.eup %5895  ;;  %5915 = vrcp.f32 %v4331_v44  ;;  %v4416_v1 = vmul.f32 %v5894_v27, %v7981_v47  ;;  %v5027_v41 = vpack.c.bf16 %v4414_v19, %v4414_v19  ;;  %4573 = vst.msk [vmem:[%s8194_s30 + $0x8] sm:$0xf] %vm4570_vm13, %v5025_v37  ;;  %v4342_v23 = vadd.f32 1.0, %v8181_v8 }
 0x31f   : > { %v5898_v50 = vpop.eup %5897  ;;  %5917 = vrcp.f32 %v4332_v17  ;;  %v4417_v33 = vmul.f32 %v5896_v0, %v7989_v18  ;;  %v5028_v28 = vpack.c.bf16 %v4415_v38, %v4415_v38  ;;  %4574 = vst.msk [vmem:[%s8194_s30 + $0xc] sm:$0xf] %vm4570_vm13, %v5026_v59  ;;  %v4344_v8 = vadd.f32 1.0, %v8185_v39 }
 0x320   : > { %v5900_v16 = vpop.eup %5899  ;;  %5919 = vrcp.f32 %v4333_v45  ;;  %v4418_v47 = vmul.f32 %v5898_v50, %v7995_v5  ;;  %v5029_v32 = vpack.c.bf16 %v4416_v1, %v4416_v1  ;;  %4575 = vst.msk [vmem:[%s8194_s30 + $0x10] sm:$0xf] %vm4570_vm13, %v5027_v41 }
 0x321   : > { %v5902_v22 = vpop.eup %5901  ;;  %5921 = vrcp.f32 %v4334_v31  ;;  %v4419_v18 = vmul.f32 %v5900_v16, %v8001_v53  ;;  %v5030_v29 = vpack.c.bf16 %v4417_v33, %v4417_v33  ;;  %4576 = vst.msk [vmem:[%s8194_s30 + $0x14] sm:$0xf] %vm4570_vm13, %v5028_v28 }
 0x322   : > { %v5904_v55 = vpop.eup %5903  ;;  %5923 = vrcp.f32 %v4335_v40  ;;  %v4420_v5 = vmul.f32 %v5902_v22, %v8007_v36  ;;  %v5031_v63 = vpack.c.bf16 %v4418_v47, %v4418_v47  ;;  %4577 = vst.msk [vmem:[%s8194_s30 + $0x18] sm:$0xf] %vm4570_vm13, %v5029_v32 }
 0x323   : > { %v5906_v44 = vpop.eup %5905  ;;  %5925 = vrcp.f32 %v4336_v52  ;;  %v4421_v53 = vmul.f32 %v5904_v55, %v8013_v58  ;;  %v5032_v46 = vpack.c.bf16 %v4419_v18, %v4419_v18  ;;  %4578 = vst.msk [vmem:[%s8194_s30 + $0x1c] sm:$0xf] %vm4570_vm13, %v5030_v29 }
 0x324   : > { %v5908_v56 = vpop.eup %5907  ;;  %5927 = vrcp.f32 %v4337_v2  ;;  %v4422_v36 = vmul.f32 %v5906_v44, %v8019_v25  ;;  %v5033_v9 = vpack.c.bf16 %v4420_v5, %v4420_v5  ;;  %4579 = vst.msk [vmem:[%s8194_s30 + $0x20] sm:$0xf] %vm4570_vm13, %v5031_v63 }
 0x325   : > { %v5910_v17 = vpop.eup %5909  ;;  %5929 = vrcp.f32 %v4338_v49  ;;  %v4423_v58 = vmul.f32 %v5908_v56, %v8025_v60  ;;  %v5034_v54 = vpack.c.bf16 %v4421_v53, %v4421_v53  ;;  %4580 = vst.msk [vmem:[%s8194_s30 + $0x24] sm:$0xf] %vm4570_vm13, %v5032_v46  ;;  %v8900_v53 = vld [vmem:[#allocation51_spill] sm:$0xff] }
 0x326   : > { %v5912_v42 = vpop.eup %5911  ;;  %5931 = vrcp.f32 %v4339_v13  ;;  %v4424_v25 = vmul.f32 %v5910_v17, %v8031_v30  ;;  %v5035_v6 = vpack.c.bf16 %v4422_v36, %v4422_v36  ;;  %4581 = vst.msk [vmem:[%s8194_s30 + $0x28] sm:$0xf] %vm4570_vm13, %v5033_v9 }
 0x327   : > { %v5914_v45 = vpop.eup %5913  ;;  %5933 = vrcp.f32 %v4340_v24  ;;  %v4425_v60 = vmul.f32 %v5912_v42, %v8037_v15  ;;  %v5036_v19 = vpack.c.bf16 %v4423_v58, %v4423_v58  ;;  %4582 = vst.msk [vmem:[%s8194_s30 + $0x2c] sm:$0xf] %vm4570_vm13, %v5034_v54 }
 0x328   : > { %v5916_v37 = vpop.eup %5915  ;;  %5935 = vrcp.f32 %v4341_v4  ;;  %v4426_v30 = vmul.f32 %v5914_v45, %v8043_v7  ;;  %v5037_v27 = vpack.c.bf16 %v4424_v25, %v4424_v25  ;;  %4583 = vst.msk [vmem:[%s8194_s30 + $0x30] sm:$0xf] %vm4570_vm13, %v5035_v6  ;;  %v8901_v4 = vld [vmem:[#allocation4_spill] sm:$0xff] }
 0x329   : > { %v5918_v31 = vpop.eup %5917  ;;  %5937 = vrcp.f32 %v4342_v23  ;;  %v4427_v39 = vmul.f32 %v5916_v37, %v8049_v62  ;;  %v5038_v38 = vpack.c.bf16 %v4425_v60, %v4425_v60  ;;  %4584 = vst.msk [vmem:[%s8194_s30 + $0x34] sm:$0xf] %vm4570_vm13, %v5036_v19 }
 0x32a   : > { %v5920_v15 = vpop.eup %5919  ;;  %5939 = vrcp.f32 %v4343_v51  ;;  %v4428_v59 = vmul.f32 %v5918_v31, %v8057_v10  ;;  %v5039_v11 = vpack.c.bf16 %v4426_v30, %v4426_v30  ;;  %4585 = vst.msk [vmem:[%s8194_s30 + $0x38] sm:$0xf] %vm4570_vm13, %v5037_v27 }
 0x32b   : > { %v5922_v7 = vpop.eup %5921  ;;  %5941 = vrcp.f32 %v4344_v8  ;;  %v4429_v0 = vmul.f32 %v5920_v15, %v8065_v21  ;;  %v5040_v40 = vpack.c.bf16 %v4427_v39, %v4427_v39  ;;  %4586 = vst.msk [vmem:[%s8194_s30 + $0x3c] sm:$0xf] %vm4570_vm13, %v5038_v38 }
 0x32c   : > { %v5924_v62 = vpop.eup %5923  ;;  %5943 = vrcp.f32 %v4345_v3  ;;  %v4430_v1 = vmul.f32 %v5922_v7, %v8073_v12  ;;  %v5041_v41 = vpack.c.bf16 %v4428_v59, %v4428_v59  ;;  %4587 = vst.msk [vmem:[%s8194_s30 + $0x40] sm:$0xf] %vm4570_vm13, %v5039_v11 }
 0x32d   : > { %v5926_v10 = vpop.eup %5925  ;;  %v4431_v50 = vmul.f32 %v5924_v62, %v8081_v35  ;;  %v5042_v52 = vpack.c.bf16 %v4429_v0, %v4429_v0  ;;  %4588 = vst.msk [vmem:[%s8194_s30 + $0x44] sm:$0xf] %vm4570_vm13, %v5040_v40 }
 0x32e   : > { %v5928_v21 = vpop.eup %5927  ;;  %v4432_v33 = vmul.f32 %v5926_v10, %v8089_v20  ;;  %v5043_v28 = vpack.c.bf16 %v4430_v1, %v4430_v1  ;;  %4589 = vst.msk [vmem:[%s8194_s30 + $0x48] sm:$0xf] %vm4570_vm13, %v5041_v41 }
 0x32f   : > { %v5930_v16 = vpop.eup %5929  ;;  %v4433_v12 = vmul.f32 %v5928_v21, %v8097_v61  ;;  %v5044_v2 = vpack.c.bf16 %v4431_v50, %v4431_v50  ;;  %4590 = vst.msk [vmem:[%s8194_s30 + $0x4c] sm:$0xf] %vm4570_vm13, %v5042_v52 }
 0x330   : > { %v5932_v47 = vpop.eup %5931  ;;  %v4434_v35 = vmul.f32 %v5930_v16, %v8105_v57  ;;  %v5045_v32 = vpack.c.bf16 %v4432_v33, %v4432_v33  ;;  %4591 = vst.msk [vmem:[%s8194_s30 + $0x50] sm:$0xf] %vm4570_vm13, %v5043_v28 }
 0x331   : > { %v5934_v22 = vpop.eup %5933  ;;  %v4435_v20 = vmul.f32 %v5932_v47, %v8113_v48  ;;  %v5046_v49 = vpack.c.bf16 %v4433_v12, %v4433_v12  ;;  %4592 = vst.msk [vmem:[%s8194_s30 + $0x54] sm:$0xf] %vm4570_vm13, %v5044_v2 }
 0x332   : > { %v5936_v18 = vpop.eup %5935  ;;  %v4436_v61 = vmul.f32 %v5934_v22, %v8121_v14  ;;  %v5047_v29 = vpack.c.bf16 %v4434_v35, %v4434_v35  ;;  %4593 = vst.msk [vmem:[%s8194_s30 + $0x58] sm:$0xf] %vm4570_vm13, %v5045_v32 }
 0x333   : > { %v5938_v55 = vpop.eup %5937  ;;  %v4437_v57 = vmul.f32 %v5936_v18, %v8127_v26  ;;  %v5048_v13 = vpack.c.bf16 %v4435_v20, %v4435_v20  ;;  %4594 = vst.msk [vmem:[%s8194_s30 + $0x5c] sm:$0xf] %vm4570_vm13, %v5046_v49 }
 0x334   : > { %v5940_v5 = vpop.eup %5939  ;;  %v4438_v48 = vmul.f32 %v5938_v55, %v8133_v43  ;;  %v5049_v63 = vpack.c.bf16 %v4436_v61, %v4436_v61  ;;  %4595 = vst.msk [vmem:[%s8194_s30 + $0x60] sm:$0xf] %vm4570_vm13, %v5047_v29 }
 0x335   : > { %v5942_v14 = vpop.eup %5941  ;;  %v4439_v44 = vmul.f32 %v5940_v5, %v8139_v34  ;;  %v5050_v24 = vpack.c.bf16 %v4437_v57, %v4437_v57  ;;  %4596 = vst.msk [vmem:[%s8194_s30 + $0x64] sm:$0xf] %vm4570_vm13, %v5048_v13 }
 0x336   : > { %v5944_v26 = vpop.eup %5943  ;;  %v4440_v46 = vmul.f32 %v5942_v14, %v8900_v53  ;;  %v5051_v56 = vpack.c.bf16 %v4438_v48, %v4438_v48  ;;  %4597 = vst.msk [vmem:[%s8194_s30 + $0x68] sm:$0xf] %vm4570_vm13, %v5049_v63 }
 0x337   : > { %v4441_v43 = vmul.f32 %v5944_v26, %v8901_v4  ;;  %v5052_v36 = vpack.c.bf16 %v4439_v44, %v4439_v44  ;;  %4598 = vst.msk [vmem:[%s8194_s30 + $0x6c] sm:$0xf] %vm4570_vm13, %v5050_v24 }
 0x338   : > { %v5053_v9 = vpack.c.bf16 %v4440_v46, %v4440_v46  ;;  %4599 = vst.msk [vmem:[%s8194_s30 + $0x70] sm:$0xf] %vm4570_vm13, %v5051_v56 }
 0x339   : > { %v5054_v17 = vpack.c.bf16 %v4441_v43, %v4441_v43  ;;  %4600 = vst.msk [vmem:[%s8194_s30 + $0x74] sm:$0xf] %vm4570_vm13, %v5052_v36 }
 0x33a   : > { %4601 = vst.msk [vmem:[%s8194_s30 + $0x78] sm:$0xf] %vm4570_vm13, %v5053_v9 }
 0x33b   : > { %4602 = vst.msk [vmem:[%s8194_s30 + $0x7c] sm:$0xf] %vm4570_vm13, %v5054_v17 }
 0x33c PF: > { %s15_s18 = sadd.s32 1, %s5985_s18  }
 0x33d   : > { %p12_p4 = scmp.ge.s32.totalorder %s15_s18, 4  }
 0x33f   :  { %14 = sbr.rel (!%p12_p4) target bundleno = 1 (0x1), region = 78 }

</bundles_post_ra>
